<compile_context>
chip_gen: v7x
topology: tpu7x:2x2x1
jax: 0.10.0
libtpu: 0.0.40
codegen_flags: <defaults>
</compile_context>

<pallas_src>
import functools

import jax
import jax.numpy as jnp
from jax import lax
from jax.experimental import pallas as pl
from jax.experimental.pallas import tpu as pltpu

EPS = 1e-5

# Set to jnp.bfloat16 on v6e/v7x for ~2x MXU throughput (accumulation stays
# f32 via preferred_element_type).  Kept f32 here so the strict f32 reference
# check below passes bit-tightly.
MATMUL_DTYPE = jnp.float32


def _shift_rows(x, s):
    """out[p] = x[p + s] with zero fill for out-of-range rows (s is static).

    On the flattened (H*W, C) operand this is a pure sublane shift (same XLU
    path as pltpu.roll) instead of a misaligned 4-D slice + reshape relayout.
    """
    if s == 0:
        return x
    pad = jnp.zeros((abs(s), x.shape[1]), x.dtype)
    if s > 0:
        return jnp.concatenate([x[s:], pad], axis=0)
    return jnp.concatenate([pad, x[:s]], axis=0)


def _conv3x3_stats_kernel(x_ref, s_ref, t_ref, w_ref, y_ref, st_ref,
                          *, H, W, apply_prelu):
    """One image: (optional fused BN-affine+ReLU) -> 3x3 conv -> partial BN stats.

    x_ref:  (1, H*W, Cin)   flattened NHWC image tile
    s_ref:  (1, Cin)        per-channel scale of the *previous* BN (or ones)
    t_ref:  (1, Cin)        per-channel shift of the *previous* BN (or zeros)
    w_ref:  (3, 3, Cin, Cout) HWIO conv weights
    y_ref:  (1, H*W, Cout)  pre-BN conv output
    st_ref: (1, 2, Cout)    [channel mean, centered sum-of-squares] of this tile
    """
    HW = H * W
    Cout = w_ref.shape[-1]

    x = x_ref[0]                                           # (HW, Cin) f32
    if apply_prelu:
        # Previous stage's BatchNorm affine + ReLU fused on the fly (single
        # FMA + max pass) -- no extra HBM round trip for the normalized tensor.
        x = jnp.maximum(x * s_ref[...] + t_ref[...], 0.0)

    # Column index of every flattened spatial position, for zero-padding the
    # horizontal halo (vertical halo is handled by the zero fill in the shift).
    w_idx = lax.broadcasted_iota(jnp.int32, (HW, 1), 0) % W

    acc = jnp.zeros((HW, Cout), jnp.float32)
    for dy in (-1, 0, 1):
        for dx in (-1, 0, 1):
            tap = _shift_rows(x, dy * W + dx)              # (HW, Cin)
            if dx != 0:
                valid = (w_idx + dx >= 0) & (w_idx + dx < W)
                tap = jnp.where(valid, tap, 0.0)
            wk = w_ref[dy + 1, dx + 1]                     # (Cin, Cout)
            acc = acc + jnp.dot(tap.astype(MATMUL_DTYPE),
                                wk.astype(MATMUL_DTYPE),
                                preferred_element_type=jnp.float32)

    y_ref[0] = acc

    # Per-tile partial BatchNorm statistics (combined across the batch outside
    # the kernel): channel mean and centered sum of squares.
    mean = jnp.mean(acc, axis=0, keepdims=True)            # (1, Cout)
    c = acc - mean
    m2 = jnp.sum(c * c, axis=0, keepdims=True)             # (1, Cout)
    st_ref[0] = jnp.concatenate([mean, m2], axis=0)        # (2, Cout)


def _affine_relu_kernel(y_ref, s_ref, t_ref, o_ref):
    """Final fused BatchNorm affine + ReLU: out = max(y * s + t, 0)."""
    o_ref[0] = jnp.maximum(y_ref[0] * s_ref[...] + t_ref[...], 0.0)


def _conv3x3_pass(x, s_pre, t_pre, w, H, W, *, apply_prelu):
    """Tiled (grid over batch) conv pass; returns pre-BN output + partial stats."""
    N, HW, Cin = x.shape
    Cout = w.shape[-1]
    kernel = functools.partial(_conv3x3_stats_kernel, H=H, W=W,
                               apply_prelu=apply_prelu)
    # Per-step VMEM footprint is a few KiB here; for large row tiles raise
    # pltpu.CompilerParams(vmem_limit_bytes=...) per generation (v6e ~96 MiB,
    # v7x ~48 MiB with double buffering).
    return pl.pallas_call(
        kernel,
        grid=(N,),
        in_specs=[
            pl.BlockSpec((1, HW, Cin), lambda n: (n, 0, 0)),
            pl.BlockSpec((1, Cin), lambda n: (0, 0)),
            pl.BlockSpec((1, Cin), lambda n: (0, 0)),
            pl.BlockSpec((3, 3, Cin, Cout), lambda n: (0, 0, 0, 0)),
        ],
        out_specs=(
            pl.BlockSpec((1, HW, Cout), lambda n: (n, 0, 0)),
            pl.BlockSpec((1, 2, Cout), lambda n: (n, 0, 0)),
        ),
        out_shape=(
            jax.ShapeDtypeStruct((N, HW, Cout), jnp.float32),
            jax.ShapeDtypeStruct((N, 2, Cout), jnp.float32),
        ),
        compiler_params=pltpu.CompilerParams(
            dimension_semantics=("parallel",)),
    )(x, s_pre, t_pre, w)


def _affine_relu_pass(y, s, t):
    N, HW, C = y.shape
    return pl.pallas_call(
        _affine_relu_kernel,
        grid=(N,),
        in_specs=[
            pl.BlockSpec((1, HW, C), lambda n: (n, 0, 0)),
            pl.BlockSpec((1, C), lambda n: (0, 0)),
            pl.BlockSpec((1, C), lambda n: (0, 0)),
        ],
        out_specs=pl.BlockSpec((1, HW, C), lambda n: (n, 0, 0)),
        out_shape=jax.ShapeDtypeStruct((N, HW, C), jnp.float32),
        compiler_params=pltpu.CompilerParams(
            dimension_semantics=("parallel",)),
    )(y, s, t)


def _bn_scale_shift(stats, gamma, beta, count_per_tile, n_tiles):
    """Combine per-tile (mean, M2) into global BN scale/shift (O(C) work)."""
    means = stats[:, 0, :]                                 # (N, C)
    m2s = stats[:, 1, :]                                   # (N, C)
    mean = jnp.mean(means, axis=0)                         # equal-sized tiles
    # Chan's parallel-variance combination -> avoids E[x^2]-E[x]^2 cancellation.
    m2 = jnp.sum(m2s, axis=0) + count_per_tile * jnp.sum((means - mean) ** 2, axis=0)
    var = m2 / (n_tiles * count_per_tile)                  # biased, BN training mode
    s = gamma * lax.rsqrt(var + EPS)
    t = beta - mean * s
    return s.reshape(1, -1), t.reshape(1, -1)


def double_conv(x_nchw, params):
    """x_nchw: (N, Cin, H, W) float32 -> (N, Cout, H, W) float32."""
    # b1/b2 are accepted but never touch the data: a conv bias followed by
    # train-mode BatchNorm cancels exactly.
    w1, b1, g1, bt1, w2, b2, g2, bt2 = params
    N, Cin, H, W = x_nchw.shape
    Cmid = w1.shape[-1]
    Cout = w2.shape[-1]

    # NCHW -> NHWC (boundary layout change only; free reshape to (N, H*W, C)).
    x = jnp.transpose(x_nchw, (0, 2, 3, 1)).astype(jnp.float32).reshape(N, H * W, Cin)

    ones_in = jnp.ones((1, Cin), jnp.float32)
    zeros_in = jnp.zeros((1, Cin), jnp.float32)

    # Pass 1: conv1 (no bias) + per-tile BN1 partial statistics.
    y1, st1 = _conv3x3_pass(x, ones_in, zeros_in, w1, H, W, apply_prelu=False)
    s1, t1 = _bn_scale_shift(st1, g1, bt1, H * W, N)

    # Pass 2: fused BN1-affine + ReLU, then conv2 + per-tile BN2 partial stats.
    y2, st2 = _conv3x3_pass(y1, s1, t1, w2, H, W, apply_prelu=True)
    s2, t2 = _bn_scale_shift(st2, g2, bt2, H * W, N)

    # Pass 3: fused BN2-affine + ReLU.
    out = _affine_relu_pass(y2, s2, t2)

    return jnp.transpose(out.reshape(N, H, W, Cout), (0, 3, 1, 2))


def init_params(key, Cin, Cmid, Cout):
    ks = jax.random.split(key, 8)
    w1 = 0.1 * jax.random.normal(ks[0], (3, 3, Cin, Cmid), jnp.float32)
    b1 = 0.1 * jax.random.normal(ks[1], (Cmid,), jnp.float32)
    g1 = 1.0 + 0.1 * jax.random.normal(ks[2], (Cmid,), jnp.float32)
    bt1 = 0.1 * jax.random.normal(ks[3], (Cmid,), jnp.float32)
    w2 = 0.1 * jax.random.normal(ks[4], (3, 3, Cmid, Cout), jnp.float32)
    b2 = 0.1 * jax.random.normal(ks[5], (Cout,), jnp.float32)
    g2 = 1.0 + 0.1 * jax.random.normal(ks[6], (Cout,), jnp.float32)
    bt2 = 0.1 * jax.random.normal(ks[7], (Cout,), jnp.float32)
    return (w1, b1, g1, bt1, w2, b2, g2, bt2)


def reference(x_nchw, params):
    """Pure-JAX reference (XLA conv, biases included, train-mode BN)."""
    w1, b1, g1, bt1, w2, b2, g2, bt2 = params
    x = jnp.transpose(x_nchw, (0, 2, 3, 1))

    def conv(a, w, b):
        return lax.conv_general_dilated(
            a, w, (1, 1), 'SAME',
            dimension_numbers=('NHWC', 'HWIO', 'NHWC')) + b

    def bn_relu(a, g, bt):
        m = jnp.mean(a, axis=(0, 1, 2), keepdims=True)
        v = jnp.mean((a - m) ** 2, axis=(0, 1, 2), keepdims=True)
        return jnp.maximum((a - m) / jnp.sqrt(v + EPS) * g + bt, 0.0)

    y = bn_relu(conv(x, w1, b1), g1, bt1)
    z = bn_relu(conv(y, w2, b2), g2, bt2)
    return jnp.transpose(z, (0, 3, 1, 2))


if __name__ == "__main__":
    N, Cin, Cmid, Cout, H, W = 2, 4, 8, 8, 16, 16

    key = jax.random.PRNGKey(0)
    kx, kp = jax.random.split(key)
    x = jax.random.normal(kx, (N, Cin, H, W), jnp.float32)
    params = init_params(kp, Cin, Cmid, Cout)

    out = jax.jit(double_conv)(x, params)
    out = jax.block_until_ready(out)

    ref = reference(x, params)
    assert out.shape == (N, Cout, H, W)
    max_err = float(jnp.max(jnp.abs(out - ref)))
    assert jnp.allclose(out, ref, atol=2e-4, rtol=2e-4), max_err

    print("KERNEL_OK")
</pallas_src>

<mosaic_0001>
module attributes {stable_mosaic.version = 11 : i64} {
  func.func @_conv3x3_stats_kernel(%arg0: i32, %arg1: memref<1x256x4xf32, #tpu.memory_space<vmem>>, %arg2: memref<1x4xf32, #tpu.memory_space<vmem>>, %arg3: memref<1x4xf32, #tpu.memory_space<vmem>>, %arg4: memref<3x3x4x8xf32, #tpu.memory_space<vmem>>, %arg5: memref<1x256x8xf32, #tpu.memory_space<vmem>>, %arg6: memref<1x2x8xf32, #tpu.memory_space<vmem>>) attributes {dimension_semantics = [#tpu.dimension_semantics<parallel>], iteration_bounds = array<i64: 2>, scalar_prefetch = 0 : i64, scratch_operands = 0 : i64, tpu.core_type = #tpu.core_type<tc>, window_params = [{transform_indices = @transform_0, window_bounds = array<i64: 1, 256, 4>}, {pipeline_mode = #tpu.pipeline_mode<synchronous>, transform_indices = @transform_1, window_bounds = array<i64: 1, 4>}, {pipeline_mode = #tpu.pipeline_mode<synchronous>, transform_indices = @transform_2, window_bounds = array<i64: 1, 4>}, {pipeline_mode = #tpu.pipeline_mode<synchronous>, transform_indices = @transform_3, window_bounds = array<i64: 3, 3, 4, 8>}, {transform_indices = @transform_4, window_bounds = array<i64: 1, 256, 8>}, {transform_indices = @transform_5, window_bounds = array<i64: 1, 2, 8>}]} {
    %c0 = arith.constant 0 : index
    %c0_0 = arith.constant 0 : index
    %c0_1 = arith.constant 0 : index
    %0 = vector.load %arg1[%c0, %c0_0, %c0_1] : memref<1x256x4xf32, #tpu.memory_space<vmem>>, vector<1x256x4xf32>
    %1 = vector.shape_cast %0 : vector<1x256x4xf32> to vector<256x4xf32>
    %2 = tpu.iota {dimensions = array<i32: 0>} : vector<256x1xi32>
    %c16_i32 = arith.constant 16 : i32
    %c0_i32 = arith.constant 0 : i32
    %3 = arith.cmpi eq, %c16_i32, %c0_i32 : i32
    %c1_i32 = arith.constant 1 : i32
    %4 = arith.select %3, %c1_i32, %c16_i32 : i32
    %5 = vector.broadcast %4 : i32 to vector<256x1xi32>
    %6 = arith.remsi %2, %5 : vector<256x1xi32>
    %c0_i32_2 = arith.constant 0 : i32
    %7 = vector.broadcast %c0_i32_2 : i32 to vector<256x1xi32>
    %8 = arith.cmpi ne, %6, %7 : vector<256x1xi32>
    %c0_i32_3 = arith.constant 0 : i32
    %9 = vector.broadcast %c0_i32_3 : i32 to vector<256x1xi32>
    %10 = arith.cmpi slt, %6, %9 : vector<256x1xi32>
    %c0_i32_4 = arith.constant 0 : i32
    %11 = arith.cmpi slt, %4, %c0_i32_4 : i32
    %12 = vector.broadcast %11 : i1 to vector<256x1xi1>
    %13 = vector.broadcast %12 : vector<256x1xi1> to vector<256x1xi1>
    %14 = arith.xori %10, %13 : vector<256x1xi1>
    %15 = arith.andi %14, %8 : vector<256x1xi1>
    %16 = vector.broadcast %4 : i32 to vector<256x1xi32>
    %17 = arith.addi %6, %16 : vector<256x1xi32>
    %18 = arith.select %15, %17, %6 : vector<256x1xi1>, vector<256x1xi32>
    %cst = arith.constant 0.000000e+00 : f32
    %19 = vector.broadcast %cst : f32 to vector<256x8xf32>
    %cst_5 = arith.constant 0.000000e+00 : f32
    %20 = vector.broadcast %cst_5 : f32 to vector<17x4xf32>
    %21 = vector.extract_strided_slice %1 {offsets = [0, 0], sizes = [239, 4], strides = [1, 1]} : vector<256x4xf32> to vector<239x4xf32>
    %22 = tpu.concatenate %20, %21 in 0 : vector<17x4xf32>, vector<239x4xf32> -> vector<256x4xf32>
    %c-1_i32 = arith.constant -1 : i32
    %23 = vector.broadcast %c-1_i32 : i32 to vector<256x1xi32>
    %24 = arith.addi %18, %23 : vector<256x1xi32>
    %c0_i32_6 = arith.constant 0 : i32
    %25 = vector.broadcast %c0_i32_6 : i32 to vector<256x1xi32>
    %26 = arith.cmpi sge, %24, %25 : vector<256x1xi32>
    %c-1_i32_7 = arith.constant -1 : i32
    %27 = vector.broadcast %c-1_i32_7 : i32 to vector<256x1xi32>
    %28 = arith.addi %18, %27 : vector<256x1xi32>
    %c16_i32_8 = arith.constant 16 : i32
    %29 = vector.broadcast %c16_i32_8 : i32 to vector<256x1xi32>
    %30 = arith.cmpi slt, %28, %29 : vector<256x1xi32>
    %31 = arith.andi %26, %30 : vector<256x1xi1>
    %cst_9 = arith.constant 0.000000e+00 : f32
    %32 = vector.shape_cast %31 : vector<256x1xi1> to vector<256x1xi1>
    %33 = vector.broadcast %32 : vector<256x1xi1> to vector<256x4xi1>
    %34 = vector.broadcast %cst_9 : f32 to vector<256x4xf32>
    %35 = arith.select %33, %22, %34 : vector<256x4xi1>, vector<256x4xf32>
    %c0_10 = arith.constant 0 : index
    %c0_11 = arith.constant 0 : index
    %c0_12 = arith.constant 0 : index
    %c0_13 = arith.constant 0 : index
    %36 = vector.load %arg4[%c0_10, %c0_11, %c0_12, %c0_13] : memref<3x3x4x8xf32, #tpu.memory_space<vmem>>, vector<1x1x4x8xf32>
    %37 = vector.shape_cast %36 : vector<1x1x4x8xf32> to vector<4x8xf32>
    %cst_14 = arith.constant dense<0.000000e+00> : vector<256x8xf32>
    %38 = tpu.matmul %35, %37, %cst_14 {dimension_numbers = #tpu.dot_dimension_numbers<[1], [0], [0], [1], [0, 0, 1, 1], [], []>} : vector<256x4xf32>, vector<4x8xf32>, vector<256x8xf32> -> vector<256x8xf32>
    %39 = arith.addf %19, %38 : vector<256x8xf32>
    %cst_15 = arith.constant 0.000000e+00 : f32
    %40 = vector.broadcast %cst_15 : f32 to vector<16x4xf32>
    %41 = vector.extract_strided_slice %1 {offsets = [0, 0], sizes = [240, 4], strides = [1, 1]} : vector<256x4xf32> to vector<240x4xf32>
    %42 = tpu.concatenate %40, %41 in 0 : vector<16x4xf32>, vector<240x4xf32> -> vector<256x4xf32>
    %c0_16 = arith.constant 0 : index
    %c1 = arith.constant 1 : index
    %c0_17 = arith.constant 0 : index
    %c0_18 = arith.constant 0 : index
    %43 = vector.load %arg4[%c0_16, %c1, %c0_17, %c0_18] : memref<3x3x4x8xf32, #tpu.memory_space<vmem>>, vector<1x1x4x8xf32>
    %44 = vector.shape_cast %43 : vector<1x1x4x8xf32> to vector<4x8xf32>
    %cst_19 = arith.constant dense<0.000000e+00> : vector<256x8xf32>
    %45 = tpu.matmul %42, %44, %cst_19 {dimension_numbers = #tpu.dot_dimension_numbers<[1], [0], [0], [1], [0, 0, 1, 1], [], []>} : vector<256x4xf32>, vector<4x8xf32>, vector<256x8xf32> -> vector<256x8xf32>
    %46 = arith.addf %39, %45 : vector<256x8xf32>
    %cst_20 = arith.constant 0.000000e+00 : f32
    %47 = vector.broadcast %cst_20 : f32 to vector<15x4xf32>
    %48 = vector.extract_strided_slice %1 {offsets = [0, 0], sizes = [241, 4], strides = [1, 1]} : vector<256x4xf32> to vector<241x4xf32>
    %49 = tpu.concatenate %47, %48 in 0 : vector<15x4xf32>, vector<241x4xf32> -> vector<256x4xf32>
    %c1_i32_21 = arith.constant 1 : i32
    %50 = vector.broadcast %c1_i32_21 : i32 to vector<256x1xi32>
    %51 = arith.addi %18, %50 : vector<256x1xi32>
    %c0_i32_22 = arith.constant 0 : i32
    %52 = vector.broadcast %c0_i32_22 : i32 to vector<256x1xi32>
    %53 = arith.cmpi sge, %51, %52 : vector<256x1xi32>
    %c1_i32_23 = arith.constant 1 : i32
    %54 = vector.broadcast %c1_i32_23 : i32 to vector<256x1xi32>
    %55 = arith.addi %18, %54 : vector<256x1xi32>
    %c16_i32_24 = arith.constant 16 : i32
    %56 = vector.broadcast %c16_i32_24 : i32 to vector<256x1xi32>
    %57 = arith.cmpi slt, %55, %56 : vector<256x1xi32>
    %58 = arith.andi %53, %57 : vector<256x1xi1>
    %cst_25 = arith.constant 0.000000e+00 : f32
    %59 = vector.shape_cast %58 : vector<256x1xi1> to vector<256x1xi1>
    %60 = vector.broadcast %59 : vector<256x1xi1> to vector<256x4xi1>
    %61 = vector.broadcast %cst_25 : f32 to vector<256x4xf32>
    %62 = arith.select %60, %49, %61 : vector<256x4xi1>, vector<256x4xf32>
    %c0_26 = arith.constant 0 : index
    %c2 = arith.constant 2 : index
    %c0_27 = arith.constant 0 : index
    %c0_28 = arith.constant 0 : index
    %63 = vector.load %arg4[%c0_26, %c2, %c0_27, %c0_28] : memref<3x3x4x8xf32, #tpu.memory_space<vmem>>, vector<1x1x4x8xf32>
    %64 = vector.shape_cast %63 : vector<1x1x4x8xf32> to vector<4x8xf32>
    %cst_29 = arith.constant dense<0.000000e+00> : vector<256x8xf32>
    %65 = tpu.matmul %62, %64, %cst_29 {dimension_numbers = #tpu.dot_dimension_numbers<[1], [0], [0], [1], [0, 0, 1, 1], [], []>} : vector<256x4xf32>, vector<4x8xf32>, vector<256x8xf32> -> vector<256x8xf32>
    %66 = arith.addf %46, %65 : vector<256x8xf32>
    %cst_30 = arith.constant 0.000000e+00 : f32
    %67 = vector.broadcast %cst_30 : f32 to vector<1x4xf32>
    %68 = vector.extract_strided_slice %1 {offsets = [0, 0], sizes = [255, 4], strides = [1, 1]} : vector<256x4xf32> to vector<255x4xf32>
    %69 = tpu.concatenate %67, %68 in 0 : vector<1x4xf32>, vector<255x4xf32> -> vector<256x4xf32>
    %c-1_i32_31 = arith.constant -1 : i32
    %70 = vector.broadcast %c-1_i32_31 : i32 to vector<256x1xi32>
    %71 = arith.addi %18, %70 : vector<256x1xi32>
    %c0_i32_32 = arith.constant 0 : i32
    %72 = vector.broadcast %c0_i32_32 : i32 to vector<256x1xi32>
    %73 = arith.cmpi sge, %71, %72 : vector<256x1xi32>
    %c-1_i32_33 = arith.constant -1 : i32
    %74 = vector.broadcast %c-1_i32_33 : i32 to vector<256x1xi32>
    %75 = arith.addi %18, %74 : vector<256x1xi32>
    %c16_i32_34 = arith.constant 16 : i32
    %76 = vector.broadcast %c16_i32_34 : i32 to vector<256x1xi32>
    %77 = arith.cmpi slt, %75, %76 : vector<256x1xi32>
    %78 = arith.andi %73, %77 : vector<256x1xi1>
    %cst_35 = arith.constant 0.000000e+00 : f32
    %79 = vector.shape_cast %78 : vector<256x1xi1> to vector<256x1xi1>
    %80 = vector.broadcast %79 : vector<256x1xi1> to vector<256x4xi1>
    %81 = vector.broadcast %cst_35 : f32 to vector<256x4xf32>
    %82 = arith.select %80, %69, %81 : vector<256x4xi1>, vector<256x4xf32>
    %c1_36 = arith.constant 1 : index
    %c0_37 = arith.constant 0 : index
    %c0_38 = arith.constant 0 : index
    %c0_39 = arith.constant 0 : index
    %83 = vector.load %arg4[%c1_36, %c0_37, %c0_38, %c0_39] : memref<3x3x4x8xf32, #tpu.memory_space<vmem>>, vector<1x1x4x8xf32>
    %84 = vector.shape_cast %83 : vector<1x1x4x8xf32> to vector<4x8xf32>
    %cst_40 = arith.constant dense<0.000000e+00> : vector<256x8xf32>
    %85 = tpu.matmul %82, %84, %cst_40 {dimension_numbers = #tpu.dot_dimension_numbers<[1], [0], [0], [1], [0, 0, 1, 1], [], []>} : vector<256x4xf32>, vector<4x8xf32>, vector<256x8xf32> -> vector<256x8xf32>
    %86 = arith.addf %66, %85 : vector<256x8xf32>
    %c1_41 = arith.constant 1 : index
    %c1_42 = arith.constant 1 : index
    %c0_43 = arith.constant 0 : index
    %c0_44 = arith.constant 0 : index
    %87 = vector.load %arg4[%c1_41, %c1_42, %c0_43, %c0_44] : memref<3x3x4x8xf32, #tpu.memory_space<vmem>>, vector<1x1x4x8xf32>
    %88 = vector.shape_cast %87 : vector<1x1x4x8xf32> to vector<4x8xf32>
    %cst_45 = arith.constant dense<0.000000e+00> : vector<256x8xf32>
    %89 = tpu.matmul %1, %88, %cst_45 {dimension_numbers = #tpu.dot_dimension_numbers<[1], [0], [0], [1], [0, 0, 1, 1], [], []>} : vector<256x4xf32>, vector<4x8xf32>, vector<256x8xf32> -> vector<256x8xf32>
    %90 = arith.addf %86, %89 : vector<256x8xf32>
    %cst_46 = arith.constant 0.000000e+00 : f32
    %91 = vector.broadcast %cst_46 : f32 to vector<1x4xf32>
    %92 = vector.extract_strided_slice %1 {offsets = [1, 0], sizes = [255, 4], strides = [1, 1]} : vector<256x4xf32> to vector<255x4xf32>
    %93 = tpu.concatenate %92, %91 in 0 : vector<255x4xf32>, vector<1x4xf32> -> vector<256x4xf32>
    %c1_i32_47 = arith.constant 1 : i32
    %94 = vector.broadcast %c1_i32_47 : i32 to vector<256x1xi32>
    %95 = arith.addi %18, %94 : vector<256x1xi32>
    %c0_i32_48 = arith.constant 0 : i32
    %96 = vector.broadcast %c0_i32_48 : i32 to vector<256x1xi32>
    %97 = arith.cmpi sge, %95, %96 : vector<256x1xi32>
    %c1_i32_49 = arith.constant 1 : i32
    %98 = vector.broadcast %c1_i32_49 : i32 to vector<256x1xi32>
    %99 = arith.addi %18, %98 : vector<256x1xi32>
    %c16_i32_50 = arith.constant 16 : i32
    %100 = vector.broadcast %c16_i32_50 : i32 to vector<256x1xi32>
    %101 = arith.cmpi slt, %99, %100 : vector<256x1xi32>
    %102 = arith.andi %97, %101 : vector<256x1xi1>
    %cst_51 = arith.constant 0.000000e+00 : f32
    %103 = vector.shape_cast %102 : vector<256x1xi1> to vector<256x1xi1>
    %104 = vector.broadcast %103 : vector<256x1xi1> to vector<256x4xi1>
    %105 = vector.broadcast %cst_51 : f32 to vector<256x4xf32>
    %106 = arith.select %104, %93, %105 : vector<256x4xi1>, vector<256x4xf32>
    %c1_52 = arith.constant 1 : index
    %c2_53 = arith.constant 2 : index
    %c0_54 = arith.constant 0 : index
    %c0_55 = arith.constant 0 : index
    %107 = vector.load %arg4[%c1_52, %c2_53, %c0_54, %c0_55] : memref<3x3x4x8xf32, #tpu.memory_space<vmem>>, vector<1x1x4x8xf32>
    %108 = vector.shape_cast %107 : vector<1x1x4x8xf32> to vector<4x8xf32>
    %cst_56 = arith.constant dense<0.000000e+00> : vector<256x8xf32>
    %109 = tpu.matmul %106, %108, %cst_56 {dimension_numbers = #tpu.dot_dimension_numbers<[1], [0], [0], [1], [0, 0, 1, 1], [], []>} : vector<256x4xf32>, vector<4x8xf32>, vector<256x8xf32> -> vector<256x8xf32>
    %110 = arith.addf %90, %109 : vector<256x8xf32>
    %cst_57 = arith.constant 0.000000e+00 : f32
    %111 = vector.broadcast %cst_57 : f32 to vector<15x4xf32>
    %112 = vector.extract_strided_slice %1 {offsets = [15, 0], sizes = [241, 4], strides = [1, 1]} : vector<256x4xf32> to vector<241x4xf32>
    %113 = tpu.concatenate %112, %111 in 0 : vector<241x4xf32>, vector<15x4xf32> -> vector<256x4xf32>
    %c-1_i32_58 = arith.constant -1 : i32
    %114 = vector.broadcast %c-1_i32_58 : i32 to vector<256x1xi32>
    %115 = arith.addi %18, %114 : vector<256x1xi32>
    %c0_i32_59 = arith.constant 0 : i32
    %116 = vector.broadcast %c0_i32_59 : i32 to vector<256x1xi32>
    %117 = arith.cmpi sge, %115, %116 : vector<256x1xi32>
    %c-1_i32_60 = arith.constant -1 : i32
    %118 = vector.broadcast %c-1_i32_60 : i32 to vector<256x1xi32>
    %119 = arith.addi %18, %118 : vector<256x1xi32>
    %c16_i32_61 = arith.constant 16 : i32
    %120 = vector.broadcast %c16_i32_61 : i32 to vector<256x1xi32>
    %121 = arith.cmpi slt, %119, %120 : vector<256x1xi32>
    %122 = arith.andi %117, %121 : vector<256x1xi1>
    %cst_62 = arith.constant 0.000000e+00 : f32
    %123 = vector.shape_cast %122 : vector<256x1xi1> to vector<256x1xi1>
    %124 = vector.broadcast %123 : vector<256x1xi1> to vector<256x4xi1>
    %125 = vector.broadcast %cst_62 : f32 to vector<256x4xf32>
    %126 = arith.select %124, %113, %125 : vector<256x4xi1>, vector<256x4xf32>
    %c2_63 = arith.constant 2 : index
    %c0_64 = arith.constant 0 : index
    %c0_65 = arith.constant 0 : index
    %c0_66 = arith.constant 0 : index
    %127 = vector.load %arg4[%c2_63, %c0_64, %c0_65, %c0_66] : memref<3x3x4x8xf32, #tpu.memory_space<vmem>>, vector<1x1x4x8xf32>
    %128 = vector.shape_cast %127 : vector<1x1x4x8xf32> to vector<4x8xf32>
    %cst_67 = arith.constant dense<0.000000e+00> : vector<256x8xf32>
    %129 = tpu.matmul %126, %128, %cst_67 {dimension_numbers = #tpu.dot_dimension_numbers<[1], [0], [0], [1], [0, 0, 1, 1], [], []>} : vector<256x4xf32>, vector<4x8xf32>, vector<256x8xf32> -> vector<256x8xf32>
    %130 = arith.addf %110, %129 : vector<256x8xf32>
    %cst_68 = arith.constant 0.000000e+00 : f32
    %131 = vector.broadcast %cst_68 : f32 to vector<16x4xf32>
    %132 = vector.extract_strided_slice %1 {offsets = [16, 0], sizes = [240, 4], strides = [1, 1]} : vector<256x4xf32> to vector<240x4xf32>
    %133 = tpu.concatenate %132, %131 in 0 : vector<240x4xf32>, vector<16x4xf32> -> vector<256x4xf32>
    %c2_69 = arith.constant 2 : index
    %c1_70 = arith.constant 1 : index
    %c0_71 = arith.constant 0 : index
    %c0_72 = arith.constant 0 : index
    %134 = vector.load %arg4[%c2_69, %c1_70, %c0_71, %c0_72] : memref<3x3x4x8xf32, #tpu.memory_space<vmem>>, vector<1x1x4x8xf32>
    %135 = vector.shape_cast %134 : vector<1x1x4x8xf32> to vector<4x8xf32>
    %cst_73 = arith.constant dense<0.000000e+00> : vector<256x8xf32>
    %136 = tpu.matmul %133, %135, %cst_73 {dimension_numbers = #tpu.dot_dimension_numbers<[1], [0], [0], [1], [0, 0, 1, 1], [], []>} : vector<256x4xf32>, vector<4x8xf32>, vector<256x8xf32> -> vector<256x8xf32>
    %137 = arith.addf %130, %136 : vector<256x8xf32>
    %cst_74 = arith.constant 0.000000e+00 : f32
    %138 = vector.broadcast %cst_74 : f32 to vector<17x4xf32>
    %139 = vector.extract_strided_slice %1 {offsets = [17, 0], sizes = [239, 4], strides = [1, 1]} : vector<256x4xf32> to vector<239x4xf32>
    %140 = tpu.concatenate %139, %138 in 0 : vector<239x4xf32>, vector<17x4xf32> -> vector<256x4xf32>
    %c1_i32_75 = arith.constant 1 : i32
    %141 = vector.broadcast %c1_i32_75 : i32 to vector<256x1xi32>
    %142 = arith.addi %18, %141 : vector<256x1xi32>
    %c0_i32_76 = arith.constant 0 : i32
    %143 = vector.broadcast %c0_i32_76 : i32 to vector<256x1xi32>
    %144 = arith.cmpi sge, %142, %143 : vector<256x1xi32>
    %c1_i32_77 = arith.constant 1 : i32
    %145 = vector.broadcast %c1_i32_77 : i32 to vector<256x1xi32>
    %146 = arith.addi %18, %145 : vector<256x1xi32>
    %c16_i32_78 = arith.constant 16 : i32
    %147 = vector.broadcast %c16_i32_78 : i32 to vector<256x1xi32>
    %148 = arith.cmpi slt, %146, %147 : vector<256x1xi32>
    %149 = arith.andi %144, %148 : vector<256x1xi1>
    %cst_79 = arith.constant 0.000000e+00 : f32
    %150 = vector.shape_cast %149 : vector<256x1xi1> to vector<256x1xi1>
    %151 = vector.broadcast %150 : vector<256x1xi1> to vector<256x4xi1>
    %152 = vector.broadcast %cst_79 : f32 to vector<256x4xf32>
    %153 = arith.select %151, %140, %152 : vector<256x4xi1>, vector<256x4xf32>
    %c2_80 = arith.constant 2 : index
    %c2_81 = arith.constant 2 : index
    %c0_82 = arith.constant 0 : index
    %c0_83 = arith.constant 0 : index
    %154 = vector.load %arg4[%c2_80, %c2_81, %c0_82, %c0_83] : memref<3x3x4x8xf32, #tpu.memory_space<vmem>>, vector<1x1x4x8xf32>
    %155 = vector.shape_cast %154 : vector<1x1x4x8xf32> to vector<4x8xf32>
    %cst_84 = arith.constant dense<0.000000e+00> : vector<256x8xf32>
    %156 = tpu.matmul %153, %155, %cst_84 {dimension_numbers = #tpu.dot_dimension_numbers<[1], [0], [0], [1], [0, 0, 1, 1], [], []>} : vector<256x4xf32>, vector<4x8xf32>, vector<256x8xf32> -> vector<256x8xf32>
    %157 = arith.addf %137, %156 : vector<256x8xf32>
    %c0_85 = arith.constant 0 : index
    %c0_86 = arith.constant 0 : index
    %c0_87 = arith.constant 0 : index
    %158 = vector.load %arg5[%c0_85, %c0_86, %c0_87] : memref<1x256x8xf32, #tpu.memory_space<vmem>>, vector<1x256x8xf32>
    %159 = vector.shape_cast %158 : vector<1x256x8xf32> to vector<256x8xf32>
    %160 = vector.shape_cast %157 : vector<256x8xf32> to vector<1x256x8xf32>
    tpu.vector_store %arg5[%c0_85, %c0_86, %c0_87], %160 {strides = array<i32>} : memref<1x256x8xf32, #tpu.memory_space<vmem>>, vector<1x256x8xf32>,
    %cst_88 = arith.constant dense<0.000000e+00> : vector<8xf32>
    %161 = vector.multi_reduction <add>, %157, %cst_88 [0] : vector<256x8xf32> to vector<8xf32>
    %162 = vector.shape_cast %161 : vector<8xf32> to vector<1x8xf32>
    %cst_89 = arith.constant 2.560000e+02 : f32
    %163 = vector.broadcast %cst_89 : f32 to vector<1x8xf32>
    %164 = arith.divf %162, %163 : vector<1x8xf32>
    %165 = vector.broadcast %164 : vector<1x8xf32> to vector<256x8xf32>
    %166 = arith.subf %157, %165 : vector<256x8xf32>
    %167 = arith.mulf %166, %166 : vector<256x8xf32>
    %cst_90 = arith.constant dense<0.000000e+00> : vector<8xf32>
    %168 = vector.multi_reduction <add>, %167, %cst_90 [0] : vector<256x8xf32> to vector<8xf32>
    %169 = vector.shape_cast %168 : vector<8xf32> to vector<1x8xf32>
    %170 = tpu.concatenate %164, %169 in 0 : vector<1x8xf32>, vector<1x8xf32> -> vector<2x8xf32>
    %c0_91 = arith.constant 0 : index
    %c0_92 = arith.constant 0 : index
    %c0_93 = arith.constant 0 : index
    %171 = vector.load %arg6[%c0_91, %c0_92, %c0_93] : memref<1x2x8xf32, #tpu.memory_space<vmem>>, vector<1x2x8xf32>
    %172 = vector.shape_cast %171 : vector<1x2x8xf32> to vector<2x8xf32>
    %173 = vector.shape_cast %170 : vector<2x8xf32> to vector<1x2x8xf32>
    tpu.vector_store %arg6[%c0_91, %c0_92, %c0_93], %173 {strides = array<i32>} : memref<1x2x8xf32, #tpu.memory_space<vmem>>, vector<1x2x8xf32>,
    return
  }
  func.func @transform_0(%arg0: i32) -> (i32, i32, i32) {
    %c0_i32 = arith.constant 0 : i32
    %c0_i32_0 = arith.constant 0 : i32
    %c0_i32_1 = arith.constant 0 : i32
    return %arg0, %c0_i32, %c0_i32_0 : i32, i32, i32
  }
  func.func @transform_1(%arg0: i32) -> (i32, i32) {
    %c0_i32 = arith.constant 0 : i32
    %c0_i32_0 = arith.constant 0 : i32
    %c0_i32_1 = arith.constant 0 : i32
    return %c0_i32, %c0_i32_0 : i32, i32
  }
  func.func @transform_2(%arg0: i32) -> (i32, i32) {
    %c0_i32 = arith.constant 0 : i32
    %c0_i32_0 = arith.constant 0 : i32
    %c0_i32_1 = arith.constant 0 : i32
    return %c0_i32, %c0_i32_0 : i32, i32
  }
  func.func @transform_3(%arg0: i32) -> (i32, i32, i32, i32) {
    %c0_i32 = arith.constant 0 : i32
    %c0_i32_0 = arith.constant 0 : i32
    %c0_i32_1 = arith.constant 0 : i32
    %c0_i32_2 = arith.constant 0 : i32
    %c0_i32_3 = arith.constant 0 : i32
    return %c0_i32, %c0_i32_0, %c0_i32_1, %c0_i32_2 : i32, i32, i32, i32
  }
  func.func @transform_4(%arg0: i32) -> (i32, i32, i32) {
    %c0_i32 = arith.constant 0 : i32
    %c0_i32_0 = arith.constant 0 : i32
    %c0_i32_1 = arith.constant 0 : i32
    return %arg0, %c0_i32, %c0_i32_0 : i32, i32, i32
  }
  func.func @transform_5(%arg0: i32) -> (i32, i32, i32) {
    %c0_i32 = arith.constant 0 : i32
    %c0_i32_0 = arith.constant 0 : i32
    %c0_i32_1 = arith.constant 0 : i32
    return %arg0, %c0_i32, %c0_i32_0 : i32, i32, i32
  }
}

module attributes {stable_mosaic.version = 11 : i64} {
  func.func @_conv3x3_stats_kernel(%arg0: i32, %arg1: memref<1x256x8xf32, #tpu.memory_space<vmem>>, %arg2: memref<1x8xf32, #tpu.memory_space<vmem>>, %arg3: memref<1x8xf32, #tpu.memory_space<vmem>>, %arg4: memref<3x3x8x8xf32, #tpu.memory_space<vmem>>, %arg5: memref<1x256x8xf32, #tpu.memory_space<vmem>>, %arg6: memref<1x2x8xf32, #tpu.memory_space<vmem>>) attributes {dimension_semantics = [#tpu.dimension_semantics<parallel>], iteration_bounds = array<i64: 2>, scalar_prefetch = 0 : i64, scratch_operands = 0 : i64, tpu.core_type = #tpu.core_type<tc>, window_params = [{transform_indices = @transform_0, window_bounds = array<i64: 1, 256, 8>}, {pipeline_mode = #tpu.pipeline_mode<synchronous>, transform_indices = @transform_1, window_bounds = array<i64: 1, 8>}, {pipeline_mode = #tpu.pipeline_mode<synchronous>, transform_indices = @transform_2, window_bounds = array<i64: 1, 8>}, {pipeline_mode = #tpu.pipeline_mode<synchronous>, transform_indices = @transform_3, window_bounds = array<i64: 3, 3, 8, 8>}, {transform_indices = @transform_4, window_bounds = array<i64: 1, 256, 8>}, {transform_indices = @transform_5, window_bounds = array<i64: 1, 2, 8>}]} {
    %c0 = arith.constant 0 : index
    %c0_0 = arith.constant 0 : index
    %c0_1 = arith.constant 0 : index
    %0 = vector.load %arg1[%c0, %c0_0, %c0_1] : memref<1x256x8xf32, #tpu.memory_space<vmem>>, vector<1x256x8xf32>
    %1 = vector.shape_cast %0 : vector<1x256x8xf32> to vector<256x8xf32>
    %c0_2 = arith.constant 0 : index
    %c0_3 = arith.constant 0 : index
    %2 = vector.load %arg2[%c0_2, %c0_3] : memref<1x8xf32, #tpu.memory_space<vmem>>, vector<1x8xf32>
    %3 = vector.broadcast %2 : vector<1x8xf32> to vector<256x8xf32>
    %4 = arith.mulf %1, %3 : vector<256x8xf32>
    %c0_4 = arith.constant 0 : index
    %c0_5 = arith.constant 0 : index
    %5 = vector.load %arg3[%c0_4, %c0_5] : memref<1x8xf32, #tpu.memory_space<vmem>>, vector<1x8xf32>
    %6 = vector.broadcast %5 : vector<1x8xf32> to vector<256x8xf32>
    %7 = arith.addf %4, %6 : vector<256x8xf32>
    %cst = arith.constant 0.000000e+00 : f32
    %8 = vector.broadcast %cst : f32 to vector<256x8xf32>
    %9 = arith.maximumf %7, %8 : vector<256x8xf32>
    %10 = tpu.iota {dimensions = array<i32: 0>} : vector<256x1xi32>
    %c16_i32 = arith.constant 16 : i32
    %c0_i32 = arith.constant 0 : i32
    %11 = arith.cmpi eq, %c16_i32, %c0_i32 : i32
    %c1_i32 = arith.constant 1 : i32
    %12 = arith.select %11, %c1_i32, %c16_i32 : i32
    %13 = vector.broadcast %12 : i32 to vector<256x1xi32>
    %14 = arith.remsi %10, %13 : vector<256x1xi32>
    %c0_i32_6 = arith.constant 0 : i32
    %15 = vector.broadcast %c0_i32_6 : i32 to vector<256x1xi32>
    %16 = arith.cmpi ne, %14, %15 : vector<256x1xi32>
    %c0_i32_7 = arith.constant 0 : i32
    %17 = vector.broadcast %c0_i32_7 : i32 to vector<256x1xi32>
    %18 = arith.cmpi slt, %14, %17 : vector<256x1xi32>
    %c0_i32_8 = arith.constant 0 : i32
    %19 = arith.cmpi slt, %12, %c0_i32_8 : i32
    %20 = vector.broadcast %19 : i1 to vector<256x1xi1>
    %21 = vector.broadcast %20 : vector<256x1xi1> to vector<256x1xi1>
    %22 = arith.xori %18, %21 : vector<256x1xi1>
    %23 = arith.andi %22, %16 : vector<256x1xi1>
    %24 = vector.broadcast %12 : i32 to vector<256x1xi32>
    %25 = arith.addi %14, %24 : vector<256x1xi32>
    %26 = arith.select %23, %25, %14 : vector<256x1xi1>, vector<256x1xi32>
    %cst_9 = arith.constant 0.000000e+00 : f32
    %27 = vector.broadcast %cst_9 : f32 to vector<256x8xf32>
    %cst_10 = arith.constant 0.000000e+00 : f32
    %28 = vector.broadcast %cst_10 : f32 to vector<17x8xf32>
    %29 = vector.extract_strided_slice %9 {offsets = [0, 0], sizes = [239, 8], strides = [1, 1]} : vector<256x8xf32> to vector<239x8xf32>
    %30 = tpu.concatenate %28, %29 in 0 : vector<17x8xf32>, vector<239x8xf32> -> vector<256x8xf32>
    %c-1_i32 = arith.constant -1 : i32
    %31 = vector.broadcast %c-1_i32 : i32 to vector<256x1xi32>
    %32 = arith.addi %26, %31 : vector<256x1xi32>
    %c0_i32_11 = arith.constant 0 : i32
    %33 = vector.broadcast %c0_i32_11 : i32 to vector<256x1xi32>
    %34 = arith.cmpi sge, %32, %33 : vector<256x1xi32>
    %c-1_i32_12 = arith.constant -1 : i32
    %35 = vector.broadcast %c-1_i32_12 : i32 to vector<256x1xi32>
    %36 = arith.addi %26, %35 : vector<256x1xi32>
    %c16_i32_13 = arith.constant 16 : i32
    %37 = vector.broadcast %c16_i32_13 : i32 to vector<256x1xi32>
    %38 = arith.cmpi slt, %36, %37 : vector<256x1xi32>
    %39 = arith.andi %34, %38 : vector<256x1xi1>
    %cst_14 = arith.constant 0.000000e+00 : f32
    %40 = vector.shape_cast %39 : vector<256x1xi1> to vector<256x1xi1>
    %41 = vector.broadcast %40 : vector<256x1xi1> to vector<256x8xi1>
    %42 = vector.broadcast %cst_14 : f32 to vector<256x8xf32>
    %43 = arith.select %41, %30, %42 : vector<256x8xi1>, vector<256x8xf32>
    %c0_15 = arith.constant 0 : index
    %c0_16 = arith.constant 0 : index
    %c0_17 = arith.constant 0 : index
    %c0_18 = arith.constant 0 : index
    %44 = vector.load %arg4[%c0_15, %c0_16, %c0_17, %c0_18] : memref<3x3x8x8xf32, #tpu.memory_space<vmem>>, vector<1x1x8x8xf32>
    %45 = vector.shape_cast %44 : vector<1x1x8x8xf32> to vector<8x8xf32>
    %cst_19 = arith.constant dense<0.000000e+00> : vector<256x8xf32>
    %46 = tpu.matmul %43, %45, %cst_19 {dimension_numbers = #tpu.dot_dimension_numbers<[1], [0], [0], [1], [0, 0, 1, 1], [], []>} : vector<256x8xf32>, vector<8x8xf32>, vector<256x8xf32> -> vector<256x8xf32>
    %47 = arith.addf %27, %46 : vector<256x8xf32>
    %cst_20 = arith.constant 0.000000e+00 : f32
    %48 = vector.broadcast %cst_20 : f32 to vector<16x8xf32>
    %49 = vector.extract_strided_slice %9 {offsets = [0, 0], sizes = [240, 8], strides = [1, 1]} : vector<256x8xf32> to vector<240x8xf32>
    %50 = tpu.concatenate %48, %49 in 0 : vector<16x8xf32>, vector<240x8xf32> -> vector<256x8xf32>
    %c0_21 = arith.constant 0 : index
    %c1 = arith.constant 1 : index
    %c0_22 = arith.constant 0 : index
    %c0_23 = arith.constant 0 : index
    %51 = vector.load %arg4[%c0_21, %c1, %c0_22, %c0_23] : memref<3x3x8x8xf32, #tpu.memory_space<vmem>>, vector<1x1x8x8xf32>
    %52 = vector.shape_cast %51 : vector<1x1x8x8xf32> to vector<8x8xf32>
    %cst_24 = arith.constant dense<0.000000e+00> : vector<256x8xf32>
    %53 = tpu.matmul %50, %52, %cst_24 {dimension_numbers = #tpu.dot_dimension_numbers<[1], [0], [0], [1], [0, 0, 1, 1], [], []>} : vector<256x8xf32>, vector<8x8xf32>, vector<256x8xf32> -> vector<256x8xf32>
    %54 = arith.addf %47, %53 : vector<256x8xf32>
    %cst_25 = arith.constant 0.000000e+00 : f32
    %55 = vector.broadcast %cst_25 : f32 to vector<15x8xf32>
    %56 = vector.extract_strided_slice %9 {offsets = [0, 0], sizes = [241, 8], strides = [1, 1]} : vector<256x8xf32> to vector<241x8xf32>
    %57 = tpu.concatenate %55, %56 in 0 : vector<15x8xf32>, vector<241x8xf32> -> vector<256x8xf32>
    %c1_i32_26 = arith.constant 1 : i32
    %58 = vector.broadcast %c1_i32_26 : i32 to vector<256x1xi32>
    %59 = arith.addi %26, %58 : vector<256x1xi32>
    %c0_i32_27 = arith.constant 0 : i32
    %60 = vector.broadcast %c0_i32_27 : i32 to vector<256x1xi32>
    %61 = arith.cmpi sge, %59, %60 : vector<256x1xi32>
    %c1_i32_28 = arith.constant 1 : i32
    %62 = vector.broadcast %c1_i32_28 : i32 to vector<256x1xi32>
    %63 = arith.addi %26, %62 : vector<256x1xi32>
    %c16_i32_29 = arith.constant 16 : i32
    %64 = vector.broadcast %c16_i32_29 : i32 to vector<256x1xi32>
    %65 = arith.cmpi slt, %63, %64 : vector<256x1xi32>
    %66 = arith.andi %61, %65 : vector<256x1xi1>
    %cst_30 = arith.constant 0.000000e+00 : f32
    %67 = vector.shape_cast %66 : vector<256x1xi1> to vector<256x1xi1>
    %68 = vector.broadcast %67 : vector<256x1xi1> to vector<256x8xi1>
    %69 = vector.broadcast %cst_30 : f32 to vector<256x8xf32>
    %70 = arith.select %68, %57, %69 : vector<256x8xi1>, vector<256x8xf32>
    %c0_31 = arith.constant 0 : index
    %c2 = arith.constant 2 : index
    %c0_32 = arith.constant 0 : index
    %c0_33 = arith.constant 0 : index
    %71 = vector.load %arg4[%c0_31, %c2, %c0_32, %c0_33] : memref<3x3x8x8xf32, #tpu.memory_space<vmem>>, vector<1x1x8x8xf32>
    %72 = vector.shape_cast %71 : vector<1x1x8x8xf32> to vector<8x8xf32>
    %cst_34 = arith.constant dense<0.000000e+00> : vector<256x8xf32>
    %73 = tpu.matmul %70, %72, %cst_34 {dimension_numbers = #tpu.dot_dimension_numbers<[1], [0], [0], [1], [0, 0, 1, 1], [], []>} : vector<256x8xf32>, vector<8x8xf32>, vector<256x8xf32> -> vector<256x8xf32>
    %74 = arith.addf %54, %73 : vector<256x8xf32>
    %cst_35 = arith.constant 0.000000e+00 : f32
    %75 = vector.broadcast %cst_35 : f32 to vector<1x8xf32>
    %76 = vector.extract_strided_slice %9 {offsets = [0, 0], sizes = [255, 8], strides = [1, 1]} : vector<256x8xf32> to vector<255x8xf32>
    %77 = tpu.concatenate %75, %76 in 0 : vector<1x8xf32>, vector<255x8xf32> -> vector<256x8xf32>
    %c-1_i32_36 = arith.constant -1 : i32
    %78 = vector.broadcast %c-1_i32_36 : i32 to vector<256x1xi32>
    %79 = arith.addi %26, %78 : vector<256x1xi32>
    %c0_i32_37 = arith.constant 0 : i32
    %80 = vector.broadcast %c0_i32_37 : i32 to vector<256x1xi32>
    %81 = arith.cmpi sge, %79, %80 : vector<256x1xi32>
    %c-1_i32_38 = arith.constant -1 : i32
    %82 = vector.broadcast %c-1_i32_38 : i32 to vector<256x1xi32>
    %83 = arith.addi %26, %82 : vector<256x1xi32>
    %c16_i32_39 = arith.constant 16 : i32
    %84 = vector.broadcast %c16_i32_39 : i32 to vector<256x1xi32>
    %85 = arith.cmpi slt, %83, %84 : vector<256x1xi32>
    %86 = arith.andi %81, %85 : vector<256x1xi1>
    %cst_40 = arith.constant 0.000000e+00 : f32
    %87 = vector.shape_cast %86 : vector<256x1xi1> to vector<256x1xi1>
    %88 = vector.broadcast %87 : vector<256x1xi1> to vector<256x8xi1>
    %89 = vector.broadcast %cst_40 : f32 to vector<256x8xf32>
    %90 = arith.select %88, %77, %89 : vector<256x8xi1>, vector<256x8xf32>
    %c1_41 = arith.constant 1 : index
    %c0_42 = arith.constant 0 : index
    %c0_43 = arith.constant 0 : index
    %c0_44 = arith.constant 0 : index
    %91 = vector.load %arg4[%c1_41, %c0_42, %c0_43, %c0_44] : memref<3x3x8x8xf32, #tpu.memory_space<vmem>>, vector<1x1x8x8xf32>
    %92 = vector.shape_cast %91 : vector<1x1x8x8xf32> to vector<8x8xf32>
    %cst_45 = arith.constant dense<0.000000e+00> : vector<256x8xf32>
    %93 = tpu.matmul %90, %92, %cst_45 {dimension_numbers = #tpu.dot_dimension_numbers<[1], [0], [0], [1], [0, 0, 1, 1], [], []>} : vector<256x8xf32>, vector<8x8xf32>, vector<256x8xf32> -> vector<256x8xf32>
    %94 = arith.addf %74, %93 : vector<256x8xf32>
    %c1_46 = arith.constant 1 : index
    %c1_47 = arith.constant 1 : index
    %c0_48 = arith.constant 0 : index
    %c0_49 = arith.constant 0 : index
    %95 = vector.load %arg4[%c1_46, %c1_47, %c0_48, %c0_49] : memref<3x3x8x8xf32, #tpu.memory_space<vmem>>, vector<1x1x8x8xf32>
    %96 = vector.shape_cast %95 : vector<1x1x8x8xf32> to vector<8x8xf32>
    %cst_50 = arith.constant dense<0.000000e+00> : vector<256x8xf32>
    %97 = tpu.matmul %9, %96, %cst_50 {dimension_numbers = #tpu.dot_dimension_numbers<[1], [0], [0], [1], [0, 0, 1, 1], [], []>} : vector<256x8xf32>, vector<8x8xf32>, vector<256x8xf32> -> vector<256x8xf32>
    %98 = arith.addf %94, %97 : vector<256x8xf32>
    %cst_51 = arith.constant 0.000000e+00 : f32
    %99 = vector.broadcast %cst_51 : f32 to vector<1x8xf32>
    %100 = vector.extract_strided_slice %9 {offsets = [1, 0], sizes = [255, 8], strides = [1, 1]} : vector<256x8xf32> to vector<255x8xf32>
    %101 = tpu.concatenate %100, %99 in 0 : vector<255x8xf32>, vector<1x8xf32> -> vector<256x8xf32>
    %c1_i32_52 = arith.constant 1 : i32
    %102 = vector.broadcast %c1_i32_52 : i32 to vector<256x1xi32>
    %103 = arith.addi %26, %102 : vector<256x1xi32>
    %c0_i32_53 = arith.constant 0 : i32
    %104 = vector.broadcast %c0_i32_53 : i32 to vector<256x1xi32>
    %105 = arith.cmpi sge, %103, %104 : vector<256x1xi32>
    %c1_i32_54 = arith.constant 1 : i32
    %106 = vector.broadcast %c1_i32_54 : i32 to vector<256x1xi32>
    %107 = arith.addi %26, %106 : vector<256x1xi32>
    %c16_i32_55 = arith.constant 16 : i32
    %108 = vector.broadcast %c16_i32_55 : i32 to vector<256x1xi32>
    %109 = arith.cmpi slt, %107, %108 : vector<256x1xi32>
    %110 = arith.andi %105, %109 : vector<256x1xi1>
    %cst_56 = arith.constant 0.000000e+00 : f32
    %111 = vector.shape_cast %110 : vector<256x1xi1> to vector<256x1xi1>
    %112 = vector.broadcast %111 : vector<256x1xi1> to vector<256x8xi1>
    %113 = vector.broadcast %cst_56 : f32 to vector<256x8xf32>
    %114 = arith.select %112, %101, %113 : vector<256x8xi1>, vector<256x8xf32>
    %c1_57 = arith.constant 1 : index
    %c2_58 = arith.constant 2 : index
    %c0_59 = arith.constant 0 : index
    %c0_60 = arith.constant 0 : index
    %115 = vector.load %arg4[%c1_57, %c2_58, %c0_59, %c0_60] : memref<3x3x8x8xf32, #tpu.memory_space<vmem>>, vector<1x1x8x8xf32>
    %116 = vector.shape_cast %115 : vector<1x1x8x8xf32> to vector<8x8xf32>
    %cst_61 = arith.constant dense<0.000000e+00> : vector<256x8xf32>
    %117 = tpu.matmul %114, %116, %cst_61 {dimension_numbers = #tpu.dot_dimension_numbers<[1], [0], [0], [1], [0, 0, 1, 1], [], []>} : vector<256x8xf32>, vector<8x8xf32>, vector<256x8xf32> -> vector<256x8xf32>
    %118 = arith.addf %98, %117 : vector<256x8xf32>
    %cst_62 = arith.constant 0.000000e+00 : f32
    %119 = vector.broadcast %cst_62 : f32 to vector<15x8xf32>
    %120 = vector.extract_strided_slice %9 {offsets = [15, 0], sizes = [241, 8], strides = [1, 1]} : vector<256x8xf32> to vector<241x8xf32>
    %121 = tpu.concatenate %120, %119 in 0 : vector<241x8xf32>, vector<15x8xf32> -> vector<256x8xf32>
    %c-1_i32_63 = arith.constant -1 : i32
    %122 = vector.broadcast %c-1_i32_63 : i32 to vector<256x1xi32>
    %123 = arith.addi %26, %122 : vector<256x1xi32>
    %c0_i32_64 = arith.constant 0 : i32
    %124 = vector.broadcast %c0_i32_64 : i32 to vector<256x1xi32>
    %125 = arith.cmpi sge, %123, %124 : vector<256x1xi32>
    %c-1_i32_65 = arith.constant -1 : i32
    %126 = vector.broadcast %c-1_i32_65 : i32 to vector<256x1xi32>
    %127 = arith.addi %26, %126 : vector<256x1xi32>
    %c16_i32_66 = arith.constant 16 : i32
    %128 = vector.broadcast %c16_i32_66 : i32 to vector<256x1xi32>
    %129 = arith.cmpi slt, %127, %128 : vector<256x1xi32>
    %130 = arith.andi %125, %129 : vector<256x1xi1>
    %cst_67 = arith.constant 0.000000e+00 : f32
    %131 = vector.shape_cast %130 : vector<256x1xi1> to vector<256x1xi1>
    %132 = vector.broadcast %131 : vector<256x1xi1> to vector<256x8xi1>
    %133 = vector.broadcast %cst_67 : f32 to vector<256x8xf32>
    %134 = arith.select %132, %121, %133 : vector<256x8xi1>, vector<256x8xf32>
    %c2_68 = arith.constant 2 : index
    %c0_69 = arith.constant 0 : index
    %c0_70 = arith.constant 0 : index
    %c0_71 = arith.constant 0 : index
    %135 = vector.load %arg4[%c2_68, %c0_69, %c0_70, %c0_71] : memref<3x3x8x8xf32, #tpu.memory_space<vmem>>, vector<1x1x8x8xf32>
    %136 = vector.shape_cast %135 : vector<1x1x8x8xf32> to vector<8x8xf32>
    %cst_72 = arith.constant dense<0.000000e+00> : vector<256x8xf32>
    %137 = tpu.matmul %134, %136, %cst_72 {dimension_numbers = #tpu.dot_dimension_numbers<[1], [0], [0], [1], [0, 0, 1, 1], [], []>} : vector<256x8xf32>, vector<8x8xf32>, vector<256x8xf32> -> vector<256x8xf32>
    %138 = arith.addf %118, %137 : vector<256x8xf32>
    %cst_73 = arith.constant 0.000000e+00 : f32
    %139 = vector.broadcast %cst_73 : f32 to vector<16x8xf32>
    %140 = vector.extract_strided_slice %9 {offsets = [16, 0], sizes = [240, 8], strides = [1, 1]} : vector<256x8xf32> to vector<240x8xf32>
    %141 = tpu.concatenate %140, %139 in 0 : vector<240x8xf32>, vector<16x8xf32> -> vector<256x8xf32>
    %c2_74 = arith.constant 2 : index
    %c1_75 = arith.constant 1 : index
    %c0_76 = arith.constant 0 : index
    %c0_77 = arith.constant 0 : index
    %142 = vector.load %arg4[%c2_74, %c1_75, %c0_76, %c0_77] : memref<3x3x8x8xf32, #tpu.memory_space<vmem>>, vector<1x1x8x8xf32>
    %143 = vector.shape_cast %142 : vector<1x1x8x8xf32> to vector<8x8xf32>
    %cst_78 = arith.constant dense<0.000000e+00> : vector<256x8xf32>
    %144 = tpu.matmul %141, %143, %cst_78 {dimension_numbers = #tpu.dot_dimension_numbers<[1], [0], [0], [1], [0, 0, 1, 1], [], []>} : vector<256x8xf32>, vector<8x8xf32>, vector<256x8xf32> -> vector<256x8xf32>
    %145 = arith.addf %138, %144 : vector<256x8xf32>
    %cst_79 = arith.constant 0.000000e+00 : f32
    %146 = vector.broadcast %cst_79 : f32 to vector<17x8xf32>
    %147 = vector.extract_strided_slice %9 {offsets = [17, 0], sizes = [239, 8], strides = [1, 1]} : vector<256x8xf32> to vector<239x8xf32>
    %148 = tpu.concatenate %147, %146 in 0 : vector<239x8xf32>, vector<17x8xf32> -> vector<256x8xf32>
    %c1_i32_80 = arith.constant 1 : i32
    %149 = vector.broadcast %c1_i32_80 : i32 to vector<256x1xi32>
    %150 = arith.addi %26, %149 : vector<256x1xi32>
    %c0_i32_81 = arith.constant 0 : i32
    %151 = vector.broadcast %c0_i32_81 : i32 to vector<256x1xi32>
    %152 = arith.cmpi sge, %150, %151 : vector<256x1xi32>
    %c1_i32_82 = arith.constant 1 : i32
    %153 = vector.broadcast %c1_i32_82 : i32 to vector<256x1xi32>
    %154 = arith.addi %26, %153 : vector<256x1xi32>
    %c16_i32_83 = arith.constant 16 : i32
    %155 = vector.broadcast %c16_i32_83 : i32 to vector<256x1xi32>
    %156 = arith.cmpi slt, %154, %155 : vector<256x1xi32>
    %157 = arith.andi %152, %156 : vector<256x1xi1>
    %cst_84 = arith.constant 0.000000e+00 : f32
    %158 = vector.shape_cast %157 : vector<256x1xi1> to vector<256x1xi1>
    %159 = vector.broadcast %158 : vector<256x1xi1> to vector<256x8xi1>
    %160 = vector.broadcast %cst_84 : f32 to vector<256x8xf32>
    %161 = arith.select %159, %148, %160 : vector<256x8xi1>, vector<256x8xf32>
    %c2_85 = arith.constant 2 : index
    %c2_86 = arith.constant 2 : index
    %c0_87 = arith.constant 0 : index
    %c0_88 = arith.constant 0 : index
    %162 = vector.load %arg4[%c2_85, %c2_86, %c0_87, %c0_88] : memref<3x3x8x8xf32, #tpu.memory_space<vmem>>, vector<1x1x8x8xf32>
    %163 = vector.shape_cast %162 : vector<1x1x8x8xf32> to vector<8x8xf32>
    %cst_89 = arith.constant dense<0.000000e+00> : vector<256x8xf32>
    %164 = tpu.matmul %161, %163, %cst_89 {dimension_numbers = #tpu.dot_dimension_numbers<[1], [0], [0], [1], [0, 0, 1, 1], [], []>} : vector<256x8xf32>, vector<8x8xf32>, vector<256x8xf32> -> vector<256x8xf32>
    %165 = arith.addf %145, %164 : vector<256x8xf32>
    %c0_90 = arith.constant 0 : index
    %c0_91 = arith.constant 0 : index
    %c0_92 = arith.constant 0 : index
    %166 = vector.load %arg5[%c0_90, %c0_91, %c0_92] : memref<1x256x8xf32, #tpu.memory_space<vmem>>, vector<1x256x8xf32>
    %167 = vector.shape_cast %166 : vector<1x256x8xf32> to vector<256x8xf32>
    %168 = vector.shape_cast %165 : vector<256x8xf32> to vector<1x256x8xf32>
    tpu.vector_store %arg5[%c0_90, %c0_91, %c0_92], %168 {strides = array<i32>} : memref<1x256x8xf32, #tpu.memory_space<vmem>>, vector<1x256x8xf32>,
    %cst_93 = arith.constant dense<0.000000e+00> : vector<8xf32>
    %169 = vector.multi_reduction <add>, %165, %cst_93 [0] : vector<256x8xf32> to vector<8xf32>
    %170 = vector.shape_cast %169 : vector<8xf32> to vector<1x8xf32>
    %cst_94 = arith.constant 2.560000e+02 : f32
    %171 = vector.broadcast %cst_94 : f32 to vector<1x8xf32>
    %172 = arith.divf %170, %171 : vector<1x8xf32>
    %173 = vector.broadcast %172 : vector<1x8xf32> to vector<256x8xf32>
    %174 = arith.subf %165, %173 : vector<256x8xf32>
    %175 = arith.mulf %174, %174 : vector<256x8xf32>
    %cst_95 = arith.constant dense<0.000000e+00> : vector<8xf32>
    %176 = vector.multi_reduction <add>, %175, %cst_95 [0] : vector<256x8xf32> to vector<8xf32>
    %177 = vector.shape_cast %176 : vector<8xf32> to vector<1x8xf32>
    %178 = tpu.concatenate %172, %177 in 0 : vector<1x8xf32>, vector<1x8xf32> -> vector<2x8xf32>
    %c0_96 = arith.constant 0 : index
    %c0_97 = arith.constant 0 : index
    %c0_98 = arith.constant 0 : index
    %179 = vector.load %arg6[%c0_96, %c0_97, %c0_98] : memref<1x2x8xf32, #tpu.memory_space<vmem>>, vector<1x2x8xf32>
    %180 = vector.shape_cast %179 : vector<1x2x8xf32> to vector<2x8xf32>
    %181 = vector.shape_cast %178 : vector<2x8xf32> to vector<1x2x8xf32>
    tpu.vector_store %arg6[%c0_96, %c0_97, %c0_98], %181 {strides = array<i32>} : memref<1x2x8xf32, #tpu.memory_space<vmem>>, vector<1x2x8xf32>,
    return
  }
  func.func @transform_0(%arg0: i32) -> (i32, i32, i32) {
    %c0_i32 = arith.constant 0 : i32
    %c0_i32_0 = arith.constant 0 : i32
    %c0_i32_1 = arith.constant 0 : i32
    return %arg0, %c0_i32, %c0_i32_0 : i32, i32, i32
  }
  func.func @transform_1(%arg0: i32) -> (i32, i32) {
    %c0_i32 = arith.constant 0 : i32
    %c0_i32_0 = arith.constant 0 : i32
    %c0_i32_1 = arith.constant 0 : i32
    return %c0_i32, %c0_i32_0 : i32, i32
  }
  func.func @transform_2(%arg0: i32) -> (i32, i32) {
    %c0_i32 = arith.constant 0 : i32
    %c0_i32_0 = arith.constant 0 : i32
    %c0_i32_1 = arith.constant 0 : i32
    return %c0_i32, %c0_i32_0 : i32, i32
  }
  func.func @transform_3(%arg0: i32) -> (i32, i32, i32, i32) {
    %c0_i32 = arith.constant 0 : i32
    %c0_i32_0 = arith.constant 0 : i32
    %c0_i32_1 = arith.constant 0 : i32
    %c0_i32_2 = arith.constant 0 : i32
    %c0_i32_3 = arith.constant 0 : i32
    return %c0_i32, %c0_i32_0, %c0_i32_1, %c0_i32_2 : i32, i32, i32, i32
  }
  func.func @transform_4(%arg0: i32) -> (i32, i32, i32) {
    %c0_i32 = arith.constant 0 : i32
    %c0_i32_0 = arith.constant 0 : i32
    %c0_i32_1 = arith.constant 0 : i32
    return %arg0, %c0_i32, %c0_i32_0 : i32, i32, i32
  }
  func.func @transform_5(%arg0: i32) -> (i32, i32, i32) {
    %c0_i32 = arith.constant 0 : i32
    %c0_i32_0 = arith.constant 0 : i32
    %c0_i32_1 = arith.constant 0 : i32
    return %arg0, %c0_i32, %c0_i32_0 : i32, i32, i32
  }
}

module attributes {stable_mosaic.version = 11 : i64} {
  func.func @_affine_relu_kernel(%arg0: i32, %arg1: memref<1x256x8xf32, #tpu.memory_space<vmem>>, %arg2: memref<1x8xf32, #tpu.memory_space<vmem>>, %arg3: memref<1x8xf32, #tpu.memory_space<vmem>>, %arg4: memref<1x256x8xf32, #tpu.memory_space<vmem>>) attributes {dimension_semantics = [#tpu.dimension_semantics<parallel>], iteration_bounds = array<i64: 2>, scalar_prefetch = 0 : i64, scratch_operands = 0 : i64, tpu.core_type = #tpu.core_type<tc>, window_params = [{transform_indices = @transform_0, window_bounds = array<i64: 1, 256, 8>}, {pipeline_mode = #tpu.pipeline_mode<synchronous>, transform_indices = @transform_1, window_bounds = array<i64: 1, 8>}, {pipeline_mode = #tpu.pipeline_mode<synchronous>, transform_indices = @transform_2, window_bounds = array<i64: 1, 8>}, {transform_indices = @transform_3, window_bounds = array<i64: 1, 256, 8>}]} {
    %c0 = arith.constant 0 : index
    %c0_0 = arith.constant 0 : index
    %c0_1 = arith.constant 0 : index
    %0 = vector.load %arg1[%c0, %c0_0, %c0_1] : memref<1x256x8xf32, #tpu.memory_space<vmem>>, vector<1x256x8xf32>
    %1 = vector.shape_cast %0 : vector<1x256x8xf32> to vector<256x8xf32>
    %c0_2 = arith.constant 0 : index
    %c0_3 = arith.constant 0 : index
    %2 = vector.load %arg2[%c0_2, %c0_3] : memref<1x8xf32, #tpu.memory_space<vmem>>, vector<1x8xf32>
    %3 = vector.broadcast %2 : vector<1x8xf32> to vector<256x8xf32>
    %4 = arith.mulf %1, %3 : vector<256x8xf32>
    %c0_4 = arith.constant 0 : index
    %c0_5 = arith.constant 0 : index
    %5 = vector.load %arg3[%c0_4, %c0_5] : memref<1x8xf32, #tpu.memory_space<vmem>>, vector<1x8xf32>
    %6 = vector.broadcast %5 : vector<1x8xf32> to vector<256x8xf32>
    %7 = arith.addf %4, %6 : vector<256x8xf32>
    %cst = arith.constant 0.000000e+00 : f32
    %8 = vector.broadcast %cst : f32 to vector<256x8xf32>
    %9 = arith.maximumf %7, %8 : vector<256x8xf32>
    %c0_6 = arith.constant 0 : index
    %c0_7 = arith.constant 0 : index
    %c0_8 = arith.constant 0 : index
    %10 = vector.load %arg4[%c0_6, %c0_7, %c0_8] : memref<1x256x8xf32, #tpu.memory_space<vmem>>, vector<1x256x8xf32>
    %11 = vector.shape_cast %10 : vector<1x256x8xf32> to vector<256x8xf32>
    %12 = vector.shape_cast %9 : vector<256x8xf32> to vector<1x256x8xf32>
    tpu.vector_store %arg4[%c0_6, %c0_7, %c0_8], %12 {strides = array<i32>} : memref<1x256x8xf32, #tpu.memory_space<vmem>>, vector<1x256x8xf32>,
    return
  }
  func.func @transform_0(%arg0: i32) -> (i32, i32, i32) {
    %c0_i32 = arith.constant 0 : i32
    %c0_i32_0 = arith.constant 0 : i32
    %c0_i32_1 = arith.constant 0 : i32
    return %arg0, %c0_i32, %c0_i32_0 : i32, i32, i32
  }
  func.func @transform_1(%arg0: i32) -> (i32, i32) {
    %c0_i32 = arith.constant 0 : i32
    %c0_i32_0 = arith.constant 0 : i32
    %c0_i32_1 = arith.constant 0 : i32
    return %c0_i32, %c0_i32_0 : i32, i32
  }
  func.func @transform_2(%arg0: i32) -> (i32, i32) {
    %c0_i32 = arith.constant 0 : i32
    %c0_i32_0 = arith.constant 0 : i32
    %c0_i32_1 = arith.constant 0 : i32
    return %c0_i32, %c0_i32_0 : i32, i32
  }
  func.func @transform_3(%arg0: i32) -> (i32, i32, i32) {
    %c0_i32 = arith.constant 0 : i32
    %c0_i32_0 = arith.constant 0 : i32
    %c0_i32_1 = arith.constant 0 : i32
    return %arg0, %c0_i32, %c0_i32_0 : i32, i32, i32
  }
}

</mosaic_0001>

<bundles_post_ra>
// kernel: double_conv.5
= control target key start
LH: loop header
LB: loop body
LE: loop exit
PB: predicated region body
PF: predicated region fallthrough
CT: control target
= control target key end

     0   :  { %s452_s12 = smov 0   ;;  %s643_s0 = inlined_call_operand.vmem [shape: f32[2,256,8], index: 0, kind: input, shape index: {}]   ;;  %s644_s1 = inlined_call_operand.vmem [shape: f32[1,8], index: 1, kind: input, shape index: {}]   ;;  %s645_s2 = inlined_call_operand.vmem [shape: f32[1,8], index: 2, kind: input, shape index: {}]   ;;  %s646_s3 = inlined_call_operand.vmem [shape: f32[2,256,8], index: 3, kind: output, shape index: {}]  }
   0x1 LB: > { %s401_s13 = sadd.s32 4294967295, %s430_s12   ;;  %p405_p0 = scmp.ge.s32.totalorder %s430_s12, 1  ;;  %s430_s12 = sphi %s452_s12, %s13_s12  }
   0x2   : > { %p137_p1 = scmp.lt.s32.totalorder %s430_s12, 3 }
   0x4   : > { %p138_p2 = pnand %p405_p0, %p137_p1 }
   0x5   : > { %p161_p3 = scmp.lt.s32.totalorder (!%p138_p2), %s401_s13, 1  ;;  %v463_v0 = vld [vmem:[%s644_s1] ss:$0 sm:$0xff] (!%p138_p2)  ;;  %vm313_vm0 = vcmask (!%p138_p2), 64512  }
   0x6   : > { %141 = sbr.rel (%p138_p2) target bundleno = 46 (0x2e), region = 32  ;;  %v473_v1 = vld [vmem:[%s645_s2] ss:$0 sm:$0xff] (!%p138_p2) }
   0xd   : > { %s648_s13 = smov (!%p161_p3, %s401_s13), 1 }
   0xe   : > { %s414_s14 = sshll.u32 %s648_s13, 8 }
   0xf   : > { %s468_s19 = scalar_lea.vmem %s643_s0, %s414_s14  ;;  %s496_s24 = scalar_lea.vmem %s646_s3, %s414_s14 }
  0x10   : > { %v171_v2 = vld [vmem:[%s468_s19] sm:$0xff]  ;;  %v172_v3 = vld [vmem:[%s468_s19 + $0x8] sm:$0xff]  ;;  %v173_v4 = vld [vmem:[%s468_s19 + $0x10] sm:$0xff] }
  0x11   : > { %v210_v5 = vmul.f32 %v463_v0, %v171_v2  ;;  %v211_v6 = vmul.f32 %v463_v0, %v172_v3  ;;  %v212_v7 = vmul.f32 %v463_v0, %v173_v4  ;;  %v174_v8 = vld [vmem:[%s468_s19 + $0x18] sm:$0xff]  ;;  %v175_v9 = vld [vmem:[%s468_s19 + $0x20] sm:$0xff]  ;;  %v176_v10 = vld [vmem:[%s468_s19 + $0x28] sm:$0xff] }
  0x12   : > { %v213_v11 = vmul.f32 %v463_v0, %v174_v8  ;;  %v214_v12 = vmul.f32 %v463_v0, %v175_v9  ;;  %v215_v13 = vmul.f32 %v463_v0, %v176_v10  ;;  %v177_v14 = vld [vmem:[%s468_s19 + $0x30] sm:$0xff]  ;;  %v178_v15 = vld [vmem:[%s468_s19 + $0x38] sm:$0xff]  ;;  %v179_v24 = vld [vmem:[%s468_s19 + $0x40] sm:$0xff] }
  0x13   : > { %v249_v16 = vadd.f32 %v473_v1, %v210_v5  ;;  %v250_v17 = vadd.f32 %v473_v1, %v211_v6  ;;  %v251_v18 = vadd.f32 %v473_v1, %v212_v7  ;;  %v216_v19 = vmul.f32 %v463_v0, %v177_v14  ;;  %v180_v25 = vld [vmem:[%s468_s19 + $0x48] sm:$0xff]  ;;  %v181_v26 = vld [vmem:[%s468_s19 + $0x50] sm:$0xff]  ;;  %v182_v31 = vld [vmem:[%s468_s19 + $0x58] sm:$0xff] }
  0x14   : > { %v252_v20 = vadd.f32 %v473_v1, %v213_v11  ;;  %v253_v21 = vadd.f32 %v473_v1, %v214_v12  ;;  %v254_v22 = vadd.f32 %v473_v1, %v215_v13  ;;  %v217_v23 = vmul.f32 %v463_v0, %v178_v15  ;;  %v183_v32 = vld [vmem:[%s468_s19 + $0x60] sm:$0xff]  ;;  %v184_v33 = vld [vmem:[%s468_s19 + $0x68] sm:$0xff]  ;;  %v185_v38 = vld [vmem:[%s468_s19 + $0x70] sm:$0xff] }
  0x15   : > { %v281_v27 = vmax.f32 %v249_v16, 0.0  ;;  %v282_v28 = vmax.f32 %v250_v17, 0.0  ;;  %v283_v29 = vmax.f32 %v251_v18, 0.0  ;;  %v255_v30 = vadd.f32 %v473_v1, %v216_v19  ;;  %v186_v43 = vld [vmem:[%s468_s19 + $0x78] sm:$0xff]  ;;  %v187_v56 = vld [vmem:[%s468_s19 + $0x80] sm:$0xff]  ;;  %v188_v57 = vld [vmem:[%s468_s19 + $0x88] sm:$0xff] }
  0x16   : > { %v284_v34 = vmax.f32 %v252_v20, 0.0  ;;  %v285_v35 = vmax.f32 %v253_v21, 0.0  ;;  %v286_v36 = vmax.f32 %v254_v22, 0.0  ;;  %v256_v37 = vadd.f32 %v473_v1, %v217_v23  ;;  %v189_v58 = vld [vmem:[%s468_s19 + $0x90] sm:$0xff]  ;;  %v190_v63 = vld [vmem:[%s468_s19 + $0x98] sm:$0xff]  ;;  %v191_v2 = vld [vmem:[%s468_s19 + $0xa0] sm:$0xff] }
  0x17   : > { %314 = vst.msk [vmem:[%s496_s24] sm:$0xff] %vm313_vm0, %v281_v27  ;;  %315 = vst.msk [vmem:[%s496_s24 + $0x8] sm:$0xff] %vm313_vm0, %v282_v28  ;;  %v287_v39 = vmax.f32 %v255_v30, 0.0  ;;  %v218_v40 = vmul.f32 %v463_v0, %v179_v24  ;;  %v219_v41 = vmul.f32 %v463_v0, %v180_v25  ;;  %v220_v42 = vmul.f32 %v463_v0, %v181_v26  ;;  %v192_v3 = vld [vmem:[%s468_s19 + $0xa8] sm:$0xff]  ;;  %v193_v8 = vld [vmem:[%s468_s19 + $0xb0] sm:$0xff] }
  0x18   : > { %316 = vst.msk [vmem:[%s496_s24 + $0x10] sm:$0xff] %vm313_vm0, %v283_v29  ;;  %317 = vst.msk [vmem:[%s496_s24 + $0x18] sm:$0xff] %vm313_vm0, %v284_v34  ;;  %v288_v44 = vmax.f32 %v256_v37, 0.0  ;;  %v221_v45 = vmul.f32 %v463_v0, %v182_v31  ;;  %v222_v46 = vmul.f32 %v463_v0, %v183_v32  ;;  %v223_v47 = vmul.f32 %v463_v0, %v184_v33  ;;  %v194_v13 = vld [vmem:[%s468_s19 + $0xb8] sm:$0xff]  ;;  %v195_v26 = vld [vmem:[%s468_s19 + $0xc0] sm:$0xff] }
  0x19   : > { %318 = vst.msk [vmem:[%s496_s24 + $0x20] sm:$0xff] %vm313_vm0, %v285_v35  ;;  %319 = vst.msk [vmem:[%s496_s24 + $0x28] sm:$0xff] %vm313_vm0, %v286_v36  ;;  %v257_v48 = vadd.f32 %v473_v1, %v218_v40  ;;  %v258_v49 = vadd.f32 %v473_v1, %v219_v41  ;;  %v259_v50 = vadd.f32 %v473_v1, %v220_v42  ;;  %v196_v27 = vld [vmem:[%s468_s19 + $0xc8] sm:$0xff]  ;;  %v197_v28 = vld [vmem:[%s468_s19 + $0xd0] sm:$0xff] }
  0x1a   : > { %320 = vst.msk [vmem:[%s496_s24 + $0x30] sm:$0xff] %vm313_vm0, %v287_v39  ;;  %v224_v51 = vmul.f32 %v463_v0, %v185_v38  ;;  %321 = vst.msk [vmem:[%s496_s24 + $0x38] sm:$0xff] %vm313_vm0, %v288_v44  ;;  %v260_v52 = vadd.f32 %v473_v1, %v221_v45  ;;  %v261_v53 = vadd.f32 %v473_v1, %v222_v46  ;;  %v198_v33 = vld [vmem:[%s468_s19 + $0xd8] sm:$0xff]  ;;  %v199_v34 = vld [vmem:[%s468_s19 + $0xe0] sm:$0xff] }
  0x1b   : > { %v262_v54 = vadd.f32 %v473_v1, %v223_v47  ;;  %v225_v55 = vmul.f32 %v463_v0, %v186_v43  ;;  %v289_v59 = vmax.f32 %v257_v48, 0.0  ;;  %v290_v60 = vmax.f32 %v258_v49, 0.0  ;;  %v200_v35 = vld [vmem:[%s468_s19 + $0xe8] sm:$0xff]  ;;  %v201_v40 = vld [vmem:[%s468_s19 + $0xf0] sm:$0xff]  ;;  %v202_v45 = vld [vmem:[%s468_s19 + $0xf8] sm:$0xff] }
  0x1c   : > { %v291_v61 = vmax.f32 %v259_v50, 0.0  ;;  %v263_v62 = vadd.f32 %v473_v1, %v224_v51  ;;  %v292_v4 = vmax.f32 %v260_v52, 0.0  ;;  %v293_v5 = vmax.f32 %v261_v53, 0.0 }
  0x1d   : > { %v294_v6 = vmax.f32 %v262_v54, 0.0  ;;  %v264_v7 = vadd.f32 %v473_v1, %v225_v55  ;;  %322 = vst.msk [vmem:[%s496_s24 + $0x40] sm:$0xff] %vm313_vm0, %v289_v59  ;;  %323 = vst.msk [vmem:[%s496_s24 + $0x48] sm:$0xff] %vm313_vm0, %v290_v60  ;;  %v226_v10 = vmul.f32 %v463_v0, %v187_v56  ;;  %v227_v11 = vmul.f32 %v463_v0, %v188_v57 }
  0x1e   : > { %324 = vst.msk [vmem:[%s496_s24 + $0x50] sm:$0xff] %vm313_vm0, %v291_v61  ;;  %v295_v9 = vmax.f32 %v263_v62, 0.0  ;;  %v228_v12 = vmul.f32 %v463_v0, %v189_v58  ;;  %325 = vst.msk [vmem:[%s496_s24 + $0x58] sm:$0xff] %vm313_vm0, %v292_v4  ;;  %v229_v15 = vmul.f32 %v463_v0, %v190_v63  ;;  %v230_v16 = vmul.f32 %v463_v0, %v191_v2 }
  0x1f   : > { %326 = vst.msk [vmem:[%s496_s24 + $0x60] sm:$0xff] %vm313_vm0, %v293_v5  ;;  %327 = vst.msk [vmem:[%s496_s24 + $0x68] sm:$0xff] %vm313_vm0, %v294_v6  ;;  %v296_v14 = vmax.f32 %v264_v7, 0.0  ;;  %v231_v17 = vmul.f32 %v463_v0, %v192_v3  ;;  %v265_v18 = vadd.f32 %v473_v1, %v226_v10  ;;  %v266_v19 = vadd.f32 %v473_v1, %v227_v11 }
  0x20   : > { %328 = vst.msk [vmem:[%s496_s24 + $0x70] sm:$0xff] %vm313_vm0, %v295_v9  ;;  %v267_v20 = vadd.f32 %v473_v1, %v228_v12  ;;  %v232_v21 = vmul.f32 %v463_v0, %v193_v8  ;;  %v268_v22 = vadd.f32 %v473_v1, %v229_v15  ;;  %v269_v23 = vadd.f32 %v473_v1, %v230_v16 }
  0x21   : > { %329 = vst.msk [vmem:[%s496_s24 + $0x78] sm:$0xff] %vm313_vm0, %v296_v14  ;;  %v270_v24 = vadd.f32 %v473_v1, %v231_v17  ;;  %v233_v25 = vmul.f32 %v463_v0, %v194_v13  ;;  %v297_v29 = vmax.f32 %v265_v18, 0.0  ;;  %v298_v30 = vmax.f32 %v266_v19, 0.0 }
  0x22   : > { %v299_v31 = vmax.f32 %v267_v20, 0.0  ;;  %v271_v32 = vadd.f32 %v473_v1, %v232_v21  ;;  %v300_v36 = vmax.f32 %v268_v22, 0.0  ;;  %v301_v37 = vmax.f32 %v269_v23, 0.0 }
  0x23   : > { %v302_v38 = vmax.f32 %v270_v24, 0.0  ;;  %v272_v39 = vadd.f32 %v473_v1, %v233_v25  ;;  %330 = vst.msk [vmem:[%s496_s24 + $0x80] sm:$0xff] %vm313_vm0, %v297_v29  ;;  %331 = vst.msk [vmem:[%s496_s24 + $0x88] sm:$0xff] %vm313_vm0, %v298_v30  ;;  %v234_v42 = vmul.f32 %v463_v0, %v195_v26  ;;  %v235_v43 = vmul.f32 %v463_v0, %v196_v27 }
  0x24   : > { %332 = vst.msk [vmem:[%s496_s24 + $0x90] sm:$0xff] %vm313_vm0, %v299_v31  ;;  %v303_v41 = vmax.f32 %v271_v32, 0.0  ;;  %v236_v44 = vmul.f32 %v463_v0, %v197_v28  ;;  %333 = vst.msk [vmem:[%s496_s24 + $0x98] sm:$0xff] %vm313_vm0, %v300_v36  ;;  %v237_v47 = vmul.f32 %v463_v0, %v198_v33  ;;  %v238_v48 = vmul.f32 %v463_v0, %v199_v34 }
  0x25   : > { %334 = vst.msk [vmem:[%s496_s24 + $0xa0] sm:$0xff] %vm313_vm0, %v301_v37  ;;  %335 = vst.msk [vmem:[%s496_s24 + $0xa8] sm:$0xff] %vm313_vm0, %v302_v38  ;;  %v304_v46 = vmax.f32 %v272_v39, 0.0  ;;  %v239_v49 = vmul.f32 %v463_v0, %v200_v35  ;;  %v273_v50 = vadd.f32 %v473_v1, %v234_v42  ;;  %v274_v51 = vadd.f32 %v473_v1, %v235_v43 }
  0x26   : > { %336 = vst.msk [vmem:[%s496_s24 + $0xb0] sm:$0xff] %vm313_vm0, %v303_v41  ;;  %v275_v52 = vadd.f32 %v473_v1, %v236_v44  ;;  %v240_v53 = vmul.f32 %v463_v0, %v201_v40  ;;  %v276_v54 = vadd.f32 %v473_v1, %v237_v47  ;;  %v277_v55 = vadd.f32 %v473_v1, %v238_v48 }
  0x27   : > { %337 = vst.msk [vmem:[%s496_s24 + $0xb8] sm:$0xff] %vm313_vm0, %v304_v46  ;;  %v278_v56 = vadd.f32 %v473_v1, %v239_v49  ;;  %v241_v57 = vmul.f32 %v463_v0, %v202_v45  ;;  %v305_v58 = vmax.f32 %v273_v50, 0.0  ;;  %v306_v59 = vmax.f32 %v274_v51, 0.0 }
  0x28   : > { %v307_v60 = vmax.f32 %v275_v52, 0.0  ;;  %v279_v61 = vadd.f32 %v473_v1, %v240_v53  ;;  %v308_v62 = vmax.f32 %v276_v54, 0.0  ;;  %v309_v63 = vmax.f32 %v277_v55, 0.0 }
  0x29   : > { %v310_v2 = vmax.f32 %v278_v56, 0.0  ;;  %v280_v3 = vadd.f32 %v473_v1, %v241_v57  ;;  %338 = vst.msk [vmem:[%s496_s24 + $0xc0] sm:$0xff] %vm313_vm0, %v305_v58  ;;  %339 = vst.msk [vmem:[%s496_s24 + $0xc8] sm:$0xff] %vm313_vm0, %v306_v59 }
  0x2a   : > { %340 = vst.msk [vmem:[%s496_s24 + $0xd0] sm:$0xff] %vm313_vm0, %v307_v60  ;;  %v311_v4 = vmax.f32 %v279_v61, 0.0  ;;  %341 = vst.msk [vmem:[%s496_s24 + $0xd8] sm:$0xff] %vm313_vm0, %v308_v62 }
  0x2b   : > { %342 = vst.msk [vmem:[%s496_s24 + $0xe0] sm:$0xff] %vm313_vm0, %v309_v63  ;;  %343 = vst.msk [vmem:[%s496_s24 + $0xe8] sm:$0xff] %vm313_vm0, %v310_v2  ;;  %v312_v0 = vmax.f32 %v280_v3, 0.0 }
  0x2c   : > { %344 = vst.msk [vmem:[%s496_s24 + $0xf0] sm:$0xff] %vm313_vm0, %v311_v4 }
  0x2d   : > { %345 = vst.msk [vmem:[%s496_s24 + $0xf8] sm:$0xff] %vm313_vm0, %v312_v0 }
  0x2e PF: > { %s13_s12 = sadd.s32 1, %s430_s12  }
  0x2f   : > { %p10_p4 = scmp.ge.s32.totalorder %s13_s12, 4  }
  0x31   :  { %12 = sbr.rel (!%p10_p4) target bundleno = 1 (0x1), region = 62 }

// kernel: double_conv.3
= control target key start
LH: loop header
LB: loop body
LE: loop exit
PB: predicated region body
PF: predicated region fallthrough
CT: control target
= control target key end

     0   :  { %s6119_s18 = smov 0   ;;  %s7857_s0 = inlined_call_operand.vmem [shape: f32[2,256,4], index: 0, kind: input, shape index: {}]   ;;  %s7858_s1 = inlined_call_operand.vmem [shape: f32[1,4], index: 1, kind: input, shape index: {}]   ;;  %s7859_s2 = inlined_call_operand.vmem [shape: f32[1,4], index: 2, kind: input, shape index: {}]   ;;  %s7860_s3 = inlined_call_operand.vmem [shape: f32[3,3,4,8], index: 3, kind: input, shape index: {}]   ;;  %s7861_s4 = inlined_call_operand.vmem [shape: f32[2,256,8], index: 4, kind: output, shape index: {0}]   ;;  %s7862_s5 = inlined_call_operand.vmem [shape: f32[2,2,8], index: 5, kind: output, shape index: {1}]  }
   0x1 LB: > { %s4731_s1 = sadd.s32 4294967295, %s6086_s18   ;;  %p4735_p0 = scmp.ge.s32.totalorder %s6086_s18, 1  ;;  %s6086_s18 = sphi %s6119_s18, %s16_s18  }
   0x2   : > { %p190_p1 = scmp.lt.s32.totalorder %s6086_s18, 3 }
   0x4   : > { %p191_p2 = pnand %p4735_p0, %p190_p1 }
   0x6   : > { %194 = sbr.rel (%p191_p2) target bundleno = 620 (0x26c), region = 36 }
   0xd   : > { %v4741_v0 = vld [vmem:[%s7860_s3 + $0x4] sm:$0xf]  ;;  %vm1095_vm0 = vcmask 1043456   ;;  %v6133_v1 = vld [vmem:[%s7860_s3 + $0x10] sm:$0xf]  ;;  %v7864_v2 = vmov 0.0   ;;  %v268_v14 = vlaneseq }
   0xe   : > { %7972 = vst [vmem:[#allocation2_spill] sm:$0xff] %v6133_v1  ;;  %5337 = vmatprep.subr.msk.mxu1 %vm1095_vm0, %v4741_v0  ;;  %5339 = vmatprep.mubr.f32.mxu1 %v7864_v2  ;;  %p222_p3 = scmp.lt.s32.totalorder %s4731_s1, 1  ;;  %v1028_v3 = vld [vmem:[%s7860_s3] sm:$0xf]  ;;  %v4905_v4 = vld [vmem:[%s7860_s3 + $0x14] sm:$0xf] }
   0xf   : > { %5338 = vmatpush3.msk.msra.mxu1 %vm1095_vm0, %v4741_v0  ;;  %5537 = vmatprep.subr.msk.mxu0 %vm1095_vm0, %v6133_v1  ;;  %v6154_v5 = vld [vmem:[%s7860_s3 + $0x8] sm:$0xf]  ;;  %vm1031_vm1 = vcmask 31744   ;;  %v6185_v9 = vld [vmem:[%s7860_s3 + $0x18] sm:$0xf]  ;;  %v6232_v17 = vshrl.u32 %v268_v14, 7 }
  0x10   : > { %5340 = vmatmul.mubr.f32.vlgmr.msra.gmra.mrb[0].mxu1 %v7864_v2  ;;  %5538 = vmatpush3.msk.msra.mxu0 %vm1095_vm0, %v6133_v1  ;;  %s8158_s1 = smov (!%p222_p3, %s4731_s1), 1  ;;  %vm1643_vm2 = vcmask 1046528   ;;  %v6345_v53 = vld [vmem:[%s7860_s3 + $0x1c] sm:$0xf]  ;;  %vm715_vm7 = vcmask 1040384  }
  0x11   : > { %5387 = vmatprep.subr.msk.mxu1 %vm1095_vm0, %v1028_v3  ;;  %5587 = vmatprep.subr.msk.mxu0 %vm1095_vm0, %v4905_v4  ;;  %s5038_s28 = sshll.u32 %s8158_s1, 8  ;;  %v270_v20 = vadd.s32 8, %v6232_v17  ;;  %v272_v22 = vadd.s32 24, %v6232_v17  ;;  %v274_v27 = vadd.s32 40, %v6232_v17  ;;  %v276_v37 = vadd.s32 56, %v6232_v17  ;;  %s4740_s20 = sshll.u32 %s8158_s1, 1 }
  0x12   : > { %5388 = vmatpush3.msk.msra.mxu1 %vm1095_vm0, %v1028_v3  ;;  %s6165_s6 = scalar_lea.vmem %s7857_s0, %s5038_s28  ;;  %v278_v42 = vadd.s32 72, %v6232_v17  ;;  %v280_v52 = vadd.s32 88, %v6232_v17  ;;  %v282_v63 = vadd.s32 104, %v6232_v17  ;;  %v284_v14 = vadd.s32 120, %v6232_v17  ;;  %s7520_s19 = scalar_lea.vmem %s7861_s4, %s5038_s28 }
  0x13   : > { %5437 = vmatprep.subr.msk.mxu1 %vm1095_vm0, %v6154_v5  ;;  %v6170_v6 = vld [vmem:[%s6165_s6] sm:$0xff]  ;;  %v6173_v7 = vld [vmem:[%s6165_s6 + $0x8] sm:$0xff]  ;;  %v6176_v8 = vld [vmem:[%s6165_s6 + $0x10] sm:$0xff]  ;;  %v312_v24 = vand.u32 15, %v270_v20  ;;  %v326_v26 = vand.u32 15, %v272_v22  ;;  %v340_v36 = vand.u32 15, %v274_v27  ;;  %s235_s23 = scalar_lea.vmem %s7862_s5, %s4740_s20 }
  0x14   : > { %5342 = vmatprep.mubr.msk.f32.mxu1 %vm1031_vm1, %v6170_v6  ;;  %5539 = vmatprep.mubr.msk.f32.mxu0 %vm1031_vm1, %v6170_v6  ;;  %v6195_v10 = vld [vmem:[%s6165_s6 + $0x18] sm:$0xff]  ;;  %v6200_v11 = vld [vmem:[%s6165_s6 + $0x20] sm:$0xff]  ;;  %v6213_v12 = vld [vmem:[%s6165_s6 + $0x28] sm:$0xff]  ;;  %v7863_v28 = vrot.slane %v6170_v6, 1  ;;  %v1645_v29 = vrot.slane %v6173_v7, 1  ;;  %v1647_v30 = vrot.slane %v6176_v8, 1 }
  0x15   : > { %5343 = vmatmul.mubr.msk.f32.gmra.mrb[2].mxu1 %vm1031_vm1, %v6173_v7  ;;  %5540 = vmatmul.mubr.msk.f32.vlgmr.msra.gmra.mrb[0].mxu0 %vm1031_vm1, %v6173_v7  ;;  %v6216_v13 = vld [vmem:[%s6165_s6 + $0x30] sm:$0xff]  ;;  %v6227_v15 = vld [vmem:[%s6165_s6 + $0x38] sm:$0xff]  ;;  %v6230_v16 = vld [vmem:[%s6165_s6 + $0x40] sm:$0xff]  ;;  %v6282_v32 = vadd.s32 1, %v312_v24  ;;  %v1649_v34 = vrot.slane %v6195_v10, 1  ;;  %v1651_v35 = vrot.slane %v6200_v11, 1 }
  0x16   : > { %5588 = vmatpush3.msk.msra.mxu0 %vm1095_vm0, %v4905_v4  ;;  %5345 = vmatprep.mubr.msk.f32.mxu1 %vm1031_vm1, %v6176_v8  ;;  %v6243_v18 = vld [vmem:[%s6165_s6 + $0x48] sm:$0xff]  ;;  %v6246_v19 = vld [vmem:[%s6165_s6 + $0x50] sm:$0xff]  ;;  %v6258_v21 = vld [vmem:[%s6165_s6 + $0x58] sm:$0xff]  ;;  %v6304_v39 = vsel %vm1643_vm2, %v7863_v28, %v1645_v29  ;;  %v6307_v40 = vsel %vm1643_vm2, %v1645_v29, %v1647_v30  ;;  %v6310_v41 = vadd.s32 1, %v326_v26  ;;  %v1653_v45 = vrot.slane %v6213_v12, 1 }
  0x17   : > { %5542 = vmatprep.mubr.msk.f32.mxu0 %vm1031_vm1, %v6176_v8  ;;  %5637 = vmatprep.subr.msk.mxu0 %vm1095_vm0, %v6185_v9  ;;  %v6262_v23 = vld [vmem:[%s6165_s6 + $0x60] sm:$0xff]  ;;  %v6273_v25 = vld [vmem:[%s6165_s6 + $0x68] sm:$0xff]  ;;  %v6280_v31 = vld [vmem:[%s6165_s6 + $0x70] sm:$0xff]  ;;  %7973 = vst [vmem:[#allocation3_spill] sm:$0xff] %v6282_v32  ;;  %vm7960_vm3 = vcmp.lt.s32.totalorder %v6282_v32, 16  ;;  %v354_v46 = vand.u32 15, %v276_v37  ;;  %v6332_v48 = vsel %vm1643_vm2, %v1649_v34, %v1651_v35  ;;  %v6339_v51 = vsel %vm1643_vm2, %v1647_v30, %v1649_v34 }
  0x18   : > { %v6293_v33 = vld [vmem:[%s6165_s6 + $0x78] sm:$0xff]  ;;  %v6299_v38 = vld [vmem:[%s6165_s6 + $0x80] sm:$0xff]  ;;  %7975 = vst [vmem:[#allocation5_spill] sm:$0xff] %v6304_v39  ;;  %7976 = vst [vmem:[#allocation6_spill] sm:$0xff] %v6307_v40  ;;  %v2984_v44 = vsel %vm7960_vm3, %v6307_v40, 0.0  ;;  %vm7959_vm4 = vcmp.lt.s32.totalorder %v6310_v41, 16  ;;  %v6370_v61 = vsel %vm1643_vm2, %v1651_v35, %v1653_v45 }
  0x19   : > { %5346 = vmatmul.mubr.msk.f32.gmra.mrb[4].mxu1 %vm1031_vm1, %v6195_v10  ;;  %5543 = vmatmul.mubr.msk.f32.gmra.mrb[2].mxu0 %vm1031_vm1, %v6195_v10  ;;  %7974 = vst [vmem:[#allocation4_spill] sm:$0xff] %v6299_v38  ;;  %7977 = vst [vmem:[#allocation7_spill] sm:$0xff] %v6310_v41  ;;  %v6322_v43 = vld [vmem:[%s6165_s6 + $0x88] sm:$0xff]  ;;  %v6329_v47 = vld [vmem:[%s6165_s6 + $0x90] sm:$0xff]  ;;  %v1655_v49 = vrot.slane %v6216_v13, 1  ;;  %v6336_v50 = vadd.s32 1, %v340_v36 }
  0x1a   : > { %5348 = vmatprep.mubr.msk.f32.mxu1 %vm1031_vm1, %v6200_v11  ;;  %5545 = vmatprep.mubr.msk.f32.mxu0 %vm1031_vm1, %v6200_v11  ;;  %7978 = vst [vmem:[#allocation8_spill] sm:$0xff] %v6332_v48  ;;  %7980 = vst [vmem:[#allocation10_spill] sm:$0xff] %v6339_v51  ;;  %v368_v54 = vand.u32 15, %v278_v42  ;;  %v6355_v55 = vld [vmem:[%s6165_s6 + $0x98] sm:$0xff]  ;;  %v2986_v56 = vsel %vm7959_vm4, %v6332_v48, 0.0  ;;  %v1657_v57 = vrot.slane %v6227_v15, 1 }
  0x1b   : > { %7979 = vst [vmem:[#allocation9_spill] sm:$0xff] %v6336_v50  ;;  %v1659_v58 = vrot.slane %v6230_v16, 1  ;;  %v6362_v59 = vadd.s32 1, %v354_v46  ;;  %v6367_v60 = vld [vmem:[%s6165_s6 + $0xa0] sm:$0xff]  ;;  %7983 = vst [vmem:[#allocation13_spill] sm:$0xff] %v6370_v61  ;;  %v6373_v62 = vsel %vm1643_vm2, %v1653_v45, %v1655_v49  ;;  %vm7956_vm5 = vcmp.lt.s32.totalorder %v6336_v50, 16 }
  0x1c   : > { %7982 = vst [vmem:[#allocation12_spill] sm:$0xff] %v6367_v60  ;;  %7984 = vst [vmem:[#allocation14_spill] sm:$0xff] %v6373_v62  ;;  %v382_v0 = vand.u32 15, %v280_v52  ;;  %v1661_v3 = vrot.slane %v6243_v18, 1  ;;  %v1663_v4 = vrot.slane %v6246_v19, 1  ;;  %v6392_v20 = vld [vmem:[%s6165_s6 + $0xa8] sm:$0xff]  ;;  %v6406_v29 = vsel %vm1643_vm2, %v1655_v49, %v1657_v57 }
  0x1d   : > { %5349 = vmatmul.mubr.msk.f32.gmra.mrb[6].mxu1 %vm1031_vm1, %v6213_v12  ;;  %5546 = vmatmul.mubr.msk.f32.gmra.mrb[4].mxu0 %vm1031_vm1, %v6213_v12  ;;  %7981 = vst [vmem:[#allocation11_spill] sm:$0xff] %v6362_v59  ;;  %v2988_v22 = vsel %vm7956_vm5, %v6373_v62, 0.0  ;;  %v6398_v24 = vsel %vm1643_vm2, %v1657_v57, %v1659_v58  ;;  %vm7952_vm6 = vcmp.lt.s32.totalorder %v6362_v59, 16  ;;  %v271_v26 = vadd.s32 16, %v6232_v17  ;;  %v6403_v27 = vld [vmem:[%s6165_s6 + $0xb0] sm:$0xff]  ;;  %7988 = vst [vmem:[#allocation18_spill] sm:$0xff] %v6406_v29 }
  0x1e   : > { %5351 = vmatprep.mubr.msk.f32.mxu1 %vm1031_vm1, %v6216_v13  ;;  %5548 = vmatprep.mubr.msk.f32.mxu0 %vm1031_vm1, %v6216_v13  ;;  %7986 = vst [vmem:[#allocation16_spill] sm:$0xff] %v6398_v24  ;;  %7987 = vst [vmem:[#allocation17_spill] sm:$0xff] %v6403_v27  ;;  %v396_v30 = vand.u32 15, %v282_v63  ;;  %v1665_v34 = vrot.slane %v6258_v21, 1  ;;  %v1667_v35 = vrot.slane %v6262_v23, 1  ;;  %v6410_v36 = vadd.s32 1, %v382_v0 }
  0x1f   : > { %v2990_v42 = vsel %vm7952_vm6, %v6398_v24, 0.0  ;;  %v410_v45 = vand.u32 15, %v284_v14  ;;  %v6427_v46 = vld [vmem:[%s6165_s6 + $0xb8] sm:$0xff]  ;;  %v1669_v49 = vrot.slane %v6273_v25, 1  ;;  %v319_v52 = vand.u32 15, %v271_v26  ;;  %v6465_v37 = vld [vmem:[%s6165_s6 + $0xc8] sm:$0xff] }
  0x20   : > { %7989 = vst [vmem:[#allocation19_spill] sm:$0xff] %v6410_v36  ;;  %v6436_v57 = vsel %vm1643_vm2, %v1659_v58, %v1661_v3  ;;  %v1671_v63 = vrot.slane %v6280_v31, 1  ;;  %v6439_v0 = vadd.s32 1, %v396_v30  ;;  %v273_v14 = vadd.s32 32, %v6232_v17  ;;  %v6512_v59 = vld [vmem:[%s6165_s6 + $0xe0] sm:$0xff] }
  0x21   : > { %5352 = vmatmul.mubr.msk.f32.gmra.mrb[8].mxu1 %vm1031_vm1, %v6227_v15  ;;  %5549 = vmatmul.mubr.msk.f32.gmra.mrb[6].mxu0 %vm1031_vm1, %v6227_v15  ;;  %7991 = vst [vmem:[#allocation21_spill] sm:$0xff] %v6436_v57  ;;  %vm7930_vm9 = vcmp.lt.s32.totalorder %v6410_v36, 16  ;;  %v1673_v26 = vrot.slane %v6293_v33, 1  ;;  %v1675_v28 = vrot.slane %v6299_v38, 1  ;;  %v6457_v30 = vadd.s32 1, %v410_v45 }
  0x22   : > { %5354 = vmatprep.mubr.msk.f32.mxu1 %vm1031_vm1, %v6230_v16  ;;  %5551 = vmatprep.mubr.msk.f32.mxu0 %vm1031_vm1, %v6230_v16  ;;  %7992 = vst [vmem:[#allocation22_spill] sm:$0xff] %v6439_v0  ;;  %v716_v2 = vrot.slane %v6170_v6, 7  ;;  %v6480_v24 = vsel %vm1643_vm2, %v1669_v49, %v1671_v63  ;;  %vm7929_vm10 = vcmp.lt.s32.totalorder %v6439_v0, 16  ;;  %v290_v36 = vadd.s32 168, %v6232_v17 }
  0x23   : > { %7995 = vst [vmem:[#allocation25_spill] sm:$0xff] %v6457_v30  ;;  %7997 = vst [vmem:[#allocation27_spill] sm:$0xff] %v6480_v24  ;;  %vm7916_vm11 = vcmp.lt.s32.totalorder %v6457_v30, 16  ;;  %v1681_v62 = vrot.slane %v6355_v55, 1  ;;  %v2996_v50 = vsel %vm7929_vm10, %v6480_v24, 0.0  ;;  %v8002_v24 = vrot.slane %v6173_v7, 7 }
  0x24   : > { %v723_v7 = vrot.slane %v6200_v11, 7  ;;  %v8009_v11 = vmov 0.0   ;;  %v281_v1 = vadd.s32 96, %v6232_v17 }
  0x25   : > { %5355 = vmatmul.mubr.msk.f32.gmra.mrb[10].mxu1 %vm1031_vm1, %v6243_v18  ;;  %5552 = vmatmul.mubr.msk.f32.gmra.mrb[8].mxu0 %vm1031_vm1, %v6243_v18  ;;  %v6538_v0 = vsel %vm715_vm7, %v716_v2, %v8002_v24  ;;  %v8005_v30 = vmov %v8002_v24  ;;  %v452_v24 = vand.u32 15, %v290_v36 }
  0x26   : > { %5357 = vmatprep.mubr.msk.f32.mxu1 %vm1031_vm1, %v6246_v19  ;;  %5554 = vmatprep.mubr.msk.f32.mxu0 %vm1031_vm1, %v6246_v19  ;;  %8003 = vst [vmem:[#allocation32_spill] sm:$0xff] %v6538_v0 }
  0x29   : > { %5358 = vmatmul.mubr.msk.f32.gmra.mrb[12].mxu1 %vm1031_vm1, %v6258_v21  ;;  %5555 = vmatmul.mubr.msk.f32.gmra.mrb[10].mxu0 %vm1031_vm1, %v6258_v21 }
  0x2a   : > { %5360 = vmatprep.mubr.msk.f32.mxu1 %vm1031_vm1, %v6262_v23  ;;  %5557 = vmatprep.mubr.msk.f32.mxu0 %vm1031_vm1, %v6262_v23 }
  0x2d   : > { %5361 = vmatmul.mubr.msk.f32.gmra.mrb[14].mxu1 %vm1031_vm1, %v6273_v25  ;;  %5558 = vmatmul.mubr.msk.f32.gmra.mrb[12].mxu0 %vm1031_vm1, %v6273_v25 }
  0x2e   : > { %5363 = vmatprep.mubr.msk.f32.mxu1 %vm1031_vm1, %v6280_v31  ;;  %5560 = vmatprep.mubr.msk.f32.mxu0 %vm1031_vm1, %v6280_v31 }
  0x31   : > { %5364 = vmatmul.mubr.msk.f32.gmra.mrb[16].mxu1 %vm1031_vm1, %v6293_v33  ;;  %5561 = vmatmul.mubr.msk.f32.gmra.mrb[14].mxu0 %vm1031_vm1, %v6293_v33 }
  0x32   : > { %5366 = vmatprep.mubr.msk.f32.mxu1 %vm1031_vm1, %v6299_v38  ;;  %5589 = vmatprep.mubr.msk.f32.mxu0 %vm1031_vm1, %v6304_v39 }
  0x35   : > { %5367 = vmatmul.mubr.msk.f32.gmra.mrb[18].mxu1 %vm1031_vm1, %v6322_v43  ;;  %5590 = vmatmul.mubr.msk.f32.vlgmr.msra.gmra.mrb[0].mxu0 %vm1031_vm1, %v2984_v44  ;;  %v6420_v44 = vsel %vm1643_vm2, %v1661_v3, %v1663_v4  ;;  %v6455_v3 = vsel %vm1643_vm2, %v1663_v4, %v1665_v34  ;;  %v288_v4 = vadd.s32 152, %v6232_v17 }
  0x36   : > { %5638 = vmatpush3.msk.msra.mxu0 %vm1095_vm0, %v6185_v9  ;;  %5369 = vmatprep.mubr.msk.f32.mxu1 %vm1031_vm1, %v6329_v47  ;;  %v6384_v9 = vadd.s32 1, %v368_v54  ;;  %7990 = vst [vmem:[#allocation20_spill] sm:$0xff] %v6420_v44  ;;  %v286_v54 = vadd.s32 136, %v6232_v17  ;;  %7994 = vst [vmem:[#allocation24_spill] sm:$0xff] %v6455_v3 }
  0x37   : > { %5592 = vmatprep.mubr.msk.f32.mxu0 %vm1031_vm1, %v6339_v51  ;;  %5687 = vmatprep.subr.msk.mxu0 %vm1095_vm0, %v6345_v53 }
  0x38   : > { %7985 = vst [vmem:[#allocation15_spill] sm:$0xff] %v6384_v9  ;;  %vm7931_vm8 = vcmp.lt.s32.totalorder %v6384_v9, 16  ;;  %v6470_v9 = vadd.s32 4294967295, %v319_v52  ;;  %v6487_v52 = vsel %vm1643_vm2, %v1673_v26, %v1675_v28 }
  0x39   : > { %5370 = vmatmul.mubr.msk.f32.gmra.mrb[20].mxu1 %vm1031_vm1, %v6355_v55  ;;  %5593 = vmatmul.mubr.msk.f32.gmra.mrb[2].mxu0 %vm1031_vm1, %v2986_v56  ;;  %v6433_v56 = vld [vmem:[%s6165_s6 + $0xc0] sm:$0xff]  ;;  %v2992_v58 = vsel %vm7931_vm8, %v6420_v44, 0.0  ;;  %v424_v44 = vand.u32 15, %v286_v54  ;;  %7999 = vst [vmem:[#allocation29_spill] sm:$0xff] %v6487_v52  ;;  %v1677_v54 = vrot.slane %v6322_v43, 1 }
  0x3a   : > { %5372 = vmatprep.mubr.msk.f32.mxu1 %vm1031_vm1, %v6367_v60  ;;  %5595 = vmatprep.mubr.msk.f32.mxu0 %vm1031_vm1, %v6370_v61  ;;  %vm840_vm12 = vcmp.ge.s32.totalorder %v6470_v9, 0  ;;  %v721_v61 = vrot.slane %v6195_v10, 7  ;;  %v757_v9 = vrot.slane %v6392_v20, 7 }
  0x3d   : > { %5373 = vmatmul.mubr.msk.f32.gmra.mrb[22].mxu1 %vm1031_vm1, %v6392_v20  ;;  %5596 = vmatmul.mubr.msk.f32.gmra.mrb[4].mxu0 %vm1031_vm1, %v2988_v22  ;;  %v6443_v22 = vsel %vm1643_vm2, %v1665_v34, %v1667_v35  ;;  %v6474_v34 = vld [vmem:[%s6165_s6 + $0xd0] sm:$0xff] }
  0x3e   : > { %5375 = vmatprep.mubr.msk.f32.mxu1 %vm1031_vm1, %v6403_v27  ;;  %5598 = vmatprep.mubr.msk.f32.mxu0 %vm1031_vm1, %v6406_v29  ;;  %7993 = vst [vmem:[#allocation23_spill] sm:$0xff] %v6443_v22  ;;  %v2994_v45 = vsel %vm7930_vm9, %v6443_v22, 0.0  ;;  %v1679_v29 = vrot.slane %v6329_v47, 1  ;;  %v438_v22 = vand.u32 15, %v288_v4  ;;  %v6526_v4 = vsel %vm1643_vm2, %v1675_v28, %v1677_v54 }
  0x3f   : > { %8001 = vst [vmem:[#allocation31_spill] sm:$0xff] %v6526_v4 }
  0x41   : > { %5376 = vmatmul.mubr.msk.f32.gmra.mrb[24].mxu1 %vm1031_vm1, %v6427_v46  ;;  %5599 = vmatmul.mubr.msk.f32.gmra.mrb[6].mxu0 %vm1031_vm1, %v2990_v42  ;;  %v6468_v42 = vsel %vm1643_vm2, %v1667_v35, %v1669_v49  ;;  %v6484_v35 = vsel %vm1643_vm2, %v1671_v63, %v1673_v26  ;;  %v6496_v49 = vsel %vm715_vm7, 0.0, %v716_v2  ;;  %v719_v63 = vrot.slane %v6176_v8, 7  ;;  %v6505_v26 = vld [vmem:[%s6165_s6 + $0xd8] sm:$0xff] }
  0x42   : > { %5378 = vmatprep.mubr.msk.f32.mxu1 %vm1031_vm1, %v6433_v56  ;;  %5601 = vmatprep.mubr.msk.f32.mxu0 %vm1031_vm1, %v6436_v57  ;;  %7996 = vst [vmem:[#allocation26_spill] sm:$0xff] %v6468_v42  ;;  %v333_v57 = vand.u32 15, %v273_v14  ;;  %7998 = vst [vmem:[#allocation28_spill] sm:$0xff] %v6484_v35  ;;  %v275_v14 = vadd.s32 48, %v6232_v17  ;;  %v998_v10 = vsel %vm840_vm12, %v6496_v49, 0.0  ;;  %v6556_v2 = vadd.s32 1, %v438_v22 }
  0x43   : > { %v6554_v48 = vsel %vm715_vm7, %v8005_v30, %v719_v63  ;;  %v1685_v30 = vrot.slane %v6392_v20, 1  ;;  %v292_v22 = vadd.s32 184, %v6232_v17 }
  0x44   : > { %v6514_v8 = vadd.s32 4294967295, %v333_v57  ;;  %v1683_v57 = vrot.slane %v6367_v60, 1  ;;  %v347_v28 = vand.u32 15, %v275_v14  ;;  %8006 = vst [vmem:[#allocation34_spill] sm:$0xff] %v6556_v2  ;;  %v6563_v14 = vsel %vm715_vm7, %v719_v63, %v721_v61 }
  0x45   : > { %5379 = vmatmul.mubr.msk.f32.gmra.mrb[26].mxu1 %vm1031_vm1, %v6465_v37  ;;  %5602 = vmatmul.mubr.msk.f32.gmra.mrb[8].mxu0 %vm1031_vm1, %v2992_v58  ;;  %v6508_v58 = vadd.s32 1, %v424_v44  ;;  %v2998_v44 = vsel %vm7916_vm11, %v6487_v52, 0.0  ;;  %v6541_v52 = vsel %vm1643_vm2, %v1677_v54, %v1679_v29  ;;  %v6560_v54 = vsel %vm1643_vm2, %v1679_v29, %v1681_v62 }
  0x46   : > { %5381 = vmatprep.mubr.msk.f32.mxu1 %vm1031_vm1, %v6474_v34  ;;  %5604 = vmatprep.mubr.msk.f32.mxu0 %vm1031_vm1, %v6455_v3  ;;  %v277_v3 = vadd.s32 64, %v6232_v17  ;;  %8004 = vst [vmem:[#allocation33_spill] sm:$0xff] %v6541_v52  ;;  %vm842_vm14 = vcmp.ge.s32.totalorder %v6514_v8, 0  ;;  %8007 = vst [vmem:[#allocation35_spill] sm:$0xff] %v6560_v54  ;;  %v6566_v51 = vsel %vm1643_vm2, %v1681_v62, %v1683_v57  ;;  %v6577_v36 = vadd.s32 4294967295, %v347_v28 }
  0x47   : > { %8000 = vst [vmem:[#allocation30_spill] sm:$0xff] %v6508_v58  ;;  %vm7914_vm13 = vcmp.lt.s32.totalorder %v6508_v58, 16  ;;  %8008 = vst [vmem:[#allocation36_spill] sm:$0xff] %v6566_v51  ;;  %v725_v62 = vrot.slane %v6213_v12, 7  ;;  %vm7915_vm15 = vcmp.lt.s32.totalorder %v6556_v2, 16  ;;  %v1687_v63 = vrot.slane %v6403_v27, 1 }
  0x48   : > { %v3000_v29 = vsel %vm7914_vm13, %v6541_v52, 0.0  ;;  %v294_v58 = vadd.s32 200, %v6232_v17  ;;  %v1000_v28 = vsel %vm842_vm14, %v6554_v48, 0.0  ;;  %v727_v12 = vrot.slane %v6216_v13, 7 }
  0x49   : > { %5382 = vmatmul.mubr.msk.f32.gmra.mrb[28].mxu1 %vm1031_vm1, %v6505_v26  ;;  %5605 = vmatmul.mubr.msk.f32.gmra.mrb[10].mxu0 %vm1031_vm1, %v2994_v45  ;;  %v6548_v45 = vld [vmem:[%s6165_s6 + $0xe8] sm:$0xff]  ;;  %v6600_v41 = vsel %vm1643_vm2, %v1683_v57, %v1685_v30  ;;  %v466_v40 = vand.u32 15, %v292_v22  ;;  %v3002_v13 = vsel %vm7915_vm15, %v6566_v51, 0.0  ;;  %vm844_vm13 = vcmp.ge.s32.totalorder %v6577_v36, 0 }
  0x4a   : > { %5384 = vmatprep.mubr.msk.f32.mxu1 %vm1031_vm1, %v6512_v59  ;;  %5607 = vmatprep.mubr.msk.f32.mxu0 %vm1031_vm1, %v6468_v42  ;;  %v361_v42 = vand.u32 15, %v277_v3  ;;  %v279_v3 = vadd.s32 80, %v6232_v17  ;;  %8011 = vst [vmem:[#allocation38_spill] sm:$0xff] %v6600_v41  ;;  %v6615_v57 = vld [vmem:[%s7860_s3 + $0xc] sm:$0xf]  ;;  %v729_v22 = vrot.slane %v6227_v15, 7 }
  0x4b   : > { %8012 = vst [vmem:[#allocation39_spill] sm:$0xff] %v6615_v57  ;;  %v389_v51 = vand.u32 15, %v281_v1  ;;  %v6638_v15 = vadd.s32 1, %v466_v40  ;;  %v1695_v40 = vrot.slane %v6474_v34, 1  ;;  %v761_v8 = vrot.slane %v6427_v46, 7 }
  0x4c   : > { %v6593_v52 = vadd.s32 4294967295, %v361_v42  ;;  %v6610_v42 = vsel %vm715_vm7, %v723_v7, %v725_v62 }
  0x4d   : > { %5385 = vmatmul.mubr.msk.f32.gmra.mrb[30].mxu1 %vm1031_vm1, %v6548_v45  ;;  %5608 = vmatmul.mubr.msk.f32.gmra.mrb[12].mxu0 %vm1031_vm1, %v2996_v50  ;;  %v6586_v50 = vadd.s32 1, %v452_v24  ;;  %v1689_v24 = vrot.slane %v6427_v46, 1  ;;  %8015 = vst [vmem:[#allocation42_spill] sm:$0xff] %v6638_v15 }
  0x4e   : > { %5389 = vmatprep.mubr.f32.mxu1 %v8009_v11  ;;  %5610 = vmatprep.mubr.msk.f32.mxu0 %vm1031_vm1, %v6484_v35  ;;  %v6597_v35 = vsel %vm715_vm7, %v721_v61, %v723_v7  ;;  %v375_v61 = vand.u32 15, %v279_v3  ;;  %v480_v7 = vand.u32 15, %v294_v58  ;;  %v6628_v3 = vsel %vm715_vm7, %v725_v62, %v727_v12 }
  0x4f   : > { %8010 = vst [vmem:[#allocation37_spill] sm:$0xff] %v6586_v50  ;;  %vm7926_vm15 = vcmp.lt.s32.totalorder %v6586_v50, 16  ;;  %vm846_vm11 = vcmp.ge.s32.totalorder %v6593_v52, 0  ;;  %v6636_v2 = vsel %vm1643_vm2, %v1687_v63, %v1689_v24  ;;  %v731_v58 = vrot.slane %v6230_v16, 7 }
  0x50   : > { %8014 = vst [vmem:[#allocation41_spill] sm:$0xff] %v6636_v2  ;;  %v1693_v62 = vrot.slane %v6465_v37, 1  ;;  %v1004_v16 = vsel %vm846_vm11, %v6628_v3, 0.0  ;;  %v283_v50 = vadd.s32 112, %v6232_v17 }
  0x51   : > { %5390 = vmatmul.mubr.f32.vlgmr.msra.gmra.mrb[0].mxu1 %v8009_v11  ;;  %5611 = vmatmul.mubr.msk.f32.gmra.mrb[14].mxu0 %vm1031_vm1, %v2998_v44  ;;  %v6621_v44 = vsel %vm1643_vm2, %v1685_v30, %v1687_v63  ;;  %v1002_v30 = vsel %vm844_vm13, %v6597_v35, 0.0  ;;  %v6662_v63 = vadd.s32 1, %v480_v7  ;;  %v305_v7 = vand.u32 15, %v6232_v17 }
  0x52   : > { %5392 = vmatprep.mubr.msk.f32.mxu1 %vm1031_vm1, %v998_v10  ;;  %5613 = vmatprep.mubr.msk.f32.mxu0 %vm1031_vm1, %v6526_v4  ;;  %8013 = vst [vmem:[#allocation40_spill] sm:$0xff] %v6621_v44  ;;  %v1691_v10 = vrot.slane %v6433_v56, 1  ;;  %v3004_v1 = vsel %vm7926_vm15, %v6621_v44, 0.0  ;;  %vm7951_vm15 = vcmp.lt.s32.totalorder %v6638_v15, 16  ;;  %v298_v44 = vadd.s32 232, %v6232_v17 }
  0x53   : > { %5438 = vmatpush3.msk.msra.mxu1 %vm1095_vm0, %v6154_v5  ;;  %v6649_v5 = vadd.s32 4294967295, %v375_v61  ;;  %8016 = vst [vmem:[#allocation43_spill] sm:$0xff] %v6662_v63  ;;  %v296_v61 = vadd.s32 216, %v6232_v17  ;;  %vm7950_vm9 = vcmp.lt.s32.totalorder %v6662_v63, 16  ;;  %v403_v4 = vand.u32 15, %v283_v50 }
  0x54   : > { %5487 = vmatprep.subr.msk.mxu1 %vm1095_vm0, %v6615_v57  ;;  %v6709_v39 = vadd.s32 4294967295, %v305_v7  ;;  %v6725_v7 = vld [vmem:[%s6165_s6 + $0xf0] sm:$0xff]  ;;  %v8023_v15 = vrot.slane %v6262_v23, 7 }
  0x55   : > { %5393 = vmatmul.mubr.msk.f32.gmra.mrb[2].mxu1 %vm1031_vm1, %v6538_v0  ;;  %5614 = vmatmul.mubr.msk.f32.gmra.mrb[16].mxu0 %vm1031_vm1, %v3000_v29  ;;  %v6660_v29 = vsel %vm715_vm7, %v727_v12, %v729_v22  ;;  %v6666_v0 = vsel %vm1643_vm2, %v1689_v24, %v1691_v10  ;;  %v733_v12 = vrot.slane %v6243_v18, 7  ;;  %vm848_vm10 = vcmp.ge.s32.totalorder %v6649_v5, 0 }
  0x56   : > { %5395 = vmatprep.mubr.msk.f32.mxu1 %vm1031_vm1, %v1000_v28  ;;  %5616 = vmatprep.mubr.msk.f32.mxu0 %vm1031_vm1, %v6560_v54  ;;  %8017 = vst [vmem:[#allocation44_spill] sm:$0xff] %v6666_v0  ;;  %v6669_v28 = vadd.s32 4294967295, %v389_v51  ;;  %v6674_v54 = vsel %vm715_vm7, %v729_v22, %v731_v58  ;;  %v6683_v51 = vsel %vm1643_vm2, %v1691_v10, %v1693_v62  ;;  %v1697_v22 = vrot.slane %v6505_v26, 1 }
  0x57   : > { %8018 = vst [vmem:[#allocation45_spill] sm:$0xff] %v6683_v51  ;;  %v6686_v24 = vsel %vm1643_vm2, %v1693_v62, %v1695_v40  ;;  %v494_v18 = vand.u32 15, %v296_v61  ;;  %v8020_v10 = vrot.slane %v6246_v19, 7  ;;  %v6706_v61 = vsel %vm715_vm7, %v731_v58, %v733_v12 }
  0x58   : > { %8019 = vst [vmem:[#allocation46_spill] sm:$0xff] %v6686_v24  ;;  %vm850_vm8 = vcmp.ge.s32.totalorder %v6669_v28, 0  ;;  %v1006_v50 = vsel %vm848_vm10, %v6674_v54, 0.0  ;;  %v6721_v58 = vsel %vm1643_vm2, %v1695_v40, %v1697_v22  ;;  %v508_v40 = vand.u32 15, %v298_v44 }
  0x59   : > { %5396 = vmatmul.mubr.msk.f32.gmra.mrb[4].mxu1 %vm1031_vm1, %v6563_v14  ;;  %5617 = vmatmul.mubr.msk.f32.gmra.mrb[18].mxu0 %vm1031_vm1, %v3002_v13  ;;  %v1699_v13 = vrot.slane %v6512_v59, 1  ;;  %v6698_v62 = vsel %vm715_vm7, %v733_v12, %v8020_v10  ;;  %v3008_v10 = vsel %vm7950_vm9, %v6686_v24, 0.0  ;;  %v737_v12 = vrot.slane %v6258_v21, 7 }
  0x5a   : > { %5398 = vmatprep.mubr.msk.f32.mxu1 %vm1031_vm1, %v1002_v30  ;;  %5619 = vmatprep.mubr.msk.f32.mxu0 %vm1031_vm1, %v6600_v41  ;;  %v285_v30 = vadd.s32 128, %v6232_v17  ;;  %v3006_v41 = vsel %vm7951_vm15, %v6666_v0, 0.0  ;;  %v6736_v24 = vadd.s32 1, %v494_v18  ;;  %v6738_v63 = vadd.s32 4294967295, %v403_v4 }
  0x5b   : > { %v6734_v57 = vsel %vm1643_vm2, %v1697_v22, %v1699_v13  ;;  %v1701_v21 = vrot.slane %v6548_v45, 1  ;;  %v1703_v32 = vrot.slane %v6725_v7, 1  ;;  %v287_v22 = vadd.s32 144, %v6232_v17 }
  0x5c   : > { %8021 = vst [vmem:[#allocation47_spill] sm:$0xff] %v6734_v57  ;;  %8022 = vst [vmem:[#allocation48_spill] sm:$0xff] %v6736_v24  ;;  %v417_v0 = vand.u32 15, %v285_v30  ;;  %vm838_vm9 = vcmp.ge.s32.totalorder %v6709_v39, 0  ;;  %v6761_v44 = vsel %vm840_vm12, %v6554_v48, 0.0  ;;  %v6771_v18 = vsel %vm844_vm13, %v6628_v3, 0.0 }
  0x5d   : > { %5399 = vmatmul.mubr.msk.f32.gmra.mrb[6].mxu1 %vm1031_vm1, %v6610_v42  ;;  %5620 = vmatmul.mubr.msk.f32.gmra.mrb[20].mxu0 %vm1031_vm1, %v3004_v1  ;;  %v1008_v1 = vsel %vm850_vm8, %v6698_v62, 0.0  ;;  %v6756_v4 = vsel %vm838_vm9, %v6496_v49, 0.0  ;;  %8025 = vst [vmem:[#allocation50_spill] sm:$0xff] %v6761_v44  ;;  %8027 = vst [vmem:[#allocation52_spill] sm:$0xff] %v6771_v18  ;;  %vm7955_vm15 = vcmp.lt.s32.totalorder %v6736_v24, 16  ;;  %v6782_v49 = vsel %vm846_vm11, %v6674_v54, 0.0 }
  0x5e   : > { %5401 = vmatprep.mubr.msk.f32.mxu1 %vm1031_vm1, %v1004_v16  ;;  %5622 = vmatprep.mubr.msk.f32.mxu0 %vm1031_vm1, %v6636_v2  ;;  %v300_v16 = vadd.s32 248, %v6232_v17  ;;  %v6745_v2 = vsel %vm715_vm7, %v737_v12, %v8023_v15  ;;  %8024 = vst [vmem:[#allocation49_spill] sm:$0xff] %v6756_v4  ;;  %v6766_v15 = vsel %vm842_vm14, %v6597_v35, 0.0  ;;  %8029 = vst [vmem:[#allocation54_spill] sm:$0xff] %v6782_v49  ;;  %v6787_v30 = vsel %vm848_vm10, %v6698_v62, 0.0 }
  0x5f   : > { %8026 = vst [vmem:[#allocation51_spill] sm:$0xff] %v6766_v15  ;;  %8030 = vst [vmem:[#allocation55_spill] sm:$0xff] %v6787_v30  ;;  %vm852_vm6 = vcmp.ge.s32.totalorder %v6738_v63, 0  ;;  %v6791_v18 = vadd.s32 4294967295, %v417_v0  ;;  %v6794_v15 = vld [vmem:[%s6165_s6 + $0xf8] sm:$0xff]  ;;  %v8031_v44 = vrot.slane %v6246_v19, 7  ;;  %v6809_v0 = vsel %vm1643_vm2, %v1699_v13, %v1701_v21 }
  0x60   : > { %v431_v49 = vand.u32 15, %v287_v22  ;;  %v741_v19 = vrot.slane %v6273_v25, 7  ;;  %v2978_v25 = vrot.slane %v6794_v15, 1  ;;  %v747_v22 = vrot.slane %v6299_v38, 7 }
  0x61   : > { %5402 = vmatmul.mubr.msk.f32.gmra.mrb[8].mxu1 %vm1031_vm1, %v6660_v29  ;;  %5623 = vmatmul.mubr.msk.f32.gmra.mrb[22].mxu0 %vm1031_vm1, %v3006_v41  ;;  %v6777_v41 = vadd.s32 1, %v508_v40  ;;  %v522_v40 = vand.u32 15, %v300_v16  ;;  %v6799_v4 = vsel %vm715_vm7, %v8031_v44, %v737_v12  ;;  %v6815_v12 = vsel %vm850_vm8, %v6745_v2, 0.0 }
  0x62   : > { %5404 = vmatprep.mubr.msk.f32.mxu1 %vm1031_vm1, %v1006_v50  ;;  %5625 = vmatprep.mubr.msk.f32.mxu0 %vm1031_vm1, %v6683_v51  ;;  %v743_v50 = vrot.slane %v6280_v31, 7  ;;  %v289_v51 = vadd.s32 160, %v6232_v17  ;;  %v3010_v31 = vsel %vm7955_vm15, %v6734_v57, 0.0  ;;  %8032 = vst [vmem:[#allocation56_spill] sm:$0xff] %v6815_v12  ;;  %v6824_v16 = vsel %vm1643_vm2, %v1701_v21, %v1703_v32 }
  0x63   : > { %8028 = vst [vmem:[#allocation53_spill] sm:$0xff] %v6777_v41  ;;  %vm7963_vm15 = vcmp.lt.s32.totalorder %v6777_v41, 16  ;;  %vm854_vm5 = vcmp.ge.s32.totalorder %v6791_v18, 0  ;;  %v6835_v44 = vadd.s32 4294967295, %v431_v49  ;;  %v291_v30 = vadd.s32 176, %v6232_v17 }
  0x64   : > { %v6829_v13 = vsel %vm715_vm7, %v741_v19, %v743_v50  ;;  %v445_v12 = vand.u32 15, %v289_v51  ;;  %v745_v21 = vrot.slane %v6293_v33, 7  ;;  %v8034_v51 = vrot.slane %v6262_v23, 7 }
  0x65   : > { %5405 = vmatmul.mubr.msk.f32.gmra.mrb[10].mxu1 %vm1031_vm1, %v6706_v61  ;;  %5626 = vmatmul.mubr.msk.f32.gmra.mrb[24].mxu0 %vm1031_vm1, %v3008_v10  ;;  %v1010_v10 = vsel %vm852_vm6, %v6745_v2, 0.0  ;;  %v6845_v57 = vsel %vm852_vm6, %v6829_v13, 0.0  ;;  %v1012_v33 = vsel %vm854_vm5, %v6829_v13, 0.0  ;;  %vm856_vm3 = vcmp.ge.s32.totalorder %v6835_v44, 0  ;;  %v8058_v44 = vld [vmem:[#allocation13_spill] sm:$0xff] }
  0x66   : > { %5407 = vmatprep.mubr.msk.f32.mxu1 %vm1031_vm1, %v1008_v1  ;;  %5628 = vmatprep.mubr.msk.f32.mxu0 %vm1031_vm1, %v6721_v58  ;;  %v6832_v1 = vadd.s32 1, %v522_v40  ;;  %8033 = vst [vmem:[#allocation57_spill] sm:$0xff] %v6845_v57  ;;  %v6853_v49 = vsel %vm715_vm7, %v8034_v51, %v741_v19  ;;  %v3012_v40 = vsel %vm7963_vm15, %v6824_v16, 0.0  ;;  %v6869_v23 = vsel %vm715_vm7, %v745_v21, %v747_v22 }
  0x67   : > { %v751_v19 = vrot.slane %v6329_v47, 7  ;;  %v6873_v51 = vadd.s32 4294967295, %v445_v12  ;;  %v459_v57 = vand.u32 15, %v291_v30  ;;  %v293_v38 = vadd.s32 192, %v6232_v17 }
  0x68   : > { %vm1832_vm4 = vcmp.lt.s32.totalorder %v6832_v1, 16  ;;  %v6889_v30 = vsel %vm715_vm7, %v743_v50, %v745_v21  ;;  %v753_v39 = vrot.slane %v6355_v55, 7  ;;  %v773_v5 = vrot.slane %v6548_v45, 7  ;;  %v6068_v1 = vld [vmem:[%s7860_s3 + $0x10] sm:$0xf] }
  0x69   : > { %5408 = vmatmul.mubr.msk.f32.gmra.mrb[12].mxu1 %vm1031_vm1, %v6799_v4  ;;  %5629 = vmatmul.mubr.msk.f32.gmra.mrb[26].mxu0 %vm1031_vm1, %v3010_v31  ;;  %v6862_v31 = vsel %vm1643_vm2, %v1703_v32, %v2978_v25  ;;  %v749_v32 = vrot.slane %v6322_v43, 7  ;;  %vm858_vm15 = vcmp.ge.s32.totalorder %v6873_v51, 0  ;;  %v6905_v50 = vadd.s32 4294967295, %v459_v57  ;;  %v8062_v51 = vld [vmem:[#allocation18_spill] sm:$0xff] }
  0x6a   : > { %5410 = vmatprep.mubr.msk.f32.mxu1 %vm1031_vm1, %v1010_v10  ;;  %5631 = vmatprep.mubr.msk.f32.mxu0 %vm1031_vm1, %v6809_v0  ;;  %8035 = vst [vmem:[#allocation58_spill] sm:$0xff] %v6862_v31  ;;  %v6866_v10 = vsel %vm1643_vm2, %v2978_v25, 0.0  ;;  %v6883_v25 = vsel %vm854_vm5, %v6869_v23, 0.0  ;;  %v473_v21 = vand.u32 15, %v293_v38 }
  0x6b   : > { %8036 = vst [vmem:[#allocation59_spill] sm:$0xff] %v6866_v10  ;;  %8037 = vst [vmem:[#allocation60_spill] sm:$0xff] %v6883_v25  ;;  %v3014_v12 = vsel %vm1832_vm4, %v6866_v10, 0.0  ;;  %v3375_v25 = vsel %vm838_vm9, %v6554_v48, 0.0  ;;  %v295_v10 = vadd.s32 208, %v6232_v17  ;;  %v6920_v38 = vsel %vm715_vm7, %v747_v22, %v749_v32 }
  0x6c   : > { %vm860_vm9 = vcmp.ge.s32.totalorder %v6905_v50, 0  ;;  %v297_v22 = vadd.s32 224, %v6232_v17  ;;  %v8066_v50 = vld [vmem:[#allocation21_spill] sm:$0xff] }
  0x6d   : > { %5411 = vmatmul.mubr.msk.f32.gmra.mrb[14].mxu1 %vm1031_vm1, %v6853_v49  ;;  %5632 = vmatmul.mubr.msk.f32.gmra.mrb[28].mxu0 %vm1031_vm1, %v3012_v40  ;;  %v1014_v40 = vsel %vm856_vm3, %v6869_v23, 0.0 }
  0x6e   : > { %5413 = vmatprep.mubr.msk.f32.mxu1 %vm1031_vm1, %v1012_v33  ;;  %5634 = vmatprep.mubr.msk.f32.mxu0 %vm1031_vm1, %v6862_v31  ;;  %v6901_v33 = vsel %vm715_vm7, %v749_v32, %v751_v19  ;;  %v755_v31 = vrot.slane %v6367_v60, 7  ;;  %v6939_v32 = vld [vmem:[%s7860_s3 + $0x20] sm:$0xf] }
  0x6f   : > { %v6915_v48 = vsel %vm856_vm3, %v6901_v33, 0.0  ;;  %v1016_v57 = vsel %vm858_vm15, %v6901_v33, 0.0  ;;  %v3391_v63 = vsel %vm854_vm5, %v6901_v33, 0.0  ;;  %v8053_v33 = vld [vmem:[#allocation2_spill] sm:$0xff] }
  0x70   : > { %8038 = vst [vmem:[#allocation61_spill] sm:$0xff] %v6915_v48  ;;  %v6929_v60 = vsel %vm715_vm7, %v753_v39, %v755_v31  ;;  %v759_v48 = vrot.slane %v6403_v27, 7  ;;  %v3379_v27 = vsel %vm842_vm14, %v6628_v3, 0.0 }
  0x71   : > { %5414 = vmatmul.mubr.msk.f32.gmra.mrb[16].mxu1 %vm1031_vm1, %v6889_v30  ;;  %5635 = vmatmul.mubr.msk.f32.gmra.mrb[30].mxu0 %vm1031_vm1, %v3014_v12  ;;  %v3377_v12 = vsel %vm840_vm12, %v6597_v35, 0.0  ;;  %v6949_v35 = vsel %vm858_vm15, %v6929_v60, 0.0  ;;  %v3393_v18 = vsel %vm856_vm3, %v6929_v60, 0.0 }
  0x72   : > { %5416 = vmatprep.mubr.msk.f32.mxu1 %vm1031_vm1, %v1014_v40  ;;  %5639 = vmatprep.mubr.msk.f32.mxu0 %vm1031_vm1, %v3375_v25  ;;  %v6933_v40 = vadd.s32 4294967295, %v473_v21  ;;  %v487_v25 = vand.u32 15, %v295_v10  ;;  %8039 = vst [vmem:[#allocation62_spill] sm:$0xff] %v6949_v35  ;;  %v6955_v10 = vsel %vm715_vm7, %v751_v19, %v753_v39  ;;  %v1018_v21 = vsel %vm860_vm9, %v6929_v60, 0.0 }
  0x73   : > { %v6965_v35 = vsel %vm715_vm7, %v757_v9, %v759_v48  ;;  %v501_v39 = vand.u32 15, %v297_v22  ;;  %v7014_v36 = vsel %vm715_vm7, %v759_v48, %v761_v8  ;;  %v769_v48 = vrot.slane %v6505_v26, 7 }
  0x74   : > { %vm862_vm12 = vcmp.ge.s32.totalorder %v6933_v40, 0  ;;  %v6971_v19 = vadd.s32 4294967295, %v487_v25  ;;  %v6982_v3 = vsel %vm860_vm9, %v6965_v35, 0.0  ;;  %v3381_v25 = vsel %vm844_vm13, %v6674_v54, 0.0  ;;  %v8070_v40 = vld [vmem:[#allocation24_spill] sm:$0xff] }
  0x75   : > { %5417 = vmatmul.mubr.msk.f32.gmra.mrb[18].mxu1 %vm1031_vm1, %v6920_v38  ;;  %5640 = vmatmul.mubr.msk.f32.vlgmr.msra.gmra.mrb[0].mxu0 %vm1031_vm1, %v6563_v14  ;;  %8040 = vst [vmem:[#allocation63_spill] sm:$0xff] %v6982_v3  ;;  %v7000_v3 = vadd.s32 4294967295, %v501_v39  ;;  %v3383_v39 = vsel %vm846_vm11, %v6698_v62, 0.0  ;;  %v3395_v60 = vsel %vm858_vm15, %v6965_v35, 0.0 }
  0x76   : > { %5688 = vmatpush3.msk.msra.mxu0 %vm1095_vm0, %v6345_v53  ;;  %5419 = vmatprep.mubr.msk.f32.mxu1 %vm1031_vm1, %v1016_v57  ;;  %v763_v53 = vrot.slane %v6433_v56, 7  ;;  %v299_v57 = vadd.s32 240, %v6232_v17  ;;  %v1020_v17 = vsel %vm862_vm12, %v6965_v35, 0.0  ;;  %vm864_vm14 = vcmp.ge.s32.totalorder %v6971_v19, 0  ;;  %v8063_v35 = vld [vmem:[#allocation16_spill] sm:$0xff] }
  0x77   : > { %5642 = vmatprep.mubr.msk.f32.mxu0 %vm1031_vm1, %v3377_v12  ;;  %5737 = vmatprep.subr.msk.mxu0 %vm1095_vm0, %v6939_v32  ;;  %v6987_v12 = vsel %vm715_vm7, %v755_v31, %v757_v9  ;;  %v765_v31 = vrot.slane %v6465_v37, 7  ;;  %vm866_vm13 = vcmp.ge.s32.totalorder %v7000_v3, 0  ;;  %v8078_v3 = vrot.slane %v6725_v7, 7 }
  0x78   : > { %v6996_v22 = vsel %vm715_vm7, %v761_v8, %v763_v53 }
  0x79   : > { %5420 = vmatmul.mubr.msk.f32.gmra.mrb[20].mxu1 %vm1031_vm1, %v6955_v10  ;;  %5643 = vmatmul.mubr.msk.f32.gmra.mrb[2].mxu0 %vm1031_vm1, %v6610_v42  ;;  %v7009_v54 = vsel %vm862_vm12, %v6996_v22, 0.0  ;;  %v1022_v9 = vsel %vm864_vm14, %v6996_v22, 0.0  ;;  %v7042_v62 = vsel %vm715_vm7, %v763_v53, %v765_v31 }
  0x7a   : > { %5422 = vmatprep.mubr.msk.f32.mxu1 %vm1031_vm1, %v1018_v21  ;;  %5645 = vmatprep.mubr.msk.f32.mxu0 %vm1031_vm1, %v3379_v27  ;;  %v767_v21 = vrot.slane %v6474_v34, 7  ;;  %v515_v27 = vand.u32 15, %v299_v57  ;;  %8041 = vst [vmem:[#allocation64_spill] sm:$0xff] %v7009_v54 }
  0x7c   : > { %v7024_v57 = vsel %vm715_vm7, %v765_v31, %v767_v21 }
  0x7d   : > { %5423 = vmatmul.mubr.msk.f32.gmra.mrb[22].mxu1 %vm1031_vm1, %v6987_v12  ;;  %5646 = vmatmul.mubr.msk.f32.gmra.mrb[4].mxu0 %vm1031_vm1, %v6660_v29  ;;  %v7037_v52 = vsel %vm864_vm14, %v7024_v57, 0.0  ;;  %v1024_v8 = vsel %vm866_vm13, %v7024_v57, 0.0 }
  0x7e   : > { %5425 = vmatprep.mubr.msk.f32.mxu1 %vm1031_vm1, %v1020_v17  ;;  %5648 = vmatprep.mubr.msk.f32.mxu0 %vm1031_vm1, %v3381_v25  ;;  %v771_v17 = vrot.slane %v6512_v59, 7  ;;  %v7028_v25 = vadd.s32 4294967295, %v515_v27  ;;  %v3385_v27 = vsel %vm848_vm10, %v6745_v2, 0.0  ;;  %v7065_v2 = vsel %vm715_vm7, %v767_v21, %v769_v48 }
  0x80   : > { %v772_v54 = vsel %vm715_vm7, %v769_v48, %v771_v17  ;;  %vm868_vm11 = vcmp.ge.s32.totalorder %v7028_v25, 0  ;;  %v7087_v28 = vsel %vm715_vm7, %v771_v17, %v773_v5  ;;  %v8045_v48 = vrot.slane %v6170_v6, 1  ;;  %v8046_v17 = vld [vmem:[#allocation3_spill] sm:$0xff]  ;;  %v8048_v6 = vld [vmem:[#allocation5_spill] sm:$0xff] }
  0x81   : > { %5426 = vmatmul.mubr.msk.f32.gmra.mrb[24].mxu1 %vm1031_vm1, %v7014_v36  ;;  %5649 = vmatmul.mubr.msk.f32.gmra.mrb[6].mxu0 %vm1031_vm1, %v6706_v61  ;;  %v7060_v53 = vsel %vm866_vm13, %v772_v54, 0.0  ;;  %v1026_v31 = vsel %vm868_vm11, %v772_v54, 0.0  ;;  %8044 = vst [vmem:[#allocation67_spill] sm:$0xff] %v7087_v28  ;;  %v8084_v25 = vld [vmem:[#allocation31_spill] sm:$0xff] }
  0x82   : > { %5428 = vmatprep.mubr.msk.f32.mxu1 %vm1031_vm1, %v1022_v9  ;;  %5651 = vmatprep.mubr.msk.f32.mxu0 %vm1031_vm1, %v3383_v39  ;;  %v7967_v9 = vrot.slane %v6725_v7, 7  ;;  %8042 = vst [vmem:[#allocation65_spill] sm:$0xff] %v7060_v53  ;;  %v3387_v39 = vsel %vm850_vm8, %v6829_v13, 0.0  ;;  %v3389_v13 = vsel %vm852_vm6, %v6869_v23, 0.0  ;;  %vm8047_vm8 = vcmp.lt.s32.totalorder %v8046_v17, 16  ;;  %v8049_v23 = vld [vmem:[#allocation6_spill] sm:$0xff] }
  0x84   : > { %v2317_v53 = vsel %vm715_vm7, %v773_v5, %v7967_v9  ;;  %v8050_v5 = vld [vmem:[#allocation7_spill] sm:$0xff]  ;;  %v8076_v9 = vld [vmem:[#allocation25_spill] sm:$0xff] }
  0x85   : > { %5429 = vmatmul.mubr.msk.f32.gmra.mrb[26].mxu1 %vm1031_vm1, %v7042_v62  ;;  %5652 = vmatmul.mubr.msk.f32.gmra.mrb[8].mxu0 %vm1031_vm1, %v6799_v4  ;;  %v7082_v21 = vsel %vm868_vm11, %v2317_v53, 0.0  ;;  %v3403_v19 = vsel %vm866_vm13, %v2317_v53, 0.0 }
  0x86   : > { %5431 = vmatprep.mubr.msk.f32.mxu1 %vm1031_vm1, %v1024_v8  ;;  %5654 = vmatprep.mubr.msk.f32.mxu0 %vm1031_vm1, %v3385_v27  ;;  %8043 = vst [vmem:[#allocation66_spill] sm:$0xff] %v7082_v21  ;;  %v1736_v8 = vsel %vm1643_vm2, 0.0, %v8045_v48  ;;  %vm8051_vm2 = vcmp.lt.s32.totalorder %v8050_v5, 16  ;;  %v8055_v48 = vld [vmem:[#allocation8_spill] sm:$0xff] }
  0x87   : > { %v1929_v27 = vsel %vm8047_vm8, %v1736_v8, 0.0  ;;  %v8056_v8 = vld [vmem:[#allocation9_spill] sm:$0xff]  ;;  %v8080_v21 = vld [vmem:[#allocation28_spill] sm:$0xff] }
  0x88   : > { %vm8057_vm5 = vcmp.lt.s32.totalorder %v8056_v8, 16 }
  0x89   : > { %5432 = vmatmul.mubr.msk.f32.gmra.mrb[28].mxu1 %vm1031_vm1, %v7065_v2  ;;  %5655 = vmatmul.mubr.msk.f32.gmra.mrb[10].mxu0 %vm1031_vm1, %v6853_v49 }
  0x8a   : > { %5434 = vmatprep.mubr.msk.f32.mxu1 %vm1031_vm1, %v1026_v31  ;;  %5657 = vmatprep.mubr.msk.f32.mxu0 %vm1031_vm1, %v3387_v39  ;;  %v1931_v31 = vsel %vm8051_vm2, %v8049_v23, 0.0  ;;  %v8052_v39 = vld [vmem:[#allocation39_spill] sm:$0xff]  ;;  %vm8102_vm2 = vcmp.lt.s32.totalorder %v6736_v24, 16 }
  0x8b   : > { %v6065_v24 = vld [vmem:[%s6165_s6 + $0x68] sm:$0xff] }
  0x8d   : > { %5435 = vmatmul.mubr.msk.f32.gmra.mrb[30].mxu1 %vm1031_vm1, %v7087_v28  ;;  %5658 = vmatmul.mubr.msk.f32.gmra.mrb[12].mxu0 %vm1031_vm1, %v6889_v30 }
  0x8e   : > { %5439 = vmatprep.mubr.f32.mxu1 %v8009_v11  ;;  %5660 = vmatprep.mubr.msk.f32.mxu0 %vm1031_vm1, %v3389_v13  ;;  %v8054_v13 = vld [vmem:[#allocation10_spill] sm:$0xff] }
  0x91   : > { %5440 = vmatmul.mubr.msk.f32.vlgmr.msra.gmra.mrb[0].mxu1 %vm1031_vm1, %v1929_v27  ;;  %5661 = vmatmul.mubr.msk.f32.gmra.mrb[14].mxu0 %vm1031_vm1, %v6920_v38  ;;  %v1933_v27 = vsel %vm8057_vm5, %v8055_v48, 0.0  ;;  %vm8104_vm5 = vcmp.lt.s32.totalorder %v6777_v41, 16  ;;  %v8105_v41 = vld [vmem:[#allocation49_spill] sm:$0xff] }
  0x92   : > { %5442 = vmatprep.mubr.msk.f32.mxu1 %vm1031_vm1, %v8048_v6  ;;  %5663 = vmatprep.mubr.msk.f32.mxu0 %vm1031_vm1, %v3391_v63  ;;  %v8059_v63 = vld [vmem:[#allocation14_spill] sm:$0xff]  ;;  %v8060_v6 = vld [vmem:[#allocation11_spill] sm:$0xff] }
  0x93   : > { %5488 = vmatpush3.msk.msra.mxu1 %vm1095_vm0, %v8052_v39  ;;  %vm8061_vm3 = vcmp.lt.s32.totalorder %v8060_v6, 16  ;;  %v8064_v39 = vld [vmem:[#allocation15_spill] sm:$0xff] }
  0x94   : > { %5787 = vmatprep.subr.msk.mxu1 %vm1095_vm0, %v8053_v33  ;;  %v1935_v23 = vsel %vm8061_vm3, %v8059_v63, 0.0  ;;  %vm8065_vm6 = vcmp.lt.s32.totalorder %v8064_v39, 16  ;;  %v3399_v33 = vsel %vm862_vm12, %v7024_v57, 0.0  ;;  %v8071_v57 = vld [vmem:[#allocation23_spill] sm:$0xff]  ;;  %vm8123_vm3 = vcmp.lt.s32.totalorder %v8056_v8, 16 }
  0x95   : > { %5443 = vmatmul.mubr.msk.f32.gmra.mrb[2].mxu1 %vm1031_vm1, %v1931_v31  ;;  %5664 = vmatmul.mubr.msk.f32.gmra.mrb[16].mxu0 %vm1031_vm1, %v6955_v10  ;;  %v3397_v31 = vsel %vm860_vm9, %v6996_v22, 0.0  ;;  %v8067_v22 = vld [vmem:[#allocation20_spill] sm:$0xff]  ;;  %vm8077_vm9 = vcmp.lt.s32.totalorder %v8076_v9, 16  ;;  %v8082_v9 = vld [vmem:[#allocation30_spill] sm:$0xff]  ;;  %v6070_v8 = vld [vmem:[%s6165_s6 + $0x88] sm:$0xff] }
  0x96   : > { %5445 = vmatprep.mubr.msk.f32.mxu1 %vm1031_vm1, %v8054_v13  ;;  %5666 = vmatprep.mubr.msk.f32.mxu0 %vm1031_vm1, %v3393_v18  ;;  %v1937_v18 = vsel %vm8065_vm6, %v8063_v35, 0.0  ;;  %vm8083_vm12 = vcmp.lt.s32.totalorder %v8082_v9, 16  ;;  %v8089_v9 = vld [vmem:[#allocation36_spill] sm:$0xff]  ;;  %vm8125_vm6 = vcmp.lt.s32.totalorder %v8060_v6, 16 }
  0x97   : > { %v8138_v6 = vld [vmem:[#allocation36_spill] sm:$0xff] }
  0x99   : > { %5446 = vmatmul.mubr.msk.f32.gmra.mrb[4].mxu1 %vm1031_vm1, %v1933_v27  ;;  %5667 = vmatmul.mubr.msk.f32.gmra.mrb[18].mxu0 %vm1031_vm1, %v6987_v12  ;;  %v8068_v27 = vld [vmem:[#allocation19_spill] sm:$0xff] }
  0x9a   : > { %5448 = vmatprep.mubr.msk.f32.mxu1 %vm1031_vm1, %v8058_v44  ;;  %5669 = vmatprep.mubr.msk.f32.mxu0 %vm1031_vm1, %v3395_v60  ;;  %vm8069_vm10 = vcmp.lt.s32.totalorder %v8068_v27, 16 }
  0x9b   : > { %v1939_v60 = vsel %vm8069_vm10, %v8067_v22, 0.0  ;;  %vm8126_vm10 = vcmp.lt.s32.totalorder %v8064_v39, 16  ;;  %v6072_v39 = vld [vmem:[%s6165_s6 + $0x98] sm:$0xff] }
  0x9d   : > { %5449 = vmatmul.mubr.msk.f32.gmra.mrb[6].mxu1 %vm1031_vm1, %v1935_v23  ;;  %5670 = vmatmul.mubr.msk.f32.gmra.mrb[20].mxu0 %vm1031_vm1, %v7014_v36  ;;  %v3401_v23 = vsel %vm864_vm14, %v772_v54, 0.0 }
  0x9e   : > { %5451 = vmatprep.mubr.msk.f32.mxu1 %vm1031_vm1, %v8062_v51  ;;  %5672 = vmatprep.mubr.msk.f32.mxu0 %vm1031_vm1, %v3397_v31  ;;  %v8072_v31 = vld [vmem:[#allocation22_spill] sm:$0xff] }
  0x9f   : > { %vm8073_vm15 = vcmp.lt.s32.totalorder %v8072_v31, 16 }
  0xa1   : > { %5452 = vmatmul.mubr.msk.f32.gmra.mrb[8].mxu1 %vm1031_vm1, %v1937_v18  ;;  %5673 = vmatmul.mubr.msk.f32.gmra.mrb[22].mxu0 %vm1031_vm1, %v7042_v62  ;;  %v1941_v18 = vsel %vm8073_vm15, %v8071_v57, 0.0  ;;  %vm8128_vm15 = vcmp.lt.s32.totalorder %v8068_v27, 16  ;;  %v8142_v27 = vld [vmem:[#allocation34_spill] sm:$0xff] }
  0xa2   : > { %5454 = vmatprep.mubr.msk.f32.mxu1 %vm1031_vm1, %v8066_v50  ;;  %5675 = vmatprep.mubr.msk.f32.mxu0 %vm1031_vm1, %v3399_v33  ;;  %v2318_v33 = vrot.slane %v6794_v15, 7 }
  0xa4   : > { %v3374_v54 = vsel %vm715_vm7, %v2318_v33, 0.0  ;;  %v7194_v53 = vsel %vm715_vm7, %v8078_v3, %v2318_v33  ;;  %v8085_v33 = vld [vmem:[#allocation33_spill] sm:$0xff] }
  0xa5   : > { %5455 = vmatmul.mubr.msk.f32.gmra.mrb[10].mxu1 %vm1031_vm1, %v1939_v60  ;;  %5676 = vmatmul.mubr.msk.f32.gmra.mrb[24].mxu0 %vm1031_vm1, %v7065_v2  ;;  %v8074_v60 = vld [vmem:[#allocation26_spill] sm:$0xff]  ;;  %8079 = vst [vmem:[#allocation3_spill] sm:$0xff] %v7194_v53 }
  0xa6   : > { %5457 = vmatprep.mubr.msk.f32.mxu1 %vm1031_vm1, %v8070_v40  ;;  %5678 = vmatprep.mubr.msk.f32.mxu0 %vm1031_vm1, %v3401_v23  ;;  %v8075_v23 = vld [vmem:[#allocation27_spill] sm:$0xff] }
  0xa7   : > { %v1943_v31 = vsel %vm8077_vm9, %v8075_v23, 0.0 }
  0xa9   : > { %5458 = vmatmul.mubr.msk.f32.gmra.mrb[12].mxu1 %vm1031_vm1, %v1941_v18  ;;  %5679 = vmatmul.mubr.msk.f32.gmra.mrb[26].mxu0 %vm1031_vm1, %v7087_v28  ;;  %v3405_v18 = vsel %vm868_vm11, %v3374_v54, 0.0  ;;  %v8086_v54 = vld [vmem:[#allocation34_spill] sm:$0xff] }
  0xaa   : > { %5460 = vmatprep.mubr.msk.f32.mxu1 %vm1031_vm1, %v8074_v60  ;;  %5681 = vmatprep.mubr.msk.f32.mxu0 %vm1031_vm1, %v3403_v19  ;;  %v8081_v19 = vld [vmem:[#allocation29_spill] sm:$0xff]  ;;  %vm8087_vm14 = vcmp.lt.s32.totalorder %v8086_v54, 16  ;;  %v8093_v54 = vld [vmem:[#allocation40_spill] sm:$0xff] }
  0xab   : > { %v1945_v28 = vsel %vm8083_vm12, %v8081_v19, 0.0  ;;  %v1947_v3 = vsel %vm8087_vm14, %v8085_v33, 0.0 }
  0xad   : > { %5461 = vmatmul.mubr.msk.f32.gmra.mrb[14].mxu1 %vm1031_vm1, %v1943_v31  ;;  %5682 = vmatmul.mubr.msk.f32.gmra.mrb[28].mxu0 %vm1031_vm1, %v7194_v53  ;;  %v6054_v31 = vld [vmem:[%s6165_s6 + $0x10] sm:$0xff]  ;;  %v6056_v53 = vld [vmem:[%s6165_s6 + $0x20] sm:$0xff] }
  0xae   : > { %5463 = vmatprep.mubr.msk.f32.mxu1 %vm1031_vm1, %v8080_v21  ;;  %5684 = vmatprep.mubr.msk.f32.mxu0 %vm1031_vm1, %v3405_v18  ;;  %v6055_v18 = vld [vmem:[%s6165_s6 + $0x18] sm:$0xff] }
  0xb1   : > { %5464 = vmatmul.mubr.msk.f32.gmra.mrb[16].mxu1 %vm1031_vm1, %v1945_v28  ;;  %5685 = vmatmul.mubr.f32.gmra.mrb[30].mxu0 %v8009_v11  ;;  %v8088_v28 = vld [vmem:[#allocation35_spill] sm:$0xff] }
  0xb2   : > { %5466 = vmatprep.mubr.msk.f32.mxu1 %vm1031_vm1, %v8084_v25  ;;  %5689 = vmatprep.mubr.msk.f32.mxu0 %vm1031_vm1, %v6054_v31  ;;  %v8090_v25 = vld [vmem:[#allocation37_spill] sm:$0xff] }
  0xb3   : > { %vm8091_vm13 = vcmp.lt.s32.totalorder %v8090_v25, 16 }
  0xb4   : > { %v1949_v31 = vsel %vm8091_vm13, %v8089_v9, 0.0  ;;  %v8098_v9 = vld [vmem:[#allocation43_spill] sm:$0xff]  ;;  %vm8143_vm13 = vcmp.lt.s32.totalorder %v8142_v27, 16 }
  0xb5   : > { %5467 = vmatmul.mubr.msk.f32.gmra.mrb[18].mxu1 %vm1031_vm1, %v1947_v3  ;;  %5690 = vmatmul.mubr.msk.f32.vlgmr.msra.gmra.mrb[0].mxu0 %vm1031_vm1, %v6055_v18  ;;  %v6057_v3 = vld [vmem:[%s6165_s6 + $0x28] sm:$0xff]  ;;  %v8092_v18 = vld [vmem:[#allocation38_spill] sm:$0xff]  ;;  %vm8099_vm8 = vcmp.lt.s32.totalorder %v8098_v9, 16  ;;  %v6063_v9 = vld [vmem:[%s6165_s6 + $0x58] sm:$0xff] }
  0xb6   : > { %5738 = vmatpush3.msk.msra.mxu0 %vm1095_vm0, %v6939_v32  ;;  %5469 = vmatprep.mubr.msk.f32.mxu1 %vm1031_vm1, %v8088_v28  ;;  %v6058_v32 = vld [vmem:[%s6165_s6 + $0x30] sm:$0xff]  ;;  %v8094_v28 = vld [vmem:[#allocation42_spill] sm:$0xff] }
  0xb7   : > { %5692 = vmatprep.mubr.msk.f32.mxu0 %vm1031_vm1, %v6056_v53  ;;  %vm8095_vm11 = vcmp.lt.s32.totalorder %v8094_v28, 16  ;;  %v6059_v53 = vld [vmem:[%s6165_s6 + $0x38] sm:$0xff]  ;;  %v6061_v28 = vld [vmem:[%s6165_s6 + $0x48] sm:$0xff] }
  0xb8   : > { %v1951_v25 = vsel %vm8095_vm11, %v8093_v54, 0.0 }
  0xb9   : > { %5470 = vmatmul.mubr.msk.f32.gmra.mrb[20].mxu1 %vm1031_vm1, %v1949_v31  ;;  %5693 = vmatmul.mubr.msk.f32.gmra.mrb[2].mxu0 %vm1031_vm1, %v6057_v3  ;;  %v8096_v31 = vld [vmem:[#allocation41_spill] sm:$0xff]  ;;  %v6060_v3 = vld [vmem:[%s6165_s6 + $0x40] sm:$0xff] }
  0xba   : > { %5472 = vmatprep.mubr.msk.f32.mxu1 %vm1031_vm1, %v8092_v18  ;;  %5695 = vmatprep.mubr.msk.f32.mxu0 %vm1031_vm1, %v6058_v32  ;;  %v8097_v18 = vld [vmem:[#allocation44_spill] sm:$0xff] }
  0xbb   : > { %v1953_v32 = vsel %vm8099_vm8, %v8097_v18, 0.0 }
  0xbd   : > { %5473 = vmatmul.mubr.msk.f32.gmra.mrb[22].mxu1 %vm1031_vm1, %v1951_v25  ;;  %5696 = vmatmul.mubr.msk.f32.gmra.mrb[4].mxu0 %vm1031_vm1, %v6059_v53  ;;  %v8100_v25 = vld [vmem:[#allocation45_spill] sm:$0xff]  ;;  %v6062_v53 = vld [vmem:[%s6165_s6 + $0x50] sm:$0xff] }
  0xbe   : > { %5475 = vmatprep.mubr.msk.f32.mxu1 %vm1031_vm1, %v8096_v31  ;;  %5698 = vmatprep.mubr.msk.f32.mxu0 %vm1031_vm1, %v6060_v3  ;;  %v8101_v31 = vld [vmem:[#allocation46_spill] sm:$0xff] }
  0xbf   : > { %v1955_v3 = vsel %vm8102_vm2, %v8101_v31, 0.0 }
  0xc1   : > { %5476 = vmatmul.mubr.msk.f32.gmra.mrb[24].mxu1 %vm1031_vm1, %v1953_v32  ;;  %5699 = vmatmul.mubr.msk.f32.gmra.mrb[6].mxu0 %vm1031_vm1, %v6061_v28  ;;  %v6064_v28 = vld [vmem:[%s6165_s6 + $0x60] sm:$0xff]  ;;  %v8103_v32 = vld [vmem:[#allocation47_spill] sm:$0xff] }
  0xc2   : > { %5478 = vmatprep.mubr.msk.f32.mxu1 %vm1031_vm1, %v8100_v25  ;;  %5701 = vmatprep.mubr.msk.f32.mxu0 %vm1031_vm1, %v6062_v53  ;;  %v1957_v53 = vsel %vm8104_vm5, %v8103_v32, 0.0 }
  0xc5   : > { %5479 = vmatmul.mubr.msk.f32.gmra.mrb[26].mxu1 %vm1031_vm1, %v1955_v3  ;;  %5702 = vmatmul.mubr.msk.f32.gmra.mrb[8].mxu0 %vm1031_vm1, %v6063_v9  ;;  %v6066_v3 = vld [vmem:[%s6165_s6 + $0x70] sm:$0xff]  ;;  %v1959_v9 = vsel %vm1832_vm4, %v6824_v16, 0.0  ;;  %vm8121_vm4 = vcmp.lt.s32.totalorder %v8050_v5, 16  ;;  %v6069_v5 = vld [vmem:[%s6165_s6 + $0x80] sm:$0xff] }
  0xc6   : > { %5481 = vmatprep.mubr.msk.f32.mxu1 %vm1031_vm1, %v6721_v58  ;;  %5704 = vmatprep.mubr.msk.f32.mxu0 %vm1031_vm1, %v6064_v28  ;;  %v6067_v28 = vld [vmem:[%s6165_s6 + $0x78] sm:$0xff] }
  0xc9   : > { %5482 = vmatmul.mubr.msk.f32.gmra.mrb[28].mxu1 %vm1031_vm1, %v1957_v53  ;;  %5705 = vmatmul.mubr.msk.f32.gmra.mrb[10].mxu0 %vm1031_vm1, %v6065_v24  ;;  %v8106_v53 = vld [vmem:[#allocation4_spill] sm:$0xff] }
  0xca   : > { %5484 = vmatprep.mubr.msk.f32.mxu1 %vm1031_vm1, %v6809_v0  ;;  %5707 = vmatprep.mubr.msk.f32.mxu0 %vm1031_vm1, %v6066_v3  ;;  %v8107_v24 = vld [vmem:[#allocation32_spill] sm:$0xff]  ;;  %v8108_v3 = vld [vmem:[#allocation50_spill] sm:$0xff] }
  0xcd   : > { %5485 = vmatmul.mubr.msk.f32.gmra.mrb[30].mxu1 %vm1031_vm1, %v1959_v9  ;;  %5708 = vmatmul.mubr.msk.f32.gmra.mrb[12].mxu0 %vm1031_vm1, %v6067_v28  ;;  %v8112_v9 = vld [vmem:[#allocation17_spill] sm:$0xff] }
  0xce   : > { %5489 = vmatprep.mubr.msk.f32.mxu1 %vm1031_vm1, %v8105_v41  ;;  %5710 = vmatprep.mubr.msk.f32.mxu0 %vm1031_vm1, %v8106_v53  ;;  %v8109_v41 = vld [vmem:[#allocation51_spill] sm:$0xff]  ;;  %v6076_v28 = vld [vmem:[%s6165_s6 + $0xb8] sm:$0xff]  ;;  %v8147_v53 = vld [vmem:[#allocation42_spill] sm:$0xff] }
  0xcf   : > { %vm8148_vm8 = vcmp.lt.s32.totalorder %v8147_v53, 16 }
  0xd1   : > { %5490 = vmatmul.mubr.msk.f32.vlgmr.msra.gmra.mrb[0].mxu1 %vm1031_vm1, %v8107_v24  ;;  %5711 = vmatmul.mubr.msk.f32.gmra.mrb[14].mxu0 %vm1031_vm1, %v6322_v43  ;;  %v8110_v43 = vld [vmem:[#allocation12_spill] sm:$0xff]  ;;  %v4046_v24 = vsel %vm8148_vm8, %v8101_v31, 0.0 }
  0xd2   : > { %5492 = vmatprep.mubr.msk.f32.mxu1 %vm1031_vm1, %v8108_v3  ;;  %5713 = vmatprep.mubr.msk.f32.mxu0 %vm1031_vm1, %v6329_v47  ;;  %v8111_v47 = vld [vmem:[#allocation52_spill] sm:$0xff]  ;;  %v6078_v3 = vld [vmem:[%s6165_s6 + $0xc8] sm:$0xff] }
  0xd3   : > { %5788 = vmatpush3.msk.msra.mxu1 %vm1095_vm0, %v6068_v1  ;;  %vm8118_vm0 = vcmp.lt.s32.totalorder %v8046_v17, 16  ;;  %v8133_v17 = vld [vmem:[#allocation3_spill] sm:$0xff]  ;;  %v8151_v31 = vld [vmem:[#allocation48_spill] sm:$0xff] }
  0xd4   : > { %v8149_v1 = vld [vmem:[#allocation43_spill] sm:$0xff]  ;;  %vm8152_vm5 = vcmp.lt.s32.totalorder %v8151_v31, 16 }
  0xd5   : > { %5493 = vmatmul.mubr.msk.f32.gmra.mrb[2].mxu1 %vm1031_vm1, %v6563_v14  ;;  %5714 = vmatmul.mubr.msk.f32.gmra.mrb[16].mxu0 %vm1031_vm1, %v6355_v55  ;;  %v8113_v55 = vld [vmem:[#allocation54_spill] sm:$0xff]  ;;  %v8119_v14 = vld [vmem:[#allocation61_spill] sm:$0xff]  ;;  %vm8150_vm2 = vcmp.lt.s32.totalorder %v8149_v1, 16 }
  0xd6   : > { %5495 = vmatprep.mubr.msk.f32.mxu1 %vm1031_vm1, %v8109_v41  ;;  %5716 = vmatprep.mubr.msk.f32.mxu0 %vm1031_vm1, %v8110_v43  ;;  %v4048_v41 = vsel %vm8150_vm2, %v8103_v32, 0.0 }
  0xd9   : > { %5496 = vmatmul.mubr.msk.f32.gmra.mrb[4].mxu1 %vm1031_vm1, %v6610_v42  ;;  %5717 = vmatmul.mubr.msk.f32.gmra.mrb[18].mxu0 %vm1031_vm1, %v6392_v20  ;;  %v8114_v20 = vld [vmem:[#allocation55_spill] sm:$0xff]  ;;  %v8120_v42 = vld [vmem:[#allocation62_spill] sm:$0xff] }
  0xda   : > { %5498 = vmatprep.mubr.msk.f32.mxu1 %vm1031_vm1, %v8111_v47  ;;  %5719 = vmatprep.mubr.msk.f32.mxu0 %vm1031_vm1, %v8112_v9 }
  0xdd   : > { %5499 = vmatmul.mubr.msk.f32.gmra.mrb[6].mxu1 %vm1031_vm1, %v6660_v29  ;;  %5720 = vmatmul.mubr.msk.f32.gmra.mrb[20].mxu0 %vm1031_vm1, %v6427_v46  ;;  %v8115_v46 = vld [vmem:[#allocation56_spill] sm:$0xff]  ;;  %v4026_v29 = vsel %vm8121_vm4, %v8059_v63, 0.0  ;;  %v8137_v63 = vld [vmem:[#allocation35_spill] sm:$0xff]  ;;  %vm4643_vm4 = vcmask 58368  }
  0xde   : > { %5501 = vmatprep.mubr.msk.f32.mxu1 %vm1031_vm1, %v8113_v55  ;;  %5722 = vmatprep.mubr.msk.f32.mxu0 %vm1031_vm1, %v6433_v56  ;;  %v8117_v56 = vld [vmem:[#allocation60_spill] sm:$0xff] }
  0xe1   : > { %5502 = vmatmul.mubr.msk.f32.gmra.mrb[8].mxu1 %vm1031_vm1, %v6706_v61  ;;  %5723 = vmatmul.mubr.msk.f32.gmra.mrb[22].mxu0 %vm1031_vm1, %v6465_v37  ;;  %v8116_v37 = vld [vmem:[#allocation57_spill] sm:$0xff]  ;;  %v8122_v61 = vld [vmem:[#allocation63_spill] sm:$0xff] }
  0xe2   : > { %5504 = vmatprep.mubr.msk.f32.mxu1 %vm1031_vm1, %v8114_v20  ;;  %5725 = vmatprep.mubr.msk.f32.mxu0 %vm1031_vm1, %v6474_v34  ;;  %v4024_v34 = vsel %vm8118_vm0, %v8055_v48, 0.0  ;;  %v8135_v48 = vld [vmem:[#allocation25_spill] sm:$0xff] }
  0xe3   : > { %vm8136_vm12 = vcmp.lt.s32.totalorder %v8135_v48, 16 }
  0xe5   : > { %5505 = vmatmul.mubr.msk.f32.gmra.mrb[10].mxu1 %vm1031_vm1, %v6799_v4  ;;  %5726 = vmatmul.mubr.msk.f32.gmra.mrb[24].mxu0 %vm1031_vm1, %v6505_v26  ;;  %v4028_v4 = vsel %vm8123_vm3, %v8063_v35, 0.0 }
  0xe6   : > { %5507 = vmatprep.mubr.msk.f32.mxu1 %vm1031_vm1, %v8115_v46  ;;  %5728 = vmatprep.mubr.msk.f32.mxu0 %vm1031_vm1, %v6512_v59 }
  0xe9   : > { %5508 = vmatmul.mubr.msk.f32.gmra.mrb[12].mxu1 %vm1031_vm1, %v6853_v49  ;;  %5729 = vmatmul.mubr.msk.f32.gmra.mrb[26].mxu0 %vm1031_vm1, %v6548_v45  ;;  %v8124_v49 = vld [vmem:[#allocation64_spill] sm:$0xff] }
  0xea   : > { %5510 = vmatprep.mubr.msk.f32.mxu1 %vm1031_vm1, %v8116_v37  ;;  %5731 = vmatprep.mubr.msk.f32.mxu0 %vm1031_vm1, %v6725_v7 }
  0xed   : > { %5511 = vmatmul.mubr.msk.f32.gmra.mrb[14].mxu1 %vm1031_vm1, %v6889_v30  ;;  %5732 = vmatmul.mubr.msk.f32.gmra.mrb[28].mxu0 %vm1031_vm1, %v6794_v15  ;;  %v4030_v30 = vsel %vm8125_vm6, %v8067_v22, 0.0  ;;  %v8141_v22 = vld [vmem:[#allocation38_spill] sm:$0xff] }
  0xee   : > { %5513 = vmatprep.mubr.msk.f32.mxu1 %vm1031_vm1, %v8117_v56  ;;  %5734 = vmatprep.mubr.f32.mxu0 %v8009_v11 }
  0xf1   : > { %5514 = vmatmul.mubr.msk.f32.gmra.mrb[16].mxu1 %vm1031_vm1, %v6920_v38  ;;  %5735 = vmatmul.mubr.f32.gmra.mrb[30].mxu0 %v8009_v11  ;;  %v4032_v38 = vsel %vm8126_vm10, %v8071_v57, 0.0  ;;  %v6074_v57 = vld [vmem:[%s6165_s6 + $0xa8] sm:$0xff] }
  0xf2   : > { %5516 = vmatprep.mubr.msk.f32.mxu1 %vm1031_vm1, %v8119_v14  ;;  %5739 = vmatprep.mubr.msk.f32.mxu0 %vm1031_vm1, %v8054_v13  ;;  %v8134_v13 = vld [vmem:[#allocation31_spill] sm:$0xff] }
  0xf5   : > { %5517 = vmatmul.mubr.msk.f32.gmra.mrb[18].mxu1 %vm1031_vm1, %v6955_v10  ;;  %5740 = vmatmul.mubr.msk.f32.vlgmr.msra.gmra.mrb[0].mxu0 %vm1031_vm1, %v4024_v34  ;;  %v8127_v10 = vld [vmem:[#allocation65_spill] sm:$0xff] }
  0xf6   : > { %5519 = vmatprep.mubr.msk.f32.mxu1 %vm1031_vm1, %v8120_v42  ;;  %5742 = vmatprep.mubr.msk.f32.mxu0 %vm1031_vm1, %v8058_v44  ;;  %v6071_v44 = vld [vmem:[%s6165_s6 + $0x90] sm:$0xff] }
  0xf9   : > { %5520 = vmatmul.mubr.msk.f32.gmra.mrb[20].mxu1 %vm1031_vm1, %v6987_v12  ;;  %5743 = vmatmul.mubr.msk.f32.gmra.mrb[2].mxu0 %vm1031_vm1, %v4026_v29  ;;  %v4034_v12 = vsel %vm8128_vm15, %v8075_v23, 0.0  ;;  %v8144_v23 = vld [vmem:[#allocation41_spill] sm:$0xff] }
  0xfa   : > { %5522 = vmatprep.mubr.msk.f32.mxu1 %vm1031_vm1, %v8122_v61  ;;  %5745 = vmatprep.mubr.msk.f32.mxu0 %vm1031_vm1, %v8062_v51  ;;  %v8139_v51 = vld [vmem:[#allocation30_spill] sm:$0xff] }
  0xfb   : > { %vm8140_vm14 = vcmp.lt.s32.totalorder %v8139_v51, 16 }
  0xfc   : > { %v4040_v35 = vsel %vm8140_vm14, %v8138_v6, 0.0 }
  0xfd   : > { %5523 = vmatmul.mubr.msk.f32.gmra.mrb[22].mxu1 %vm1031_vm1, %v7014_v36  ;;  %5746 = vmatmul.mubr.msk.f32.gmra.mrb[4].mxu0 %vm1031_vm1, %v4028_v4  ;;  %v8129_v36 = vld [vmem:[#allocation67_spill] sm:$0xff] }
  0xfe   : > { %5525 = vmatprep.mubr.msk.f32.mxu1 %vm1031_vm1, %v8124_v49  ;;  %5748 = vmatprep.mubr.msk.f32.mxu0 %vm1031_vm1, %v8066_v50  ;;  %v6073_v50 = vld [vmem:[%s6165_s6 + $0xa0] sm:$0xff] }
 0x101   : > { %5526 = vmatmul.mubr.msk.f32.gmra.mrb[24].mxu1 %vm1031_vm1, %v7042_v62  ;;  %5749 = vmatmul.mubr.msk.f32.gmra.mrb[6].mxu0 %vm1031_vm1, %v4030_v30  ;;  %v8131_v62 = vld [vmem:[#allocation22_spill] sm:$0xff] }
 0x102   : > { %5528 = vmatprep.mubr.msk.f32.mxu1 %vm1031_vm1, %v7037_v52  ;;  %5751 = vmatprep.mubr.msk.f32.mxu0 %vm1031_vm1, %v8070_v40  ;;  %v8130_v52 = vld [vmem:[#allocation66_spill] sm:$0xff]  ;;  %vm8132_vm9 = vcmp.lt.s32.totalorder %v8131_v62, 16  ;;  %v4042_v40 = vsel %vm8143_vm13, %v8093_v54, 0.0 }
 0x103   : > { %v6077_v54 = vld [vmem:[%s6165_s6 + $0xc0] sm:$0xff] }
 0x105   : > { %5529 = vmatmul.mubr.msk.f32.gmra.mrb[26].mxu1 %vm1031_vm1, %v7065_v2  ;;  %5752 = vmatmul.mubr.msk.f32.gmra.mrb[8].mxu0 %vm1031_vm1, %v4032_v38  ;;  %v4036_v2 = vsel %vm8132_vm9, %v8081_v19, 0.0  ;;  %v8145_v19 = vld [vmem:[#allocation37_spill] sm:$0xff] }
 0x106   : > { %5531 = vmatprep.mubr.msk.f32.mxu1 %vm1031_vm1, %v8127_v10  ;;  %5754 = vmatprep.mubr.msk.f32.mxu0 %vm1031_vm1, %v8074_v60  ;;  %v6075_v60 = vld [vmem:[%s6165_s6 + $0xb0] sm:$0xff]  ;;  %vm8146_vm11 = vcmp.lt.s32.totalorder %v8145_v19, 16 }
 0x109   : > { %5532 = vmatmul.mubr.msk.f32.gmra.mrb[28].mxu1 %vm1031_vm1, %v8129_v36  ;;  %5755 = vmatmul.mubr.msk.f32.gmra.mrb[10].mxu0 %vm1031_vm1, %v4034_v12 }
 0x10a   : > { %5534 = vmatprep.mubr.msk.f32.mxu1 %vm1031_vm1, %v8130_v52  ;;  %5757 = vmatprep.mubr.msk.f32.mxu0 %vm1031_vm1, %v8080_v21  ;;  %v4038_v21 = vsel %vm8136_vm12, %v8085_v33, 0.0  ;;  %v4044_v33 = vsel %vm8146_vm11, %v8097_v18, 0.0  ;;  %v6079_v18 = vld [vmem:[%s6165_s6 + $0xd0] sm:$0xff] }
 0x10d   : > { %5535 = vmatmul.mubr.msk.f32.gmra.mrb[30].mxu1 %vm1031_vm1, %v8133_v17  ;;  %5758 = vmatmul.mubr.msk.f32.gmra.mrb[12].mxu0 %vm1031_vm1, %v4036_v2 }
 0x10e   : > { %5563 = vmatprep.mubr.msk.f32.mxu1 %vm1031_vm1, %v6069_v5  ;;  %5760 = vmatprep.mubr.msk.f32.mxu0 %vm1031_vm1, %v8134_v13 }
 0x111   : > { %5564 = vmatmul.mubr.msk.f32.vlgmr.msra.gmra.mrb[16].mxu1 %vm1031_vm1, %v6070_v8  ;;  %5761 = vmatmul.mubr.msk.f32.gmra.mrb[14].mxu0 %vm1031_vm1, %v4038_v21 }
 0x112   : > { %5566 = vmatprep.mubr.msk.f32.mxu1 %vm1031_vm1, %v6071_v44  ;;  %5763 = vmatprep.mubr.msk.f32.mxu0 %vm1031_vm1, %v8137_v63 }
 0x115   : > { %5567 = vmatmul.mubr.msk.f32.gmra.mrb[18].mxu1 %vm1031_vm1, %v6072_v39  ;;  %5764 = vmatmul.mubr.msk.f32.gmra.mrb[16].mxu0 %vm1031_vm1, %v4040_v35 }
 0x116   : > { %5569 = vmatprep.mubr.msk.f32.mxu1 %vm1031_vm1, %v6073_v50  ;;  %5766 = vmatprep.mubr.msk.f32.mxu0 %vm1031_vm1, %v8141_v22 }
 0x119   : > { %5570 = vmatmul.mubr.msk.f32.gmra.mrb[20].mxu1 %vm1031_vm1, %v6074_v57  ;;  %5767 = vmatmul.mubr.msk.f32.gmra.mrb[18].mxu0 %vm1031_vm1, %v4042_v40 }
 0x11a   : > { %5572 = vmatprep.mubr.msk.f32.mxu1 %vm1031_vm1, %v6075_v60  ;;  %5769 = vmatprep.mubr.msk.f32.mxu0 %vm1031_vm1, %v8144_v23 }
 0x11d   : > { %5573 = vmatmul.mubr.msk.f32.gmra.mrb[22].mxu1 %vm1031_vm1, %v6076_v28  ;;  %5770 = vmatmul.mubr.msk.f32.gmra.mrb[20].mxu0 %vm1031_vm1, %v4044_v33 }
 0x11e   : > { %5575 = vmatprep.mubr.msk.f32.mxu1 %vm1031_vm1, %v6077_v54  ;;  %5772 = vmatprep.mubr.msk.f32.mxu0 %vm1031_vm1, %v8100_v25  ;;  %v4050_v25 = vsel %vm8152_vm5, %v6824_v16, 0.0 }
 0x121   : > { %5576 = vmatmul.mubr.msk.f32.gmra.mrb[24].mxu1 %vm1031_vm1, %v6078_v3  ;;  %5773 = vmatmul.mubr.msk.f32.gmra.mrb[22].mxu0 %vm1031_vm1, %v4046_v24 }
 0x122   : > { %5578 = vmatprep.mubr.msk.f32.mxu1 %vm1031_vm1, %v6079_v18  ;;  %5775 = vmatprep.mubr.msk.f32.mxu0 %vm1031_vm1, %v6721_v58  ;;  %v8154_v58 = vld [vmem:[#allocation59_spill] sm:$0xff] }
 0x125   : > { %5579 = vmatmul.mubr.msk.f32.gmra.mrb[26].mxu1 %vm1031_vm1, %v6505_v26  ;;  %5776 = vmatmul.mubr.msk.f32.gmra.mrb[24].mxu0 %vm1031_vm1, %v4048_v41  ;;  %v8153_v26 = vld [vmem:[#allocation58_spill] sm:$0xff] }
 0x126   : > { %5581 = vmatprep.mubr.msk.f32.mxu1 %vm1031_vm1, %v6512_v59  ;;  %5778 = vmatprep.mubr.msk.f32.mxu0 %vm1031_vm1, %v6809_v0  ;;  %v8155_v59 = vld [vmem:[#allocation53_spill] sm:$0xff] }
 0x127   : > { %vm8156_vm0 = vcmp.lt.s32.totalorder %v8155_v59, 16 }
 0x128   : > { %v4052_v32 = vsel %vm8156_vm0, %v8154_v58, 0.0 }
 0x129   : > { %5582 = vmatmul.mubr.msk.f32.gmra.mrb[28].mxu1 %vm1031_vm1, %v6548_v45  ;;  %5779 = vmatmul.mubr.msk.f32.gmra.mrb[26].mxu0 %vm1031_vm1, %v4050_v25 }
 0x12a   : > { %5584 = vmatprep.mubr.msk.f32.mxu1 %vm1031_vm1, %v6725_v7  ;;  %5781 = vmatprep.mubr.msk.f32.mxu0 %vm1031_vm1, %v8153_v26 }
 0x12d   : > { %5585 = vmatmul.mubr.msk.f32.gmra.mrb[30].mxu1 %vm1031_vm1, %v6794_v15  ;;  %5782 = vmatmul.mubr.msk.f32.gmra.mrb[28].mxu0 %vm1031_vm1, %v4052_v32  ;;  %vm4405_vm1 = vcmask 64512  }
 0x12e   : > { %5784 = vmatprep.mubr.f32.mxu0 %v8009_v11 }
 0x131   : > { %5785 = vmatmul.mubr.f32.gmra.mrb[30].mxu0 %v8009_v11 }
 0x1a4   : > { %v5491_v45 = vpop.f32.mrb[0].mxu1 }
 0x1a5   : > { %v2521_v0 = vpop.f32.mrb[1].mxu1 }
 0x1a8   : > { %v5494_v7 = vpop.f32.mrb[2].mxu1 }
 0x1a9   : > { %v2531_v16 = vpop.f32.mrb[3].mxu1 }
 0x1ac   : > { %v5497_v43 = vpop.f32.mrb[4].mxu1 }
 0x1ad   : > { %v2541_v47 = vpop.f32.mrb[5].mxu1 }
 0x1b0   : > { %v5500_v9 = vpop.f32.mrb[6].mxu1 }
 0x1b1   : > { %v2551_v55 = vpop.f32.mrb[7].mxu1 }
 0x1b4   : > { %v5503_v20 = vpop.f32.mrb[8].mxu1 }
 0x1b5   : > { %v2561_v46 = vpop.f32.mrb[9].mxu1 }
 0x1b8   : > { %v5506_v37 = vpop.f32.mrb[10].mxu1 }
 0x1b9   : > { %v2571_v56 = vpop.f32.mrb[11].mxu1 }
 0x1bc   : > { %v7507_v15 = vpop.f32.mrb[12].mxu1 }
 0x1bd   : > { %v7509_v34 = vpop.f32.mrb[13].mxu1 }
 0x1c0   : > { %v7511_v14 = vpop.f32.mrb[14].mxu1 }
 0x1c1   : > { %v7513_v11 = vpop.f32.mrb[15].mxu1 }
 0x1c8   : > { %v5741_v42 = vpop.f32.mrb[0].mxu0 }
 0x1c9   : > { %v7522_v29 = vadd.f32 %v5741_v42, %v5491_v45  ;;  %v4214_v61 = vpop.f32.mrb[1].mxu0 }
 0x1ca   : > { %v7524_v4 = vadd.f32 %v4214_v61, %v2521_v0 }
 0x1cb   : > { %4407 = vst.msk [vmem:[%s7520_s19 + $0x8] sm:$0xff] %vm4405_vm1, %v7522_v29  ;;  %v4439_v49 = vsel %vm4405_vm1, %v7522_v29, 0.0 }
 0x1cc   : > { %4406 = vst.msk [vmem:[%s7520_s19] sm:$0xff] %vm4405_vm1, %v7524_v4  ;;  %v4438_v30 = vsel %vm4405_vm1, %v7524_v4, 0.0  ;;  %v5744_v38 = vpop.f32.mrb[2].mxu0 }
 0x1cd   : > { %v7536_v10 = vadd.f32 %v5744_v38, %v5494_v7  ;;  %v4224_v12 = vpop.f32.mrb[3].mxu0  ;;  %v4440_v52 = vadd.f32 %v4439_v49, %v4438_v30 }
 0x1ce   : > { %v7538_v36 = vadd.f32 %v4224_v12, %v2531_v16 }
 0x1cf   : > { %4409 = vst.msk [vmem:[%s7520_s19 + $0x18] sm:$0xff] %vm4405_vm1, %v7536_v10  ;;  %v4443_v48 = vsel %vm4405_vm1, %v7536_v10, 0.0 }
 0x1d0   : > { %4408 = vst.msk [vmem:[%s7520_s19 + $0x10] sm:$0xff] %vm4405_vm1, %v7538_v36  ;;  %v4441_v62 = vsel %vm4405_vm1, %v7538_v36, 0.0  ;;  %v5747_v2 = vpop.f32.mrb[4].mxu0 }
 0x1d1   : > { %v4442_v17 = vadd.f32 %v4441_v62, %v4440_v52  ;;  %v7548_v5 = vadd.f32 %v5747_v2, %v5497_v43  ;;  %v4234_v13 = vpop.f32.mrb[5].mxu0 }
 0x1d2   : > { %v7552_v21 = vadd.f32 %v4234_v13, %v2541_v47 }
 0x1d3   : > { %4411 = vst.msk [vmem:[%s7520_s19 + $0x28] sm:$0xff] %vm4405_vm1, %v7548_v5  ;;  %v4444_v8 = vadd.f32 %v4443_v48, %v4442_v17  ;;  %v4447_v39 = vsel %vm4405_vm1, %v7548_v5, 0.0 }
 0x1d4   : > { %4410 = vst.msk [vmem:[%s7520_s19 + $0x20] sm:$0xff] %vm4405_vm1, %v7552_v21  ;;  %v4445_v44 = vsel %vm4405_vm1, %v7552_v21, 0.0  ;;  %v5750_v63 = vpop.f32.mrb[6].mxu0 }
 0x1d5   : > { %v4446_v6 = vadd.f32 %v4445_v44, %v4444_v8  ;;  %v7562_v51 = vadd.f32 %v5750_v63, %v5500_v9  ;;  %v4244_v35 = vpop.f32.mrb[7].mxu0 }
 0x1d6   : > { %v7566_v50 = vadd.f32 %v4244_v35, %v2551_v55 }
 0x1d7   : > { %4413 = vst.msk [vmem:[%s7520_s19 + $0x38] sm:$0xff] %vm4405_vm1, %v7562_v51  ;;  %v4448_v22 = vadd.f32 %v4447_v39, %v4446_v6  ;;  %v4451_v19 = vsel %vm4405_vm1, %v7562_v51, 0.0 }
 0x1d8   : > { %4412 = vst.msk [vmem:[%s7520_s19 + $0x30] sm:$0xff] %vm4405_vm1, %v7566_v50  ;;  %v4449_v27 = vsel %vm4405_vm1, %v7566_v50, 0.0  ;;  %v5753_v40 = vpop.f32.mrb[8].mxu0 }
 0x1d9   : > { %v4450_v57 = vadd.f32 %v4449_v27, %v4448_v22  ;;  %v7576_v60 = vadd.f32 %v5753_v40, %v5503_v20  ;;  %v4254_v23 = vpop.f32.mrb[9].mxu0 }
 0x1da   : > { %v7580_v33 = vadd.f32 %v4254_v23, %v2561_v46 }
 0x1db   : > { %4415 = vst.msk [vmem:[%s7520_s19 + $0x48] sm:$0xff] %vm4405_vm1, %v7576_v60  ;;  %v4452_v28 = vadd.f32 %v4451_v19, %v4450_v57  ;;  %v4455_v1 = vsel %vm4405_vm1, %v7576_v60, 0.0 }
 0x1dc   : > { %4414 = vst.msk [vmem:[%s7520_s19 + $0x40] sm:$0xff] %vm4405_vm1, %v7580_v33  ;;  %v4453_v54 = vsel %vm4405_vm1, %v7580_v33, 0.0  ;;  %v5756_v53 = vpop.f32.mrb[10].mxu0 }
 0x1dd   : > { %v4454_v24 = vadd.f32 %v4453_v54, %v4452_v28  ;;  %v7590_v3 = vadd.f32 %v5756_v53, %v5506_v37  ;;  %v4264_v18 = vpop.f32.mrb[11].mxu0 }
 0x1de   : > { %v7594_v41 = vadd.f32 %v4264_v18, %v2571_v56 }
 0x1df   : > { %4417 = vst.msk [vmem:[%s7520_s19 + $0x58] sm:$0xff] %vm4405_vm1, %v7590_v3  ;;  %v4456_v31 = vadd.f32 %v4455_v1, %v4454_v24  ;;  %v4459_v45 = vsel %vm4405_vm1, %v7590_v3, 0.0 }
 0x1e0   : > { %4416 = vst.msk [vmem:[%s7520_s19 + $0x50] sm:$0xff] %vm4405_vm1, %v7594_v41  ;;  %v4457_v25 = vsel %vm4405_vm1, %v7594_v41, 0.0  ;;  %v5759_v26 = vpop.f32.mrb[12].mxu0 }
 0x1e1   : > { %v4458_v58 = vadd.f32 %v4457_v25, %v4456_v31  ;;  %v7605_v59 = vadd.f32 %v5759_v26, %v7507_v15  ;;  %v4274_v32 = vpop.f32.mrb[13].mxu0 }
 0x1e2   : > { %v7610_v0 = vadd.f32 %v4274_v32, %v7509_v34 }
 0x1e3   : > { %4419 = vst.msk [vmem:[%s7520_s19 + $0x68] sm:$0xff] %vm4405_vm1, %v7605_v59  ;;  %v4460_v7 = vadd.f32 %v4459_v45, %v4458_v58  ;;  %v4463_v37 = vsel %vm4405_vm1, %v7605_v59, 0.0 }
 0x1e4   : > { %4418 = vst.msk [vmem:[%s7520_s19 + $0x60] sm:$0xff] %vm4405_vm1, %v7610_v0  ;;  %v4461_v16 = vsel %vm4405_vm1, %v7610_v0, 0.0  ;;  %v5565_v43 = vpop.f32.mrb[16].mxu1  ;;  %v5762_v47 = vpop.f32.mrb[14].mxu0 }
 0x1e5   : > { %v4462_v9 = vadd.f32 %v4461_v16, %v4460_v7  ;;  %v7621_v55 = vadd.f32 %v5762_v47, %v7511_v14  ;;  %v2867_v20 = vpop.f32.mrb[17].mxu1  ;;  %v4284_v46 = vpop.f32.mrb[15].mxu0 }
 0x1e6   : > { %v7626_v56 = vadd.f32 %v4284_v46, %v7513_v11 }
 0x1e7   : > { %4421 = vst.msk [vmem:[%s7520_s19 + $0x78] sm:$0xff] %vm4405_vm1, %v7621_v55  ;;  %v4464_v15 = vadd.f32 %v4463_v37, %v4462_v9  ;;  %v4467_v11 = vsel %vm4405_vm1, %v7621_v55, 0.0 }
 0x1e8   : > { %4420 = vst.msk [vmem:[%s7520_s19 + $0x70] sm:$0xff] %vm4405_vm1, %v7626_v56  ;;  %v4465_v34 = vsel %vm4405_vm1, %v7626_v56, 0.0  ;;  %v5568_v14 = vpop.f32.mrb[18].mxu1  ;;  %v5765_v42 = vpop.f32.mrb[16].mxu0 }
 0x1e9   : > { %v4466_v61 = vadd.f32 %v4465_v34, %v4464_v15  ;;  %v7636_v49 = vadd.f32 %v5765_v42, %v5565_v43  ;;  %v2877_v30 = vpop.f32.mrb[19].mxu1  ;;  %v4294_v38 = vpop.f32.mrb[17].mxu0 }
 0x1ea   : > { %v7640_v12 = vadd.f32 %v4294_v38, %v2867_v20 }
 0x1eb   : > { %4423 = vst.msk [vmem:[%s7520_s19 + $0x88] sm:$0xff] %vm4405_vm1, %v7636_v49  ;;  %v4468_v52 = vadd.f32 %v4467_v11, %v4466_v61  ;;  %v4471_v63 = vsel %vm4405_vm1, %v7636_v49, 0.0 }
 0x1ec   : > { %4422 = vst.msk [vmem:[%s7520_s19 + $0x80] sm:$0xff] %vm4405_vm1, %v7640_v12  ;;  %v4469_v62 = vsel %vm4405_vm1, %v7640_v12, 0.0  ;;  %v5571_v2 = vpop.f32.mrb[20].mxu1  ;;  %v5768_v17 = vpop.f32.mrb[18].mxu0 }
 0x1ed   : > { %v4470_v13 = vadd.f32 %v4469_v62, %v4468_v52  ;;  %v7650_v48 = vadd.f32 %v5768_v17, %v5568_v14  ;;  %v2887_v8 = vpop.f32.mrb[21].mxu1  ;;  %v4304_v44 = vpop.f32.mrb[19].mxu0 }
 0x1ee   : > { %v7654_v6 = vadd.f32 %v4304_v44, %v2877_v30 }
 0x1ef   : > { %4425 = vst.msk [vmem:[%s7520_s19 + $0x98] sm:$0xff] %vm4405_vm1, %v7650_v48  ;;  %v4472_v35 = vadd.f32 %v4471_v63, %v4470_v13  ;;  %v4475_v28 = vsel %vm4405_vm1, %v7650_v48, 0.0 }
 0x1f0   : > { %4424 = vst.msk [vmem:[%s7520_s19 + $0x90] sm:$0xff] %vm4405_vm1, %v7654_v6  ;;  %v4473_v39 = vsel %vm4405_vm1, %v7654_v6, 0.0  ;;  %v5574_v22 = vpop.f32.mrb[22].mxu1  ;;  %v5771_v27 = vpop.f32.mrb[20].mxu0 }
 0x1f1   : > { %v4474_v40 = vadd.f32 %v4473_v39, %v4472_v35  ;;  %v7664_v57 = vadd.f32 %v5771_v27, %v5571_v2  ;;  %v2897_v23 = vpop.f32.mrb[23].mxu1  ;;  %v4314_v19 = vpop.f32.mrb[21].mxu0 }
 0x1f2   : > { %v7668_v54 = vadd.f32 %v4314_v19, %v2887_v8 }
 0x1f3   : > { %4427 = vst.msk [vmem:[%s7520_s19 + $0xa8] sm:$0xff] %vm4405_vm1, %v7664_v57  ;;  %v4476_v53 = vadd.f32 %v4475_v28, %v4474_v40  ;;  %v4479_v32 = vsel %vm4405_vm1, %v7664_v57, 0.0 }
 0x1f4   : > { %4426 = vst.msk [vmem:[%s7520_s19 + $0xa0] sm:$0xff] %vm4405_vm1, %v7668_v54  ;;  %v4477_v24 = vsel %vm4405_vm1, %v7668_v54, 0.0  ;;  %v5577_v18 = vpop.f32.mrb[24].mxu1  ;;  %v5774_v1 = vpop.f32.mrb[22].mxu0 }
 0x1f5   : > { %v4478_v31 = vadd.f32 %v4477_v24, %v4476_v53  ;;  %v7678_v25 = vadd.f32 %v5774_v1, %v5574_v22  ;;  %v2907_v26 = vpop.f32.mrb[25].mxu1  ;;  %v4324_v58 = vpop.f32.mrb[23].mxu0 }
 0x1f6   : > { %v7682_v45 = vadd.f32 %v4324_v58, %v2897_v23 }
 0x1f7   : > { %4429 = vst.msk [vmem:[%s7520_s19 + $0xb8] sm:$0xff] %vm4405_vm1, %v7678_v25  ;;  %v4480_v7 = vadd.f32 %v4479_v32, %v4478_v31  ;;  %v4483_v15 = vsel %vm4405_vm1, %v7678_v25, 0.0 }
 0x1f8   : > { %4428 = vst.msk [vmem:[%s7520_s19 + $0xb0] sm:$0xff] %vm4405_vm1, %v7682_v45  ;;  %v4481_v16 = vsel %vm4405_vm1, %v7682_v45, 0.0  ;;  %v5580_v43 = vpop.f32.mrb[26].mxu1  ;;  %v5777_v47 = vpop.f32.mrb[24].mxu0 }
 0x1f9   : > { %v4482_v9 = vadd.f32 %v4481_v16, %v4480_v7  ;;  %v7692_v20 = vadd.f32 %v5777_v47, %v5577_v18  ;;  %v2917_v46 = vpop.f32.mrb[27].mxu1  ;;  %v4334_v37 = vpop.f32.mrb[25].mxu0 }
 0x1fa   : > { %v7696_v34 = vadd.f32 %v4334_v37, %v2907_v26 }
 0x1fb   : > { %4431 = vst.msk [vmem:[%s7520_s19 + $0xc8] sm:$0xff] %vm4405_vm1, %v7692_v20  ;;  %v4484_v14 = vadd.f32 %v4483_v15, %v4482_v9  ;;  %v4487_v2 = vsel %vm4405_vm1, %v7692_v20, 0.0 }
 0x1fc   : > { %4430 = vst.msk [vmem:[%s7520_s19 + $0xc0] sm:$0xff] %vm4405_vm1, %v7696_v34  ;;  %v4485_v42 = vsel %vm4405_vm1, %v7696_v34, 0.0  ;;  %v5583_v61 = vpop.f32.mrb[28].mxu1  ;;  %v5780_v30 = vpop.f32.mrb[26].mxu0 }
 0x1fd   : > { %v4486_v38 = vadd.f32 %v4485_v42, %v4484_v14  ;;  %v7706_v11 = vadd.f32 %v5780_v30, %v5580_v43  ;;  %v2927_v52 = vpop.f32.mrb[29].mxu1  ;;  %v4344_v62 = vpop.f32.mrb[27].mxu0 }
 0x1fe   : > { %v7710_v17 = vadd.f32 %v4344_v62, %v2917_v46 }
 0x1ff   : > { %4433 = vst.msk [vmem:[%s7520_s19 + $0xd8] sm:$0xff] %vm4405_vm1, %v7706_v11  ;;  %v4488_v13 = vadd.f32 %v4487_v2, %v4486_v38  ;;  %v4491_v40 = vsel %vm4405_vm1, %v7706_v11, 0.0 }
 0x200   : > { %4432 = vst.msk [vmem:[%s7520_s19 + $0xd0] sm:$0xff] %vm4405_vm1, %v7710_v17  ;;  %v4489_v8 = vsel %vm4405_vm1, %v7710_v17, 0.0  ;;  %v5586_v44 = vpop.f32.mrb[30].mxu1  ;;  %v5783_v63 = vpop.f32.mrb[28].mxu0 }
 0x201   : > { %v4490_v35 = vadd.f32 %v4489_v8, %v4488_v13  ;;  %v7720_v39 = vadd.f32 %v5783_v63, %v5583_v61  ;;  %v2937_v22 = vpop.f32.mrb[31].mxu1  ;;  %v4354_v27 = vpop.f32.mrb[29].mxu0 }
 0x202   : > { %v7724_v23 = vadd.f32 %v4354_v27, %v2927_v52 }
 0x203   : > { %4435 = vst.msk [vmem:[%s7520_s19 + $0xe8] sm:$0xff] %vm4405_vm1, %v7720_v39  ;;  %v4492_v19 = vadd.f32 %v4491_v40, %v4490_v35  ;;  %v4495_v31 = vsel %vm4405_vm1, %v7720_v39, 0.0 }
 0x204   : > { %4434 = vst.msk [vmem:[%s7520_s19 + $0xe0] sm:$0xff] %vm4405_vm1, %v7724_v23  ;;  %v4493_v28 = vsel %vm4405_vm1, %v7724_v23, 0.0  ;;  %v5786_v53 = vpop.f32.mrb[30].mxu0 }
 0x205   : > { %v4494_v24 = vadd.f32 %v4493_v28, %v4492_v19  ;;  %v7734_v18 = vadd.f32 %v5786_v53, %v5586_v44  ;;  %v4364_v1 = vpop.f32.mrb[31].mxu0 }
 0x206   : > { %v7738_v26 = vadd.f32 %v4364_v1, %v2937_v22 }
 0x207   : > { %4437 = vst.msk [vmem:[%s7520_s19 + $0xf8] sm:$0xff] %vm4405_vm1, %v7734_v18  ;;  %v4496_v58 = vadd.f32 %v4495_v31, %v4494_v24  ;;  %v4499_v16 = vsel %vm4405_vm1, %v7734_v18, 0.0 }
 0x208   : > { %4436 = vst.msk [vmem:[%s7520_s19 + $0xf0] sm:$0xff] %vm4405_vm1, %v7738_v26  ;;  %v4497_v32 = vsel %vm4405_vm1, %v7738_v26, 0.0 }
 0x209   : > { %v4498_v7 = vadd.f32 %v4497_v32, %v4496_v58 }
 0x20b   : > { %v4500_v43 = vadd.f32 %v4499_v16, %v4498_v7 }
 0x20d   : > { %v4501_v47 = vrot.slane %v4500_v43, 4 }
 0x20f   : > { %v4502_v9 = vadd.f32 %v4501_v47, %v4500_v43 }
 0x211   : > { %v4503_v46 = vrot.slane %v4502_v9, 2 }
 0x213   : > { %v4504_v37 = vadd.f32 %v4503_v46, %v4502_v9 }
 0x215   : > { %v4505_v15 = vrot.slane %v4504_v37, 1 }
 0x217   : > { %v4506_v14 = vadd.f32 %v4505_v15, %v4504_v37 }
 0x219   : > { %v7750_v42 = vmul.f32 0.00390625, %v4506_v14 }
 0x21b   : > { %v4509_v61 = vsub.f32 %v7524_v4, %v7750_v42  ;;  %v4510_v30 = vsub.f32 %v7522_v29, %v7750_v42  ;;  %v4511_v38 = vsub.f32 %v7538_v36, %v7750_v42  ;;  %v4512_v52 = vsub.f32 %v7536_v10, %v7750_v42 }
 0x21c   : > { %v4513_v13 = vsub.f32 %v7552_v21, %v7750_v42  ;;  %v4514_v44 = vsub.f32 %v7548_v5, %v7750_v42  ;;  %v4515_v36 = vsub.f32 %v7566_v50, %v7750_v42  ;;  %v4516_v21 = vsub.f32 %v7562_v51, %v7750_v42 }
 0x21d   : > { %v4541_v62 = vmul.f32 %v4509_v61, %v4509_v61  ;;  %v4542_v2 = vmul.f32 %v4510_v30, %v4510_v30  ;;  %v4543_v8 = vmul.f32 %v4511_v38, %v4511_v38  ;;  %v4544_v63 = vmul.f32 %v4512_v52, %v4512_v52 }
 0x21e   : > { %v4545_v22 = vmul.f32 %v4513_v13, %v4513_v13  ;;  %v4546_v40 = vmul.f32 %v4514_v44, %v4514_v44  ;;  %v4517_v28 = vsub.f32 %v7580_v33, %v7750_v42  ;;  %v4547_v53 = vmul.f32 %v4515_v36, %v4515_v36 }
 0x21f   : > { %v4573_v4 = vsel %vm4405_vm1, %v4541_v62, 0.0  ;;  %v4574_v29 = vsel %vm4405_vm1, %v4542_v2, 0.0  ;;  %v4576_v10 = vsel %vm4405_vm1, %v4543_v8, 0.0  ;;  %v4578_v19 = vsel %vm4405_vm1, %v4544_v63, 0.0 }
 0x220   : > { %v4575_v35 = vadd.f32 %v4574_v29, %v4573_v4  ;;  %v4580_v24 = vsel %vm4405_vm1, %v4545_v22, 0.0  ;;  %v4518_v50 = vsub.f32 %v7576_v60, %v7750_v42  ;;  %v4548_v31 = vmul.f32 %v4516_v21, %v4516_v21 }
 0x221   : > { %v4582_v58 = vsel %vm4405_vm1, %v4546_v40, 0.0  ;;  %v4519_v51 = vsub.f32 %v7594_v41, %v7750_v42  ;;  %v4549_v7 = vmul.f32 %v4517_v28, %v4517_v28  ;;  %v4584_v16 = vsel %vm4405_vm1, %v4547_v53, 0.0 }
 0x222   : > { %v4577_v27 = vadd.f32 %v4576_v10, %v4575_v35  ;;  %v4520_v33 = vsub.f32 %v7590_v3, %v7750_v42  ;;  %v4550_v47 = vmul.f32 %v4518_v50, %v4518_v50  ;;  %v4586_v9 = vsel %vm4405_vm1, %v4548_v31, 0.0 }
 0x223   : > { %v4521_v60 = vsub.f32 %v7610_v0, %v7750_v42  ;;  %v4551_v37 = vmul.f32 %v4519_v51, %v4519_v51  ;;  %v4588_v15 = vsel %vm4405_vm1, %v4549_v7, 0.0  ;;  %v4522_v41 = vsub.f32 %v7605_v59, %v7750_v42 }
 0x224   : > { %v4579_v5 = vadd.f32 %v4578_v19, %v4577_v27  ;;  %v4552_v61 = vmul.f32 %v4520_v33, %v4520_v33  ;;  %v4590_v30 = vsel %vm4405_vm1, %v4550_v47, 0.0  ;;  %v4523_v3 = vsub.f32 %v7626_v56, %v7750_v42 }
 0x225   : > { %v4553_v52 = vmul.f32 %v4521_v60, %v4521_v60  ;;  %v4592_v62 = vsel %vm4405_vm1, %v4551_v37, 0.0  ;;  %v4524_v0 = vsub.f32 %v7621_v55, %v7750_v42  ;;  %v4554_v13 = vmul.f32 %v4522_v41, %v4522_v41 }
 0x226   : > { %v4581_v1 = vadd.f32 %v4580_v24, %v4579_v5  ;;  %v4594_v8 = vsel %vm4405_vm1, %v4552_v61, 0.0  ;;  %v4525_v59 = vsub.f32 %v7640_v12, %v7750_v42  ;;  %v4555_v63 = vmul.f32 %v4523_v3, %v4523_v3 }
 0x227   : > { %v4596_v4 = vsel %vm4405_vm1, %v4553_v52, 0.0  ;;  %v4526_v56 = vsub.f32 %v7636_v49, %v7750_v42  ;;  %v4556_v35 = vmul.f32 %v4524_v0, %v4524_v0  ;;  %v4598_v36 = vsel %vm4405_vm1, %v4554_v13, 0.0 }
 0x228   : > { %v4583_v32 = vadd.f32 %v4582_v58, %v4581_v1  ;;  %v4527_v55 = vsub.f32 %v7654_v6, %v7750_v42  ;;  %v4557_v10 = vmul.f32 %v4525_v59, %v4525_v59  ;;  %v4600_v27 = vsel %vm4405_vm1, %v4555_v63, 0.0 }
 0x229   : > { %v4528_v12 = vsub.f32 %v7650_v48, %v7750_v42  ;;  %v4558_v40 = vmul.f32 %v4526_v56, %v4526_v56  ;;  %v4602_v19 = vsel %vm4405_vm1, %v4556_v35, 0.0  ;;  %v4529_v49 = vsub.f32 %v7668_v54, %v7750_v42 }
 0x22a   : > { %v4585_v43 = vadd.f32 %v4584_v16, %v4583_v32  ;;  %v4559_v28 = vmul.f32 %v4527_v55, %v4527_v55  ;;  %v4604_v53 = vsel %vm4405_vm1, %v4557_v10, 0.0  ;;  %v4530_v6 = vsub.f32 %v7664_v57, %v7750_v42 }
 0x22b   : > { %v4560_v1 = vmul.f32 %v4528_v12, %v4528_v12  ;;  %v4606_v50 = vsel %vm4405_vm1, %v4558_v40, 0.0  ;;  %v4531_v48 = vsub.f32 %v7682_v45, %v7750_v42  ;;  %v4561_v58 = vmul.f32 %v4529_v49, %v4529_v49 }
 0x22c   : > { %v4587_v46 = vadd.f32 %v4586_v9, %v4585_v43  ;;  %v4608_v32 = vsel %vm4405_vm1, %v4559_v28, 0.0  ;;  %v4532_v54 = vsub.f32 %v7678_v25, %v7750_v42  ;;  %v4562_v7 = vmul.f32 %v4530_v6, %v4530_v6 }
 0x22d   : > { %v4610_v16 = vsel %vm4405_vm1, %v4560_v1, 0.0  ;;  %v4533_v57 = vsub.f32 %v7696_v34, %v7750_v42  ;;  %v4563_v33 = vmul.f32 %v4531_v48, %v4531_v48  ;;  %v4612_v47 = vsel %vm4405_vm1, %v4561_v58, 0.0 }
 0x22e   : > { %v4589_v14 = vadd.f32 %v4588_v15, %v4587_v46  ;;  %v4534_v45 = vsub.f32 %v7692_v20, %v7750_v42  ;;  %v4564_v46 = vmul.f32 %v4532_v54, %v4532_v54  ;;  %v4614_v60 = vsel %vm4405_vm1, %v4562_v7, 0.0 }
 0x22f   : > { %v4535_v25 = vsub.f32 %v7710_v17, %v7750_v42  ;;  %v4565_v15 = vmul.f32 %v4533_v57, %v4533_v57  ;;  %v4536_v34 = vsub.f32 %v7706_v11, %v7750_v42  ;;  %v4537_v20 = vsub.f32 %v7724_v23, %v7750_v42 }
 0x230   : > { %v4591_v38 = vadd.f32 %v4590_v30, %v4589_v14  ;;  %v4616_v14 = vsel %vm4405_vm1, %v4563_v33, 0.0  ;;  %v4566_v61 = vmul.f32 %v4534_v45, %v4534_v45  ;;  %v4618_v30 = vsel %vm4405_vm1, %v4564_v46, 0.0 }
 0x231   : > { %v4567_v3 = vmul.f32 %v4535_v25, %v4535_v25  ;;  %v4620_v52 = vsel %vm4405_vm1, %v4565_v15, 0.0  ;;  %v4538_v17 = vsub.f32 %v7720_v39, %v7750_v42  ;;  %v4539_v11 = vsub.f32 %v7738_v26, %v7750_v42 }
 0x232   : > { %v4593_v2 = vadd.f32 %v4592_v62, %v4591_v38  ;;  %v4622_v0 = vsel %vm4405_vm1, %v4566_v61, 0.0  ;;  %v4540_v23 = vsub.f32 %v7734_v18, %v7750_v42 }
 0x233   : > { %v4570_v63 = vmul.f32 %v4538_v17, %v4538_v17  ;;  %v4571_v39 = vmul.f32 %v4539_v11, %v4539_v11 }
 0x234   : > { %v4595_v44 = vadd.f32 %v4594_v8, %v4593_v2  ;;  %v4568_v2 = vmul.f32 %v4536_v34, %v4536_v34  ;;  %v4569_v8 = vmul.f32 %v4537_v20, %v4537_v20 }
 0x235   : > { %v4632_v55 = vsel %vm4405_vm1, %v4571_v39, 0.0 }
 0x236   : > { %v4597_v29 = vadd.f32 %v4596_v4, %v4595_v44  ;;  %v4624_v44 = vsel %vm4405_vm1, %v4567_v3, 0.0  ;;  %v4626_v4 = vsel %vm4405_vm1, %v4568_v2, 0.0  ;;  %v4628_v56 = vsel %vm4405_vm1, %v4569_v8, 0.0 }
 0x238   : > { %v4599_v22 = vadd.f32 %v4598_v36, %v4597_v29  ;;  %v4572_v36 = vmul.f32 %v4540_v23, %v4540_v23 }
 0x23a   : > { %v4601_v21 = vadd.f32 %v4600_v27, %v4599_v22  ;;  %v4630_v22 = vsel %vm4405_vm1, %v4570_v63, 0.0  ;;  %v4634_v27 = vsel %vm4405_vm1, %v4572_v36, 0.0 }
 0x23c   : > { %v4603_v5 = vadd.f32 %v4602_v19, %v4601_v21 }
 0x23e   : > { %v4605_v24 = vadd.f32 %v4604_v53, %v4603_v5 }
 0x240   : > { %v4607_v31 = vadd.f32 %v4606_v50, %v4605_v24 }
 0x242   : > { %v4609_v51 = vadd.f32 %v4608_v32, %v4607_v31 }
 0x244   : > { %v4611_v43 = vadd.f32 %v4610_v16, %v4609_v51 }
 0x246   : > { %v4613_v9 = vadd.f32 %v4612_v47, %v4611_v43 }
 0x248   : > { %v4615_v37 = vadd.f32 %v4614_v60, %v4613_v9 }
 0x24a   : > { %v4617_v41 = vadd.f32 %v4616_v14, %v4615_v37 }
 0x24c   : > { %v4619_v38 = vadd.f32 %v4618_v30, %v4617_v41 }
 0x24e   : > { %v4621_v62 = vadd.f32 %v4620_v52, %v4619_v38 }
 0x250   : > { %v4623_v13 = vadd.f32 %v4622_v0, %v4621_v62 }
 0x252   : > { %v4625_v59 = vadd.f32 %v4624_v44, %v4623_v13 }
 0x254   : > { %v4627_v29 = vadd.f32 %v4626_v4, %v4625_v59 }
 0x256   : > { %v4629_v35 = vadd.f32 %v4628_v56, %v4627_v29 }
 0x258   : > { %v4631_v26 = vadd.f32 %v4630_v22, %v4629_v35 }
 0x25a   : > { %v4633_v10 = vadd.f32 %v4632_v55, %v4631_v26 }
 0x25c   : > { %v4635_v21 = vadd.f32 %v4634_v27, %v4633_v10 }
 0x25e   : > { %v4636_v18 = vrot.slane %v4635_v21, 4 }
 0x260   : > { %v4637_v12 = vadd.f32 %v4636_v18, %v4635_v21 }
 0x262   : > { %v4638_v40 = vrot.slane %v4637_v12, 2 }
 0x264   : > { %v4639_v19 = vadd.f32 %v4638_v40, %v4637_v12 }
 0x266   : > { %v4640_v5 = vrot.slane %v4639_v19, 1 }
 0x268   : > { %v4641_v49 = vadd.f32 %v4640_v5, %v4639_v19 }
 0x26a   : > { %v4642_v28 = vsel %vm715_vm7, %v7750_v42, %v4641_v49 }
 0x26b   : > { %4644 = vst.msk [vmem:[%s235_s23] sm:$0x3] %vm4643_vm4, %v4642_v28 }
 0x26c PF: > { %s16_s18 = sadd.s32 1, %s6086_s18  }
 0x26d   : > { %p13_p4 = scmp.ge.s32.totalorder %s16_s18, 4  }
 0x26f   :  { %15 = sbr.rel (!%p13_p4) target bundleno = 1 (0x1), region = 86 }

// kernel: double_conv.4
= control target key start
LH: loop header
LB: loop body
LE: loop exit
PB: predicated region body
PF: predicated region fallthrough
CT: control target
= control target key end

     0   :  { %s6168_s18 = smov 0   ;;  %s7957_s0 = inlined_call_operand.vmem [shape: f32[2,256,8], index: 0, kind: input, shape index: {}]   ;;  %s7958_s1 = inlined_call_operand.vmem [shape: f32[1,8], index: 1, kind: input, shape index: {}]   ;;  %s7959_s2 = inlined_call_operand.vmem [shape: f32[1,8], index: 2, kind: input, shape index: {}]   ;;  %s7960_s3 = inlined_call_operand.vmem [shape: f32[3,3,8,8], index: 3, kind: input, shape index: {}]   ;;  %s7961_s4 = inlined_call_operand.vmem [shape: f32[2,256,8], index: 4, kind: output, shape index: {0}]   ;;  %s7962_s5 = inlined_call_operand.vmem [shape: f32[2,2,8], index: 5, kind: output, shape index: {1}]  }
   0x1 LB: > { %s4812_s19 = sadd.s32 4294967295, %s6135_s18   ;;  %p4816_p0 = scmp.ge.s32.totalorder %s6135_s18, 1  ;;  %s6135_s18 = sphi %s6168_s18, %s16_s18  }
   0x2   : > { %p190_p1 = scmp.lt.s32.totalorder %s6135_s18, 3 }
   0x4   : > { %p191_p2 = pnand %p4816_p0, %p190_p1 }
   0x6   : > { %194 = sbr.rel (%p191_p2) target bundleno = 625 (0x271), region = 36 }
   0xd   : > { %v4824_v0 = vld [vmem:[%s7960_s3 + $0x8] sm:$0xff]  ;;  %v4950_v1 = vld [vmem:[%s7960_s3 + $0x20] sm:$0xff]  ;;  %p222_p3 = scmp.lt.s32.totalorder %s4812_s19, 1  ;;  %v7964_v2 = vmov 0.0   ;;  %v6195_v5 = vld [vmem:[%s7960_s3 + $0x10] sm:$0xff]  ;;  %vm1141_vm0 = vcmask 64512   ;;  %v378_v32 = vlaneseq }
   0xe   : > { %5411 = vmatprep.subr.mxu1 %v4824_v0  ;;  %5413 = vmatprep.mubr.f32.mxu1 %v7964_v2  ;;  %v1138_v3 = vld [vmem:[%s7960_s3] sm:$0xff]  ;;  %v4983_v4 = vld [vmem:[%s7960_s3 + $0x28] sm:$0xff]  ;;  %v6258_v36 = vld [vmem:[%s7960_s3 + $0x30] sm:$0xff]  ;;  %vm1746_vm1 = vcmask 1046528   ;;  %vm825_vm7 = vcmask 1040384  }
   0xf   : > { %5412 = vmatpush3.msra.mxu1 %v4824_v0  ;;  %5611 = vmatprep.subr.mxu0 %v4950_v1  ;;  %s8305_s19 = smov (!%p222_p3, %s4812_s19), 1  ;;  %v6201_v6 = vld [vmem:[%s7958_s1] ss:$0 sm:$0xff]  ;;  %v6271_v42 = vshrl.u32 %v378_v32, 7 }
  0x10   : > { %5414 = vmatmul.mubr.f32.vlgmr.msra.gmra.mrb[0].mxu1 %v7964_v2  ;;  %5612 = vmatpush3.msra.mxu0 %v4950_v1  ;;  %s5112_s30 = sshll.u32 %s8305_s19, 8  ;;  %v6213_v7 = vld [vmem:[%s7959_s2] ss:$0 sm:$0xff]  ;;  %s4821_s28 = sshll.u32 %s8305_s19, 1 }
  0x11   : > { %5461 = vmatprep.subr.mxu1 %v1138_v3  ;;  %5661 = vmatprep.subr.mxu0 %v4983_v4  ;;  %s6208_s10 = scalar_lea.vmem %s7957_s0, %s5112_s30  ;;  %v380_v51 = vadd.s32 8, %v6271_v42  ;;  %v6363_v32 = vadd.s32 88, %v6271_v42  ;;  %s7620_s27 = scalar_lea.vmem %s7961_s4, %s5112_s30 }
  0x12   : > { %5462 = vmatpush3.msra.mxu1 %v1138_v3  ;;  %v236_v8 = vld [vmem:[%s6208_s10] sm:$0xff]  ;;  %v237_v9 = vld [vmem:[%s6208_s10 + $0x8] sm:$0xff]  ;;  %v238_v10 = vld [vmem:[%s6208_s10 + $0x10] sm:$0xff]  ;;  %s235_s6 = scalar_lea.vmem %s7962_s5, %s4821_s28 }
  0x13   : > { %5511 = vmatprep.subr.mxu1 %v6195_v5  ;;  %v275_v11 = vmul.f32 %v6201_v6, %v236_v8  ;;  %v276_v12 = vmul.f32 %v6201_v6, %v237_v9  ;;  %v277_v13 = vmul.f32 %v6201_v6, %v238_v10  ;;  %v239_v14 = vld [vmem:[%s6208_s10 + $0x18] sm:$0xff]  ;;  %v240_v15 = vld [vmem:[%s6208_s10 + $0x20] sm:$0xff]  ;;  %v241_v16 = vld [vmem:[%s6208_s10 + $0x28] sm:$0xff]  ;;  %v422_v60 = vand.u32 15, %v380_v51 }
  0x14   : > { %v278_v17 = vmul.f32 %v6201_v6, %v239_v14  ;;  %v279_v18 = vmul.f32 %v6201_v6, %v240_v15  ;;  %v242_v19 = vld [vmem:[%s6208_s10 + $0x30] sm:$0xff]  ;;  %v280_v24 = vmul.f32 %v6201_v6, %v241_v16  ;;  %v243_v30 = vld [vmem:[%s6208_s10 + $0x38] sm:$0xff]  ;;  %v244_v31 = vld [vmem:[%s6208_s10 + $0x40] sm:$0xff] }
  0x15   : > { %v314_v20 = vadd.f32 %v6213_v7, %v275_v11  ;;  %v315_v21 = vadd.f32 %v6213_v7, %v276_v12  ;;  %v316_v22 = vadd.f32 %v6213_v7, %v277_v13  ;;  %v281_v25 = vmul.f32 %v6201_v6, %v242_v19  ;;  %v245_v40 = vld [vmem:[%s6208_s10 + $0x48] sm:$0xff]  ;;  %v246_v41 = vld [vmem:[%s6208_s10 + $0x50] sm:$0xff]  ;;  %v247_v49 = vld [vmem:[%s6208_s10 + $0x58] sm:$0xff] }
  0x16   : > { %v317_v23 = vadd.f32 %v6213_v7, %v278_v17  ;;  %v318_v29 = vadd.f32 %v6213_v7, %v279_v18  ;;  %v319_v34 = vadd.f32 %v6213_v7, %v280_v24  ;;  %v282_v35 = vmul.f32 %v6201_v6, %v243_v30  ;;  %v248_v50 = vld [vmem:[%s6208_s10 + $0x60] sm:$0xff]  ;;  %v249_v58 = vld [vmem:[%s6208_s10 + $0x68] sm:$0xff]  ;;  %v250_v59 = vld [vmem:[%s6208_s10 + $0x70] sm:$0xff] }
  0x17   : > { %v6234_v26 = vmax.f32 %v314_v20, 0.0  ;;  %v6236_v27 = vmax.f32 %v315_v21, 0.0  ;;  %v6238_v28 = vmax.f32 %v316_v22, 0.0  ;;  %v320_v38 = vadd.f32 %v6213_v7, %v281_v25  ;;  %v252_v8 = vld [vmem:[%s6208_s10 + $0x80] sm:$0xff]  ;;  %v253_v9 = vld [vmem:[%s6208_s10 + $0x88] sm:$0xff]  ;;  %v254_v10 = vld [vmem:[%s6208_s10 + $0x90] sm:$0xff] }
  0x18   : > { %v6251_v33 = vmax.f32 %v317_v23, 0.0  ;;  %v6262_v37 = vmax.f32 %v318_v29, 0.0  ;;  %v283_v39 = vmul.f32 %v6201_v6, %v244_v31  ;;  %v6277_v43 = vmax.f32 %v319_v34, 0.0  ;;  %v255_v22 = vld [vmem:[%s6208_s10 + $0x98] sm:$0xff] }
  0x19   : > { %8098 = vst [vmem:[#allocation2_spill] sm:$0xff] %v6238_v28  ;;  %5416 = vmatprep.mubr.msk.f32.mxu1 %vm1141_vm0, %v6234_v26  ;;  %5613 = vmatprep.mubr.msk.f32.mxu0 %vm1141_vm0, %v6234_v26  ;;  %v321_v44 = vadd.f32 %v6213_v7, %v282_v35  ;;  %v284_v45 = vmul.f32 %v6201_v6, %v245_v40  ;;  %v6285_v46 = vmax.f32 %v320_v38, 0.0  ;;  %v382_v11 = vadd.s32 24, %v6271_v42 }
  0x1a   : > { %5417 = vmatmul.mubr.msk.f32.gmra.mrb[2].mxu1 %vm1141_vm0, %v6236_v27  ;;  %5614 = vmatmul.mubr.msk.f32.vlgmr.msra.gmra.mrb[0].mxu0 %vm1141_vm0, %v6236_v27  ;;  %8099 = vst [vmem:[#allocation3_spill] sm:$0xff] %v6251_v33  ;;  %8100 = vst [vmem:[#allocation4_spill] sm:$0xff] %v6262_v37  ;;  %v322_v47 = vadd.f32 %v6213_v7, %v283_v39  ;;  %v285_v48 = vmul.f32 %v6201_v6, %v246_v41  ;;  %v6331_v12 = vadd.s32 1, %v422_v60  ;;  %v256_v41 = vld [vmem:[%s6208_s10 + $0xa0] sm:$0xff] }
  0x1b   : > { %5662 = vmatpush3.msra.mxu0 %v4983_v4  ;;  %5419 = vmatprep.mubr.msk.f32.mxu1 %vm1141_vm0, %v6238_v28  ;;  %8101 = vst [vmem:[#allocation5_spill] sm:$0xff] %v6277_v43  ;;  %8102 = vst [vmem:[#allocation6_spill] sm:$0xff] %v6285_v46  ;;  %v6296_v52 = vmax.f32 %v321_v44, 0.0  ;;  %v323_v53 = vadd.f32 %v6213_v7, %v284_v45  ;;  %v286_v54 = vmul.f32 %v6201_v6, %v247_v49  ;;  %v251_v4 = vld [vmem:[%s6208_s10 + $0x78] sm:$0xff] }
  0x1c   : > { %5616 = vmatprep.mubr.msk.f32.mxu0 %vm1141_vm0, %v6238_v28  ;;  %5711 = vmatprep.subr.mxu0 %v6258_v36  ;;  %v6304_v55 = vmax.f32 %v322_v47, 0.0  ;;  %v324_v56 = vadd.f32 %v6213_v7, %v285_v48  ;;  %v287_v57 = vmul.f32 %v6201_v6, %v248_v50  ;;  %v288_v63 = vmul.f32 %v6201_v6, %v249_v58  ;;  %v257_v48 = vld [vmem:[%s6208_s10 + $0xa8] sm:$0xff] }
  0x1d   : > { %8103 = vst [vmem:[#allocation7_spill] sm:$0xff] %v6296_v52  ;;  %v6314_v61 = vmax.f32 %v323_v53, 0.0  ;;  %v325_v62 = vadd.f32 %v6213_v7, %v286_v54  ;;  %v289_v0 = vmul.f32 %v6201_v6, %v250_v59  ;;  %8107 = vst [vmem:[#allocation11_spill] sm:$0xff] %v6331_v12  ;;  %v6334_v13 = vadd.s32 40, %v6271_v42 }
  0x1e   : > { %5420 = vmatmul.mubr.msk.f32.gmra.mrb[4].mxu1 %vm1141_vm0, %v6251_v33  ;;  %5617 = vmatmul.mubr.msk.f32.gmra.mrb[2].mxu0 %vm1141_vm0, %v6251_v33  ;;  %8104 = vst [vmem:[#allocation8_spill] sm:$0xff] %v6304_v55  ;;  %v6323_v1 = vmax.f32 %v324_v56, 0.0  ;;  %v326_v3 = vadd.f32 %v6213_v7, %v287_v57  ;;  %v327_v15 = vadd.f32 %v6213_v7, %v288_v63  ;;  %v1748_v23 = vrot.slane %v6236_v27, 1  ;;  %v258_v57 = vld [vmem:[%s6208_s10 + $0xb0] sm:$0xff] }
  0x1f   : > { %5422 = vmatprep.mubr.msk.f32.mxu1 %vm1141_vm0, %v6262_v37  ;;  %5619 = vmatprep.mubr.msk.f32.mxu0 %vm1141_vm0, %v6262_v37  ;;  %8105 = vst [vmem:[#allocation9_spill] sm:$0xff] %v6314_v61  ;;  %v6340_v14 = vmax.f32 %v325_v62, 0.0  ;;  %v328_v16 = vadd.f32 %v6213_v7, %v289_v0  ;;  %v290_v17 = vmul.f32 %v6201_v6, %v251_v4  ;;  %v1750_v24 = vrot.slane %v6238_v28, 1 }
  0x20   : > { %8106 = vst [vmem:[#allocation10_spill] sm:$0xff] %v6323_v1  ;;  %v6349_v18 = vmax.f32 %v326_v3, 0.0  ;;  %v291_v19 = vmul.f32 %v6201_v6, %v252_v8  ;;  %v292_v20 = vmul.f32 %v6201_v6, %v253_v9  ;;  %v293_v21 = vmul.f32 %v6201_v6, %v254_v10  ;;  %v259_v3 = vld [vmem:[%s6208_s10 + $0xb8] sm:$0xff] }
  0x21   : > { %8108 = vst [vmem:[#allocation12_spill] sm:$0xff] %v6340_v14  ;;  %v436_v25 = vand.u32 15, %v382_v11  ;;  %v386_v29 = vadd.s32 56, %v6271_v42  ;;  %v7963_v30 = vrot.slane %v6234_v26, 1  ;;  %v6360_v31 = vadd.s32 72, %v6271_v42 }
  0x22   : > { %5423 = vmatmul.mubr.msk.f32.gmra.mrb[6].mxu1 %vm1141_vm0, %v6277_v43  ;;  %5620 = vmatmul.mubr.msk.f32.gmra.mrb[4].mxu0 %vm1141_vm0, %v6277_v43  ;;  %8109 = vst [vmem:[#allocation13_spill] sm:$0xff] %v6349_v18  ;;  %v6366_v34 = vadd.s32 104, %v6271_v42  ;;  %v6372_v35 = vmax.f32 %v327_v15, 0.0  ;;  %v6374_v38 = vmax.f32 %v328_v16, 0.0  ;;  %v329_v39 = vadd.f32 %v6213_v7, %v290_v17 }
  0x23   : > { %5425 = vmatprep.mubr.msk.f32.mxu1 %vm1141_vm0, %v6285_v46  ;;  %5622 = vmatprep.mubr.msk.f32.mxu0 %vm1141_vm0, %v6285_v46  ;;  %v294_v40 = vmul.f32 %v6201_v6, %v255_v22  ;;  %v330_v44 = vadd.f32 %v6213_v7, %v291_v19  ;;  %v331_v45 = vadd.f32 %v6213_v7, %v292_v20  ;;  %vm1905_vm2 = vcmp.lt.s32.totalorder %v6331_v12, 16  ;;  %v261_v22 = vld [vmem:[%s6208_s10 + $0xc8] sm:$0xff] }
  0x24   : > { %8110 = vst [vmem:[#allocation14_spill] sm:$0xff] %v6372_v35  ;;  %8111 = vst [vmem:[#allocation15_spill] sm:$0xff] %v6374_v38  ;;  %v332_v47 = vadd.f32 %v6213_v7, %v293_v21  ;;  %v6389_v49 = vsel %vm1746_vm1, %v1748_v23, %v1750_v24  ;;  %v1752_v50 = vrot.slane %v6251_v33, 1  ;;  %v1754_v51 = vrot.slane %v6262_v37, 1  ;;  %v260_v21 = vld [vmem:[%s6208_s10 + $0xc0] sm:$0xff] }
  0x25   : > { %8112 = vst [vmem:[#allocation16_spill] sm:$0xff] %v6389_v49  ;;  %v6393_v53 = vadd.s32 1, %v436_v25  ;;  %v295_v54 = vmul.f32 %v6201_v6, %v256_v41  ;;  %v450_v56 = vand.u32 15, %v6334_v13  ;;  %v464_v58 = vand.u32 15, %v386_v29 }
  0x26   : > { %5426 = vmatmul.mubr.msk.f32.gmra.mrb[8].mxu1 %vm1141_vm0, %v6296_v52  ;;  %5623 = vmatmul.mubr.msk.f32.gmra.mrb[6].mxu0 %vm1141_vm0, %v6296_v52  ;;  %v6399_v59 = vadd.s32 120, %v6271_v42  ;;  %v6405_v60 = vmax.f32 %v329_v39, 0.0  ;;  %v6410_v62 = vsel %vm1746_vm1, %v7963_v30, %v1748_v23  ;;  %v333_v63 = vadd.f32 %v6213_v7, %v294_v40  ;;  %v265_v30 = vld [vmem:[%s6208_s10 + $0xe8] sm:$0xff] }
  0x27   : > { %5428 = vmatprep.mubr.msk.f32.mxu1 %vm1141_vm0, %v6304_v55  ;;  %5625 = vmatprep.mubr.msk.f32.mxu0 %vm1141_vm0, %v6304_v55  ;;  %8113 = vst [vmem:[#allocation17_spill] sm:$0xff] %v6393_v53  ;;  %8115 = vst [vmem:[#allocation19_spill] sm:$0xff] %v6410_v62  ;;  %v296_v0 = vmul.f32 %v6201_v6, %v257_v48  ;;  %v6419_v4 = vmax.f32 %v330_v44, 0.0  ;;  %v6421_v8 = vmax.f32 %v331_v45, 0.0  ;;  %v3078_v9 = vsel %vm1905_vm2, %v6389_v49, 0.0 }
  0x28   : > { %8114 = vst [vmem:[#allocation18_spill] sm:$0xff] %v6405_v60  ;;  %v6426_v10 = vmax.f32 %v332_v47, 0.0  ;;  %v6429_v11 = vsel %vm1746_vm1, %v1752_v50, %v1754_v51  ;;  %vm8087_vm3 = vcmp.lt.s32.totalorder %v6393_v53, 16  ;;  %v1756_v13 = vrot.slane %v6277_v43, 1 }
  0x29   : > { %8116 = vst [vmem:[#allocation20_spill] sm:$0xff] %v6419_v4  ;;  %8118 = vst [vmem:[#allocation22_spill] sm:$0xff] %v6429_v11  ;;  %v297_v15 = vmul.f32 %v6201_v6, %v258_v57  ;;  %v334_v16 = vadd.f32 %v6213_v7, %v295_v54  ;;  %v1758_v17 = vrot.slane %v6285_v46, 1  ;;  %v6436_v19 = vadd.s32 1, %v450_v56 }
  0x2a   : > { %5429 = vmatmul.mubr.msk.f32.gmra.mrb[10].mxu1 %vm1141_vm0, %v6314_v61  ;;  %5626 = vmatmul.mubr.msk.f32.gmra.mrb[8].mxu0 %vm1141_vm0, %v6314_v61  ;;  %8117 = vst [vmem:[#allocation21_spill] sm:$0xff] %v6426_v10  ;;  %v298_v20 = vmul.f32 %v6201_v6, %v259_v3  ;;  %v6446_v23 = vsel %vm1746_vm1, %v1750_v24, %v1752_v50  ;;  %v6448_v25 = vmax.f32 %v333_v63, 0.0  ;;  %v1760_v39 = vrot.slane %v6296_v52, 1  ;;  %v262_v3 = vld [vmem:[%s6208_s10 + $0xd0] sm:$0xff] }
  0x2b   : > { %5431 = vmatprep.mubr.msk.f32.mxu1 %vm1141_vm0, %v6323_v1  ;;  %5628 = vmatprep.mubr.msk.f32.mxu0 %vm1141_vm0, %v6323_v1  ;;  %8119 = vst [vmem:[#allocation23_spill] sm:$0xff] %v6436_v19  ;;  %8120 = vst [vmem:[#allocation24_spill] sm:$0xff] %v6446_v23  ;;  %v335_v29 = vadd.f32 %v6213_v7, %v296_v0  ;;  %v3080_v40 = vsel %vm8087_vm3, %v6429_v11, 0.0  ;;  %v1762_v41 = vrot.slane %v6304_v55, 1  ;;  %v6460_v24 = vadd.s32 1, %v464_v58 }
  0x2c   : > { %8121 = vst [vmem:[#allocation25_spill] sm:$0xff] %v6448_v25  ;;  %v478_v44 = vand.u32 15, %v6360_v31  ;;  %v6464_v45 = vsel %vm1746_vm1, %v1754_v51, %v1756_v13  ;;  %v336_v47 = vadd.f32 %v6213_v7, %v297_v15  ;;  %v299_v48 = vmul.f32 %v6201_v6, %v260_v21  ;;  %v6479_v51 = vld [vmem:[%s7960_s3 + $0x38] sm:$0xff] }
  0x2d   : > { %8122 = vst [vmem:[#allocation26_spill] sm:$0xff] %v6460_v24  ;;  %8123 = vst [vmem:[#allocation27_spill] sm:$0xff] %v6464_v45  ;;  %v300_v50 = vmul.f32 %v6201_v6, %v261_v22  ;;  %v6469_v54 = vmax.f32 %v334_v16, 0.0  ;;  %v6472_v56 = vsel %vm1746_vm1, %v1756_v13, %v1758_v17  ;;  %vm8077_vm4 = vcmp.lt.s32.totalorder %v6436_v19, 16  ;;  %v263_v13 = vld [vmem:[%s6208_s10 + $0xd8] sm:$0xff] }
  0x2e   : > { %5432 = vmatmul.mubr.msk.f32.gmra.mrb[12].mxu1 %vm1141_vm0, %v6340_v14  ;;  %5629 = vmatmul.mubr.msk.f32.gmra.mrb[10].mxu0 %vm1141_vm0, %v6340_v14  ;;  %8125 = vst [vmem:[#allocation29_spill] sm:$0xff] %v6472_v56  ;;  %v337_v31 = vadd.f32 %v6213_v7, %v298_v20  ;;  %v6484_v57 = vmax.f32 %v335_v29, 0.0  ;;  %v6487_v58 = vsel %vm1746_vm1, %v1758_v17, %v1760_v39  ;;  %v1764_v63 = vrot.slane %v6314_v61, 1 }
  0x2f   : > { %5434 = vmatprep.mubr.msk.f32.mxu1 %vm1141_vm0, %v6349_v18  ;;  %5631 = vmatprep.mubr.msk.f32.mxu0 %vm1141_vm0, %v6349_v18  ;;  %8124 = vst [vmem:[#allocation28_spill] sm:$0xff] %v6469_v54  ;;  %8127 = vst [vmem:[#allocation31_spill] sm:$0xff] %v6487_v58  ;;  %v1766_v0 = vrot.slane %v6323_v1, 1  ;;  %vm8073_vm5 = vcmp.lt.s32.totalorder %v6460_v24, 16  ;;  %v6500_v15 = vadd.s32 1, %v478_v44  ;;  %v492_v16 = vand.u32 15, %v6363_v32 }
  0x30   : > { %8126 = vst [vmem:[#allocation30_spill] sm:$0xff] %v6484_v57  ;;  %v6508_v17 = vmax.f32 %v336_v47, 0.0  ;;  %v338_v20 = vadd.f32 %v6213_v7, %v299_v48  ;;  %v339_v21 = vadd.f32 %v6213_v7, %v300_v50  ;;  %v6513_v22 = vmax.f32 %v337_v31, 0.0  ;;  %v264_v44 = vld [vmem:[%s6208_s10 + $0xe0] sm:$0xff] }
  0x31   : > { %8129 = vst [vmem:[#allocation33_spill] sm:$0xff] %v6500_v15  ;;  %v301_v29 = vmul.f32 %v6201_v6, %v262_v3  ;;  %v1768_v32 = vrot.slane %v6340_v14, 1  ;;  %v6527_v48 = vsel %vm1746_vm1, %v1762_v41, %v1764_v63  ;;  %v6530_v50 = vsel %vm1746_vm1, %v1764_v63, %v1766_v0 }
  0x32   : > { %5435 = vmatmul.mubr.msk.f32.gmra.mrb[14].mxu1 %vm1141_vm0, %v6372_v35  ;;  %5632 = vmatmul.mubr.msk.f32.gmra.mrb[12].mxu0 %vm1141_vm0, %v6372_v35  ;;  %8130 = vst [vmem:[#allocation34_spill] sm:$0xff] %v6508_v17  ;;  %8131 = vst [vmem:[#allocation35_spill] sm:$0xff] %v6527_v48  ;;  %v1770_v31 = vrot.slane %v6349_v18, 1  ;;  %vm8057_vm6 = vcmp.lt.s32.totalorder %v6500_v15, 16  ;;  %v506_v3 = vand.u32 15, %v6366_v34  ;;  %v6544_v63 = vmax.f32 %v339_v21, 0.0 }
  0x33   : > { %5437 = vmatprep.mubr.msk.f32.mxu1 %vm1141_vm0, %v6374_v38  ;;  %5634 = vmatprep.mubr.msk.f32.mxu0 %vm1141_vm0, %v6374_v38  ;;  %8132 = vst [vmem:[#allocation36_spill] sm:$0xff] %v6530_v50  ;;  %v303_v2 = vmul.f32 %v6201_v6, %v264_v44  ;;  %v340_v24 = vadd.f32 %v6213_v7, %v301_v29  ;;  %v520_v34 = vand.u32 15, %v6399_v59  ;;  %v1772_v21 = vrot.slane %v6372_v35, 1 }
  0x34   : > { %v6570_v59 = vadd.s32 1, %v506_v3  ;;  %v396_v29 = vadd.s32 136, %v6271_v42  ;;  %v1776_v44 = vrot.slane %v6405_v60, 1  ;;  %v383_v3 = vadd.s32 32, %v6271_v42 }
  0x35   : > { %v6577_v15 = vmax.f32 %v340_v24, 0.0  ;;  %v1784_v11 = vrot.slane %v6448_v25, 1  ;;  %v1788_v53 = vrot.slane %v6484_v57, 1  ;;  %v391_v12 = vadd.s32 96, %v6271_v42 }
  0x36   : > { %5438 = vmatmul.mubr.msk.f32.gmra.mrb[16].mxu1 %vm1141_vm0, %v6405_v60  ;;  %5635 = vmatmul.mubr.msk.f32.gmra.mrb[14].mxu0 %vm1141_vm0, %v6405_v60  ;;  %8136 = vst [vmem:[#allocation40_spill] sm:$0xff] %v6570_v59  ;;  %vm8052_vm9 = vcmp.lt.s32.totalorder %v6570_v59, 16  ;;  %v443_v19 = vand.u32 15, %v383_v3  ;;  %v829_v59 = vrot.slane %v6238_v28, 7 }
  0x37   : > { %5440 = vmatprep.mubr.msk.f32.mxu1 %vm1141_vm0, %v6419_v4  ;;  %5663 = vmatprep.mubr.msk.f32.mxu0 %vm1141_vm0, %v6410_v62 }
  0x3a   : > { %5441 = vmatmul.mubr.msk.f32.gmra.mrb[18].mxu1 %vm1141_vm0, %v6421_v8  ;;  %5664 = vmatmul.mubr.msk.f32.vlgmr.msra.gmra.mrb[0].mxu0 %vm1141_vm0, %v3078_v9  ;;  %v6497_v9 = vsel %vm1746_vm1, %v1760_v39, %v1762_v41  ;;  %v302_v39 = vmul.f32 %v6201_v6, %v263_v13  ;;  %v381_v41 = vadd.s32 16, %v6271_v42  ;;  %v6542_v13 = vmax.f32 %v338_v20, 0.0 }
  0x3b   : > { %5712 = vmatpush3.msra.mxu0 %v6258_v36  ;;  %5443 = vmatprep.mubr.msk.f32.mxu1 %vm1141_vm0, %v6426_v10  ;;  %8128 = vst [vmem:[#allocation32_spill] sm:$0xff] %v6497_v9  ;;  %v3082_v36 = vsel %vm8077_vm4, %v6472_v56, 0.0  ;;  %v3084_v47 = vsel %vm8073_vm5, %v6497_v9, 0.0  ;;  %v304_v9 = vmul.f32 %v6201_v6, %v265_v30  ;;  %v6550_v56 = vsel %vm1746_vm1, %v1766_v0, %v1768_v32 }
  0x3c   : > { %5666 = vmatprep.mubr.msk.f32.mxu0 %vm1141_vm0, %v6446_v23  ;;  %5761 = vmatprep.subr.mxu0 %v6479_v51  ;;  %8134 = vst [vmem:[#allocation38_spill] sm:$0xff] %v6550_v56  ;;  %v3086_v20 = vsel %vm8057_vm6, %v6530_v50, 0.0  ;;  %v6561_v30 = vsel %vm1746_vm1, %v1768_v32, %v1770_v31  ;;  %v1774_v0 = vrot.slane %v6374_v38, 1  ;;  %v342_v32 = vadd.f32 %v6213_v7, %v303_v2 }
  0x3d   : > { %8135 = vst [vmem:[#allocation39_spill] sm:$0xff] %v6561_v30  ;;  %v1778_v50 = vrot.slane %v6419_v4, 1  ;;  %v6648_v23 = vadd.s32 4294967295, %v443_v19  ;;  %v1786_v19 = vrot.slane %v6469_v54, 1 }
  0x3e   : > { %5444 = vmatmul.mubr.msk.f32.gmra.mrb[20].mxu1 %vm1141_vm0, %v6448_v25  ;;  %5667 = vmatmul.mubr.msk.f32.gmra.mrb[2].mxu0 %vm1141_vm0, %v3080_v40  ;;  %v6538_v40 = vadd.s32 1, %v492_v16  ;;  %v341_v16 = vadd.f32 %v6213_v7, %v302_v39  ;;  %v343_v39 = vadd.f32 %v6213_v7, %v304_v9  ;;  %v6591_v9 = vsel %vm1746_vm1, %v1770_v31, %v1772_v21 }
  0x3f   : > { %5446 = vmatprep.mubr.msk.f32.mxu1 %vm1141_vm0, %v6469_v54  ;;  %5669 = vmatprep.mubr.msk.f32.mxu0 %vm1141_vm0, %v6464_v45  ;;  %8138 = vst [vmem:[#allocation42_spill] sm:$0xff] %v6591_v9  ;;  %v6594_v24 = vsel %vm1746_vm1, %v1772_v21, %v1774_v0  ;;  %v6605_v31 = vmax.f32 %v342_v32, 0.0  ;;  %v6610_v21 = vsel %vm1746_vm1, %v1776_v44, %v1778_v50  ;;  %vm952_vm13 = vcmp.ge.s32.totalorder %v6648_v23, 0 }
  0x40   : > { %8133 = vst [vmem:[#allocation37_spill] sm:$0xff] %v6538_v40  ;;  %vm8056_vm8 = vcmp.lt.s32.totalorder %v6538_v40, 16  ;;  %v6579_v45 = vmax.f32 %v341_v16, 0.0  ;;  %8139 = vst [vmem:[#allocation43_spill] sm:$0xff] %v6594_v24  ;;  %v534_v16 = vand.u32 15, %v396_v29  ;;  %v1780_v40 = vrot.slane %v6421_v8, 1 }
  0x41   : > { %v3088_v2 = vsel %vm8056_vm8, %v6561_v30, 0.0  ;;  %v6607_v30 = vmax.f32 %v343_v39, 0.0  ;;  %8140 = vst [vmem:[#allocation44_spill] sm:$0xff] %v6610_v21  ;;  %v3090_v29 = vsel %vm8052_vm9, %v6594_v24, 0.0  ;;  %v6623_v32 = vsel %vm1746_vm1, %v1774_v0, %v1776_v44 }
  0x42   : > { %5447 = vmatmul.mubr.msk.f32.gmra.mrb[22].mxu1 %vm1141_vm0, %v6484_v57  ;;  %5670 = vmatmul.mubr.msk.f32.gmra.mrb[4].mxu0 %vm1141_vm0, %v3082_v36  ;;  %v429_v36 = vand.u32 15, %v381_v41  ;;  %v826_v41 = vrot.slane %v6234_v26, 7  ;;  %8141 = vst [vmem:[#allocation45_spill] sm:$0xff] %v6623_v32  ;;  %v400_v24 = vadd.s32 168, %v6271_v42  ;;  %v6641_v44 = vsel %vm1746_vm1, %v1778_v50, %v1780_v40 }
  0x43   : > { %5449 = vmatprep.mubr.msk.f32.mxu1 %vm1141_vm0, %v6508_v17  ;;  %5672 = vmatprep.mubr.msk.f32.mxu0 %vm1141_vm0, %v6487_v58  ;;  %v6581_v58 = vadd.s32 1, %v520_v34  ;;  %v398_v34 = vadd.s32 152, %v6271_v42  ;;  %8143 = vst [vmem:[#allocation47_spill] sm:$0xff] %v6641_v44  ;;  %v871_v23 = vrot.slane %v6513_v22, 7 }
  0x44   : > { %v6626_v39 = vsel %vm825_vm7, 0.0, %v826_v41 }
  0x45   : > { %8137 = vst [vmem:[#allocation41_spill] sm:$0xff] %v6581_v58  ;;  %vm8031_vm10 = vcmp.lt.s32.totalorder %v6581_v58, 16  ;;  %v548_v3 = vand.u32 15, %v398_v34  ;;  %v387_v34 = vadd.s32 64, %v6271_v42  ;;  %v833_v58 = vrot.slane %v6262_v37, 7 }
  0x46   : > { %5450 = vmatmul.mubr.msk.f32.gmra.mrb[24].mxu1 %vm1141_vm0, %v6513_v22  ;;  %5673 = vmatmul.mubr.msk.f32.gmra.mrb[6].mxu0 %vm1141_vm0, %v3084_v47  ;;  %v6602_v47 = vadd.s32 4294967295, %v429_v36  ;;  %v385_v36 = vadd.s32 48, %v6271_v42  ;;  %v3092_v0 = vsel %vm8031_vm10, %v6610_v21, 0.0  ;;  %v402_v21 = vadd.s32 184, %v6271_v42 }
  0x47   : > { %5452 = vmatprep.mubr.msk.f32.mxu1 %vm1141_vm0, %v6542_v13  ;;  %5675 = vmatprep.mubr.msk.f32.mxu0 %vm1141_vm0, %v6527_v48  ;;  %v827_v48 = vrot.slane %v6236_v27, 7  ;;  %v1782_v27 = vrot.slane %v6426_v10, 1  ;;  %v471_v49 = vand.u32 15, %v387_v34  ;;  %v8149_v34 = vmov 0.0  }
  0x48   : > { %vm950_vm11 = vcmp.ge.s32.totalorder %v6602_v47, 0 }
  0x49   : > { %v1108_v50 = vsel %vm950_vm11, %v6626_v39, 0.0  ;;  %v6658_v28 = vsel %vm1746_vm1, %v1780_v40, %v1782_v27  ;;  %v6671_v40 = vsel %vm825_vm7, %v827_v48, %v829_v59 }
  0x4a   : > { %5453 = vmatmul.mubr.msk.f32.gmra.mrb[26].mxu1 %vm1141_vm0, %v6544_v63  ;;  %5676 = vmatmul.mubr.msk.f32.gmra.mrb[8].mxu0 %vm1141_vm0, %v3086_v20  ;;  %v6634_v20 = vadd.s32 1, %v534_v16  ;;  %v457_v16 = vand.u32 15, %v385_v36  ;;  %8145 = vst [vmem:[#allocation49_spill] sm:$0xff] %v6658_v28  ;;  %v562_v36 = vand.u32 15, %v400_v24 }
  0x4b   : > { %5455 = vmatprep.mubr.msk.f32.mxu1 %vm1141_vm0, %v6577_v15  ;;  %5678 = vmatprep.mubr.msk.f32.mxu0 %vm1141_vm0, %v6550_v56  ;;  %v6646_v56 = vsel %vm825_vm7, %v826_v41, %v827_v48  ;;  %v831_v41 = vrot.slane %v6251_v33, 7  ;;  %v6674_v33 = vsel %vm1746_vm1, %v1782_v27, %v1784_v11  ;;  %v6692_v27 = vsel %vm1746_vm1, %v1784_v11, %v1786_v19 }
  0x4c   : > { %8142 = vst [vmem:[#allocation46_spill] sm:$0xff] %v6634_v20  ;;  %8144 = vst [vmem:[#allocation48_spill] sm:$0xff] %v6646_v56  ;;  %vm8025_vm12 = vcmp.lt.s32.totalorder %v6634_v20, 16  ;;  %v6700_v37 = vadd.s32 1, %v562_v36  ;;  %v837_v20 = vrot.slane %v6285_v46, 7  ;;  %v404_v36 = vadd.s32 200, %v6271_v42 }
  0x4d   : > { %8147 = vst [vmem:[#allocation51_spill] sm:$0xff] %v6674_v33  ;;  %v3094_v48 = vsel %vm8025_vm12, %v6658_v28, 0.0  ;;  %v6689_v24 = vsel %vm825_vm7, %v829_v59, %v831_v41  ;;  %8148 = vst [vmem:[#allocation52_spill] sm:$0xff] %v6692_v27  ;;  %v576_v28 = vand.u32 15, %v402_v21  ;;  %v1110_v59 = vsel %vm952_vm13, %v6671_v40, 0.0 }
  0x4e   : > { %5456 = vmatmul.mubr.msk.f32.gmra.mrb[28].mxu1 %vm1141_vm0, %v6579_v45  ;;  %5679 = vmatmul.mubr.msk.f32.gmra.mrb[10].mxu0 %vm1141_vm0, %v3088_v2  ;;  %v6667_v2 = vadd.s32 1, %v548_v3  ;;  %v389_v3 = vadd.s32 80, %v6271_v42  ;;  %8150 = vst [vmem:[#allocation53_spill] sm:$0xff] %v6700_v37  ;;  %v6706_v11 = vsel %vm825_vm7, %v831_v41, %v833_v58 }
  0x4f   : > { %5458 = vmatprep.mubr.msk.f32.mxu1 %vm1141_vm0, %v6605_v31  ;;  %5681 = vmatprep.mubr.msk.f32.mxu0 %vm1141_vm0, %v6591_v9  ;;  %v6679_v9 = vadd.s32 4294967295, %v457_v16  ;;  %v835_v16 = vrot.slane %v6277_v43, 7  ;;  %v6709_v43 = vsel %vm1746_vm1, %v1786_v19, %v1788_v53  ;;  %v1792_v19 = vrot.slane %v6513_v22, 1 }
  0x50   : > { %8146 = vst [vmem:[#allocation50_spill] sm:$0xff] %v6667_v2  ;;  %vm8018_vm14 = vcmp.lt.s32.totalorder %v6667_v2, 16  ;;  %8151 = vst [vmem:[#allocation54_spill] sm:$0xff] %v6709_v43  ;;  %v485_v62 = vand.u32 15, %v389_v3  ;;  %v6729_v3 = vld [vmem:[%s7960_s3 + $0x18] sm:$0xff]  ;;  %v6739_v46 = vadd.s32 1, %v576_v28 }
  0x51   : > { %vm954_vm15 = vcmp.ge.s32.totalorder %v6679_v9, 0  ;;  %v3096_v21 = vsel %vm8018_vm14, %v6692_v27, 0.0  ;;  %v6722_v41 = vsel %vm825_vm7, %v833_v58, %v835_v16  ;;  %8152 = vst [vmem:[#allocation55_spill] sm:$0xff] %v6729_v3  ;;  %vm8035_vm14 = vcmp.lt.s32.totalorder %v6700_v37, 16  ;;  %v266_v2 = vld [vmem:[%s6208_s10 + $0xf0] sm:$0xff] }
  0x52   : > { %5459 = vmatmul.mubr.msk.f32.gmra.mrb[30].mxu1 %vm1141_vm0, %v6607_v30  ;;  %5682 = vmatmul.mubr.msk.f32.gmra.mrb[12].mxu0 %vm1141_vm0, %v3090_v29  ;;  %v1790_v29 = vrot.slane %v6508_v17, 1  ;;  %v1794_v58 = vrot.slane %v6542_v13, 1  ;;  %8154 = vst [vmem:[#allocation57_spill] sm:$0xff] %v6739_v46  ;;  %v841_v27 = vrot.slane %v6304_v55, 7  ;;  %v590_v28 = vand.u32 15, %v404_v36 }
  0x53   : > { %5463 = vmatprep.mubr.f32.mxu1 %v8149_v34  ;;  %5684 = vmatprep.mubr.msk.f32.mxu0 %vm1141_vm0, %v6623_v32  ;;  %v6713_v32 = vadd.s32 4294967295, %v471_v49  ;;  %v839_v49 = vrot.slane %v6296_v52, 7  ;;  %v1112_v52 = vsel %vm954_vm15, %v6706_v11, 0.0  ;;  %v406_v36 = vadd.s32 216, %v6271_v42 }
  0x54   : > { %vm8047_vm10 = vcmp.lt.s32.totalorder %v6739_v46, 16  ;;  %v6790_v37 = vadd.s32 1, %v590_v28  ;;  %v875_v9 = vrot.slane %v6544_v63, 7 }
  0x55   : > { %vm956_vm12 = vcmp.ge.s32.totalorder %v6713_v32, 0  ;;  %v6782_v55 = vsel %vm825_vm7, %v839_v49, %v841_v27 }
  0x56   : > { %5464 = vmatmul.mubr.f32.vlgmr.msra.gmra.mrb[0].mxu1 %v8149_v34  ;;  %5685 = vmatmul.mubr.msk.f32.gmra.mrb[14].mxu0 %vm1141_vm0, %v3092_v0  ;;  %v6735_v0 = vsel %vm1746_vm1, %v1788_v53, %v1790_v29  ;;  %v1796_v53 = vrot.slane %v6544_v63, 1  ;;  %8158 = vst [vmem:[#allocation61_spill] sm:$0xff] %v6790_v37  ;;  %v7018_v47 = vsel %vm956_vm12, %v6782_v55, 0.0 }
  0x57   : > { %5466 = vmatprep.mubr.msk.f32.mxu1 %vm1141_vm0, %v1108_v50  ;;  %5687 = vmatprep.mubr.msk.f32.mxu0 %vm1141_vm0, %v6641_v44  ;;  %8153 = vst [vmem:[#allocation56_spill] sm:$0xff] %v6735_v0  ;;  %v6746_v50 = vsel %vm825_vm7, %v835_v16, %v837_v20  ;;  %v6752_v44 = vadd.s32 4294967295, %v485_v62  ;;  %v6763_v16 = vsel %vm1746_vm1, %v1790_v29, %v1792_v19 }
  0x58   : > { %5512 = vmatpush3.msra.mxu1 %v6195_v5  ;;  %v3098_v5 = vsel %vm8035_vm14, %v6735_v0, 0.0  ;;  %8155 = vst [vmem:[#allocation58_spill] sm:$0xff] %v6763_v16  ;;  %v6766_v62 = vsel %vm825_vm7, %v837_v20, %v839_v49  ;;  %v305_v29 = vmul.f32 %v6201_v6, %v266_v2  ;;  %v1114_v20 = vsel %vm956_vm12, %v6746_v50, 0.0 }
  0x59   : > { %5561 = vmatprep.subr.mxu1 %v6729_v3  ;;  %v1798_v0 = vrot.slane %v6577_v15, 1  ;;  %vm958_vm14 = vcmp.ge.s32.totalorder %v6752_v44, 0  ;;  %v393_v2 = vadd.s32 112, %v6271_v42  ;;  %v408_v3 = vadd.s32 232, %v6271_v42 }
  0x5a   : > { %5467 = vmatmul.mubr.msk.f32.gmra.mrb[2].mxu1 %vm1141_vm0, %v6646_v56  ;;  %5688 = vmatmul.mubr.msk.f32.gmra.mrb[16].mxu0 %vm1141_vm0, %v3094_v48  ;;  %v6773_v56 = vsel %vm1746_vm1, %v1792_v19, %v1794_v58  ;;  %v843_v48 = vrot.slane %v6314_v61, 7  ;;  %v267_v19 = vld [vmem:[%s6208_s10 + $0xf8] sm:$0xff]  ;;  %v499_v61 = vand.u32 15, %v391_v12  ;;  %v344_v28 = vadd.f32 %v6213_v7, %v305_v29 }
  0x5b   : > { %5469 = vmatprep.mubr.msk.f32.mxu1 %vm1141_vm0, %v1110_v59  ;;  %5690 = vmatprep.mubr.msk.f32.mxu0 %vm1141_vm0, %v6674_v33  ;;  %8156 = vst [vmem:[#allocation59_spill] sm:$0xff] %v6773_v56  ;;  %v6785_v59 = vsel %vm1746_vm1, %v1794_v58, %v1796_v53  ;;  %v3100_v49 = vsel %vm8047_vm10, %v6773_v56, 0.0  ;;  %v845_v58 = vrot.slane %v6323_v1, 7  ;;  %v604_v33 = vand.u32 15, %v406_v36 }
  0x5c   : > { %8157 = vst [vmem:[#allocation60_spill] sm:$0xff] %v6785_v59  ;;  %v6805_v12 = vsel %vm825_vm7, %v841_v27, %v843_v48  ;;  %v306_v46 = vmul.f32 %v6201_v6, %v267_v19  ;;  %v1116_v36 = vsel %vm958_vm14, %v6782_v55, 0.0  ;;  %v6814_v1 = vsel %vm1746_vm1, %v1796_v53, %v1798_v0 }
  0x5d   : > { %8159 = vst [vmem:[#allocation62_spill] sm:$0xff] %v6814_v1  ;;  %v847_v56 = vrot.slane %v6340_v14, 7  ;;  %vm8053_vm10 = vcmp.lt.s32.totalorder %v6790_v37, 16  ;;  %v6819_v27 = vadd.s32 4294967295, %v499_v61  ;;  %v1802_v29 = vrot.slane %v6605_v31, 1 }
  0x5e   : > { %5470 = vmatmul.mubr.msk.f32.gmra.mrb[4].mxu1 %vm1141_vm0, %v6689_v24  ;;  %5691 = vmatmul.mubr.msk.f32.gmra.mrb[18].mxu0 %vm1141_vm0, %v3096_v21  ;;  %v395_v21 = vadd.s32 128, %v6271_v42  ;;  %v6826_v6 = vsel %vm825_vm7, %v843_v48, %v845_v58  ;;  %v6828_v53 = vadd.s32 1, %v604_v33  ;;  %v618_v19 = vand.u32 15, %v408_v3 }
  0x5f   : > { %5472 = vmatprep.mubr.msk.f32.mxu1 %vm1141_vm0, %v1112_v52  ;;  %5693 = vmatprep.mubr.msk.f32.mxu0 %vm1141_vm0, %v6709_v43  ;;  %v1800_v52 = vrot.slane %v6579_v45, 1  ;;  %v513_v43 = vand.u32 15, %v393_v2  ;;  %v410_v14 = vadd.s32 248, %v6271_v42  ;;  %v849_v61 = vrot.slane %v6349_v18, 7 }
  0x60   : > { %8160 = vst [vmem:[#allocation63_spill] sm:$0xff] %v6828_v53  ;;  %v6835_v2 = vmax.f32 %v344_v28, 0.0  ;;  %v527_v34 = vand.u32 15, %v395_v21  ;;  %v3102_v33 = vsel %vm8053_vm10, %v6814_v1, 0.0  ;;  %v6845_v48 = vsel %vm825_vm7, %v845_v58, %v847_v56 }
  0x61   : > { %v6842_v3 = vsel %vm1746_vm1, %v1798_v0, %v1800_v52  ;;  %vm960_vm9 = vcmp.ge.s32.totalorder %v6819_v27, 0  ;;  %v6850_v28 = vsel %vm1746_vm1, %v1800_v52, %v1802_v29  ;;  %v6852_v21 = vadd.s32 4294967295, %v513_v43 }
  0x62   : > { %5473 = vmatmul.mubr.msk.f32.gmra.mrb[6].mxu1 %vm1141_vm0, %v6722_v41  ;;  %5694 = vmatmul.mubr.msk.f32.gmra.mrb[20].mxu0 %vm1141_vm0, %v3098_v5  ;;  %v345_v5 = vadd.f32 %v6213_v7, %v306_v46  ;;  %8161 = vst [vmem:[#allocation64_spill] sm:$0xff] %v6842_v3  ;;  %8162 = vst [vmem:[#allocation65_spill] sm:$0xff] %v6850_v28  ;;  %v1804_v7 = vrot.slane %v6607_v30, 1  ;;  %vm8061_vm10 = vcmp.lt.s32.totalorder %v6828_v53, 16  ;;  %v6859_v46 = vadd.s32 1, %v618_v19 }
  0x63   : > { %5475 = vmatprep.mubr.msk.f32.mxu1 %vm1141_vm0, %v1114_v20  ;;  %5696 = vmatprep.mubr.msk.f32.mxu0 %vm1141_vm0, %v6763_v16  ;;  %v397_v20 = vadd.s32 144, %v6271_v42  ;;  %v853_v0 = vrot.slane %v6374_v38, 7  ;;  %v632_v58 = vand.u32 15, %v410_v14  ;;  %v6866_v43 = vsel %vm825_vm7, %v847_v56, %v849_v61 }
  0x64   : > { %v1806_v52 = vrot.slane %v6835_v2, 1  ;;  %v6869_v18 = vadd.s32 4294967295, %v527_v34  ;;  %v1118_v19 = vsel %vm960_vm9, %v6826_v6, 0.0  ;;  %v851_v14 = vrot.slane %v6372_v35, 7 }
  0x65   : > { %v541_v38 = vand.u32 15, %v397_v20  ;;  %v3104_v56 = vsel %vm8061_vm10, %v6850_v28, 0.0  ;;  %vm962_vm8 = vcmp.ge.s32.totalorder %v6852_v21, 0  ;;  %v6883_v34 = vsel %vm1746_vm1, %v1802_v29, %v1804_v7 }
  0x66   : > { %5476 = vmatmul.mubr.msk.f32.gmra.mrb[8].mxu1 %vm1141_vm0, %v6766_v62  ;;  %5697 = vmatmul.mubr.msk.f32.gmra.mrb[22].mxu0 %vm1141_vm0, %v3100_v49  ;;  %v6871_v49 = vmax.f32 %v345_v5, 0.0  ;;  %v415_v5 = vand.u32 15, %v6271_v42  ;;  %vm8074_vm6 = vcmp.lt.s32.totalorder %v6859_v46, 16  ;;  %v6891_v20 = vsel %vm825_vm7, %v851_v14, %v853_v0 }
  0x67   : > { %5478 = vmatprep.mubr.msk.f32.mxu1 %vm1141_vm0, %v1116_v36  ;;  %5699 = vmatprep.mubr.msk.f32.mxu0 %vm1141_vm0, %v6785_v59  ;;  %v399_v36 = vadd.s32 160, %v6271_v42  ;;  %v6893_v35 = vadd.s32 1, %v632_v58  ;;  %v857_v28 = vrot.slane %v6419_v4, 7  ;;  %v6900_v29 = vsel %vm1746_vm1, %v1804_v7, %v1806_v52 }
  0x68   : > { %8163 = vst [vmem:[#allocation66_spill] sm:$0xff] %v6900_v29  ;;  %vm964_vm10 = vcmp.ge.s32.totalorder %v6869_v18, 0  ;;  %v401_v53 = vadd.s32 176, %v6271_v42  ;;  %v1120_v58 = vsel %vm962_vm8, %v6866_v43, 0.0  ;;  %v855_v4 = vrot.slane %v6405_v60, 7 }
  0x69   : > { %v6909_v1 = vadd.s32 4294967295, %v541_v38  ;;  %v916_v59 = vadd.s32 4294967295, %v415_v5  ;;  %v6915_v7 = vsel %vm825_vm7, %v849_v61, %v851_v14  ;;  %v1122_v60 = vsel %vm964_vm10, %v6891_v20, 0.0 }
  0x6a   : > { %5479 = vmatmul.mubr.msk.f32.gmra.mrb[10].mxu1 %vm1141_vm0, %v6805_v12  ;;  %5700 = vmatmul.mubr.msk.f32.gmra.mrb[24].mxu0 %vm1141_vm0, %v3102_v33  ;;  %v3072_v33 = vrot.slane %v6871_v49, 1  ;;  %v6924_v38 = vsel %vm825_vm7, %v855_v4, %v857_v28  ;;  %vm8079_vm5 = vcmp.lt.s32.totalorder %v6893_v35, 16  ;;  %v569_v14 = vand.u32 15, %v401_v53 }
  0x6b   : > { %5481 = vmatprep.mubr.msk.f32.mxu1 %vm1141_vm0, %v1118_v19  ;;  %5702 = vmatprep.mubr.msk.f32.mxu0 %vm1141_vm0, %v6842_v3  ;;  %v555_v19 = vand.u32 15, %v399_v36  ;;  %v3106_v3 = vsel %vm8074_vm6, %v6900_v29, 0.0  ;;  %v403_v36 = vadd.s32 192, %v6271_v42  ;;  %vm966_vm6 = vcmp.ge.s32.totalorder %v6909_v1, 0  ;;  %v8188_v1 = vld [vmem:[#allocation23_spill] sm:$0xff] }
  0x6c   : > { %v6931_v61 = vsel %vm1746_vm1, %v3072_v33, 0.0  ;;  %v861_v5 = vrot.slane %v6426_v10, 7  ;;  %vm948_vm4 = vcmp.ge.s32.totalorder %v916_v59, 0  ;;  %v869_v10 = vrot.slane %v6508_v17, 7 }
  0x6d   : > { %8164 = vst [vmem:[#allocation67_spill] sm:$0xff] %v6931_v61  ;;  %v6939_v29 = vadd.s32 4294967295, %v555_v19  ;;  %v3108_v53 = vsel %vm8079_vm5, %v6931_v61, 0.0  ;;  %v6958_v19 = vadd.s32 4294967295, %v569_v14  ;;  %v6993_v17 = vsel %vm948_vm4, %v6626_v39, 0.0 }
  0x6e   : > { %5482 = vmatmul.mubr.msk.f32.gmra.mrb[12].mxu1 %vm1141_vm0, %v6845_v48  ;;  %5703 = vmatmul.mubr.msk.f32.gmra.mrb[26].mxu0 %vm1141_vm0, %v3104_v56  ;;  %v6935_v56 = vsel %vm1746_vm1, %v1806_v52, %v3072_v33  ;;  %v859_v52 = vrot.slane %v6421_v8, 7  ;;  %v1124_v33 = vsel %vm966_vm6, %v6924_v38, 0.0  ;;  %v7013_v39 = vsel %vm954_vm15, %v6746_v50, 0.0 }
  0x6f   : > { %5484 = vmatprep.mubr.msk.f32.mxu1 %vm1141_vm0, %v1120_v58  ;;  %5705 = vmatprep.mubr.msk.f32.mxu0 %vm1141_vm0, %v6883_v34  ;;  %8165 = vst [vmem:[#allocation68_spill] sm:$0xff] %v6935_v56  ;;  %v6945_v58 = vsel %vm825_vm7, %v853_v0, %v855_v4  ;;  %v583_v4 = vand.u32 15, %v403_v36  ;;  %v3466_v0 = vsel %vm948_vm4, %v6671_v40, 0.0  ;;  %vm968_vm5 = vcmp.ge.s32.totalorder %v6939_v29, 0  ;;  %v8194_v29 = vld [vmem:[#allocation31_spill] sm:$0xff] }
  0x70   : > { %v6963_v61 = vsel %vm825_vm7, %v859_v52, %v861_v5  ;;  %v6972_v14 = vsel %vm825_vm7, %v857_v28, %v859_v52  ;;  %v3468_v36 = vsel %vm950_vm11, %v6706_v11, 0.0  ;;  %vm970_vm3 = vcmp.ge.s32.totalorder %v6958_v19, 0  ;;  %v8198_v19 = vld [vmem:[#allocation35_spill] sm:$0xff] }
  0x71   : > { %v6988_v28 = vadd.s32 4294967295, %v583_v4  ;;  %v7008_v4 = vsel %vm952_vm13, %v6706_v11, 0.0  ;;  %v7032_v11 = vsel %vm960_vm9, %v6866_v43, 0.0  ;;  %v7037_v59 = vsel %vm962_vm8, %v6891_v20, 0.0 }
  0x72   : > { %5485 = vmatmul.mubr.msk.f32.gmra.mrb[14].mxu1 %vm1141_vm0, %v6915_v7  ;;  %5706 = vmatmul.mubr.msk.f32.gmra.mrb[28].mxu0 %vm1141_vm0, %v3106_v3  ;;  %v865_v3 = vrot.slane %v6469_v54, 7  ;;  %v867_v54 = vrot.slane %v6484_v57, 7  ;;  %v407_v57 = vadd.s32 224, %v6271_v42  ;;  %8167 = vst [vmem:[#allocation70_spill] sm:$0xff] %v7032_v11  ;;  %8168 = vst [vmem:[#allocation71_spill] sm:$0xff] %v7037_v59  ;;  %v3482_v21 = vsel %vm964_vm10, %v6963_v61, 0.0 }
  0x73   : > { %5487 = vmatprep.mubr.msk.f32.mxu1 %vm1141_vm0, %v1122_v60  ;;  %5708 = vmatprep.mubr.msk.f32.mxu0 %vm1141_vm0, %v6935_v56  ;;  %v405_v60 = vadd.s32 208, %v6271_v42  ;;  %v863_v56 = vrot.slane %v6448_v25, 7  ;;  %v1126_v25 = vsel %vm968_vm5, %v6963_v61, 0.0  ;;  %vm972_vm4 = vcmp.ge.s32.totalorder %v6988_v28, 0  ;;  %v8202_v28 = vld [vmem:[#allocation38_spill] sm:$0xff] }
  0x75   : > { %v597_v52 = vand.u32 15, %v405_v60  ;;  %v7042_v60 = vsel %vm964_vm10, %v6924_v38, 0.0  ;;  %v7052_v11 = vsel %vm825_vm7, %v861_v5, %v863_v56 }
  0x76   : > { %5488 = vmatmul.mubr.msk.f32.gmra.mrb[16].mxu1 %vm1141_vm0, %v6945_v58  ;;  %5709 = vmatmul.mubr.msk.f32.gmra.mrb[30].mxu0 %vm1141_vm0, %v3108_v53  ;;  %v6985_v53 = vsel %vm825_vm7, %v863_v56, %v865_v3  ;;  %8169 = vst [vmem:[#allocation72_spill] sm:$0xff] %v7042_v60  ;;  %v873_v56 = vrot.slane %v6542_v13, 7 }
  0x77   : > { %5490 = vmatprep.mubr.msk.f32.mxu1 %vm1141_vm0, %v1124_v33  ;;  %5713 = vmatprep.mubr.msk.f32.mxu0 %vm1141_vm0, %v3466_v0  ;;  %v6998_v33 = vsel %vm950_vm11, %v6671_v40, 0.0  ;;  %v7003_v0 = vld [vmem:[%s7960_s3 + $0x40] sm:$0xff]  ;;  %v7023_v40 = vsel %vm958_vm14, %v6826_v6, 0.0  ;;  %v7057_v59 = vsel %vm968_vm5, %v6985_v53, 0.0  ;;  %v1128_v60 = vsel %vm970_vm3, %v6985_v53, 0.0 }
  0x78   : > { %8166 = vst [vmem:[#allocation69_spill] sm:$0xff] %v7023_v40  ;;  %v7047_v40 = vsel %vm966_vm6, %v6963_v61, 0.0  ;;  %8171 = vst [vmem:[#allocation74_spill] sm:$0xff] %v7057_v59  ;;  %v7072_v5 = vadd.s32 4294967295, %v597_v52  ;;  %v409_v59 = vadd.s32 240, %v6271_v42  ;;  %v3472_v52 = vsel %vm954_vm15, %v6782_v55, 0.0 }
  0x79   : > { %8170 = vst [vmem:[#allocation73_spill] sm:$0xff] %v7047_v40  ;;  %v7097_v40 = vsel %vm825_vm7, %v871_v23, %v873_v56  ;;  %v7143_v32 = vsel %vm825_vm7, %v873_v56, %v875_v9  ;;  %v3484_v18 = vsel %vm966_vm6, %v6985_v53, 0.0  ;;  %v7223_v61 = vld [vmem:[%s7960_s3 + $0x20] sm:$0xff]  ;;  %vm8189_vm6 = vcmp.lt.s32.totalorder %v8188_v1, 16 }
  0x7a   : > { %5491 = vmatmul.mubr.msk.f32.gmra.mrb[18].mxu1 %vm1141_vm0, %v6972_v14  ;;  %5714 = vmatmul.mubr.msk.f32.vlgmr.msra.gmra.mrb[0].mxu0 %vm1141_vm0, %v6689_v24  ;;  %vm974_vm11 = vcmp.ge.s32.totalorder %v7072_v5, 0  ;;  %v7110_v55 = vsel %vm972_vm4, %v7097_v40, 0.0 }
  0x7b   : > { %5762 = vmatpush3.msra.mxu0 %v6479_v51  ;;  %5493 = vmatprep.mubr.msk.f32.mxu1 %vm1141_vm0, %v1126_v25  ;;  %v3470_v51 = vsel %vm952_vm13, %v6746_v50, 0.0  ;;  %v7067_v25 = vsel %vm825_vm7, %v867_v54, %v869_v10  ;;  %8173 = vst [vmem:[#allocation76_spill] sm:$0xff] %v7110_v55 }
  0x7c   : > { %5716 = vmatprep.mubr.msk.f32.mxu0 %vm1141_vm0, %v3468_v36  ;;  %5811 = vmatprep.subr.mxu0 %v7003_v0  ;;  %v611_v36 = vand.u32 15, %v407_v57  ;;  %v7083_v50 = vsel %vm970_vm3, %v7067_v25, 0.0  ;;  %v7088_v57 = vsel %vm825_vm7, %v865_v3, %v867_v54  ;;  %v1130_v42 = vsel %vm972_vm4, %v7067_v25, 0.0 }
  0x7d   : > { %8172 = vst [vmem:[#allocation75_spill] sm:$0xff] %v7083_v50  ;;  %v7115_v54 = vsel %vm825_vm7, %v869_v10, %v871_v23  ;;  %v1132_v3 = vsel %vm974_vm11, %v7097_v40, 0.0 }
  0x7e   : > { %5494 = vmatmul.mubr.msk.f32.gmra.mrb[20].mxu1 %vm1141_vm0, %v7052_v11  ;;  %5717 = vmatmul.mubr.msk.f32.gmra.mrb[2].mxu0 %vm1141_vm0, %v6722_v41  ;;  %v7101_v50 = vadd.s32 4294967295, %v611_v36 }
  0x7f   : > { %5496 = vmatprep.mubr.msk.f32.mxu1 %vm1141_vm0, %v1128_v60  ;;  %5719 = vmatprep.mubr.msk.f32.mxu0 %vm1141_vm0, %v3470_v51  ;;  %v877_v60 = vrot.slane %v6577_v15, 7  ;;  %v625_v51 = vand.u32 15, %v409_v59  ;;  %v3474_v59 = vsel %vm956_vm12, %v6826_v6, 0.0  ;;  %v879_v6 = vrot.slane %v6579_v45, 7 }
  0x80   : > { %vm976_vm13 = vcmp.ge.s32.totalorder %v7101_v50, 0 }
  0x81   : > { %v7125_v36 = vsel %vm825_vm7, %v875_v9, %v877_v60  ;;  %v7166_v44 = vsel %vm825_vm7, %v877_v60, %v879_v6 }
  0x82   : > { %5497 = vmatmul.mubr.msk.f32.gmra.mrb[22].mxu1 %vm1141_vm0, %v7088_v57  ;;  %5720 = vmatmul.mubr.msk.f32.gmra.mrb[4].mxu0 %vm1141_vm0, %v6766_v62  ;;  %v7138_v10 = vsel %vm974_vm11, %v7125_v36, 0.0  ;;  %v1134_v23 = vsel %vm976_vm13, %v7125_v36, 0.0  ;;  %8175 = vst [vmem:[#allocation78_spill] sm:$0xff] %v7166_v44 }
  0x83   : > { %5499 = vmatprep.mubr.msk.f32.mxu1 %vm1141_vm0, %v1130_v42  ;;  %5722 = vmatprep.mubr.msk.f32.mxu0 %vm1141_vm0, %v3472_v52  ;;  %v881_v42 = vrot.slane %v6605_v31, 7  ;;  %v7129_v52 = vadd.s32 4294967295, %v625_v51  ;;  %v3476_v51 = vsel %vm958_vm14, %v6866_v43, 0.0  ;;  %v883_v43 = vrot.slane %v6607_v30, 7 }
  0x85   : > { %v882_v55 = vsel %vm825_vm7, %v879_v6, %v881_v42  ;;  %vm978_vm12 = vcmp.ge.s32.totalorder %v7129_v52, 0  ;;  %v7188_v27 = vsel %vm825_vm7, %v881_v42, %v883_v43  ;;  %v8178_v6 = vrot.slane %v6234_v26, 1  ;;  %v8181_v26 = vld [vmem:[#allocation19_spill] sm:$0xff] }
  0x86   : > { %5500 = vmatmul.mubr.msk.f32.gmra.mrb[24].mxu1 %vm1141_vm0, %v7115_v54  ;;  %5723 = vmatmul.mubr.msk.f32.gmra.mrb[6].mxu0 %vm1141_vm0, %v6805_v12  ;;  %v7161_v56 = vsel %vm976_vm13, %v882_v55, 0.0  ;;  %v1136_v9 = vsel %vm978_vm12, %v882_v55, 0.0  ;;  %8177 = vst [vmem:[#allocation80_spill] sm:$0xff] %v7188_v27  ;;  %v8216_v52 = vld [vmem:[#allocation47_spill] sm:$0xff] }
  0x87   : > { %5502 = vmatprep.mubr.msk.f32.mxu1 %vm1141_vm0, %v1132_v3  ;;  %5725 = vmatprep.mubr.msk.f32.mxu0 %vm1141_vm0, %v3474_v59  ;;  %v8092_v3 = vrot.slane %v6835_v2, 7  ;;  %8174 = vst [vmem:[#allocation77_spill] sm:$0xff] %v7161_v56  ;;  %v3478_v59 = vsel %vm960_vm9, %v6891_v20, 0.0  ;;  %v3480_v20 = vsel %vm962_vm8, %v6924_v38, 0.0  ;;  %v8182_v38 = vld [vmem:[#allocation16_spill] sm:$0xff] }
  0x89   : > { %v2417_v56 = vsel %vm825_vm7, %v883_v43, %v8092_v3  ;;  %v3492_v3 = vsel %vm974_vm11, %v882_v55, 0.0 }
  0x8a   : > { %5503 = vmatmul.mubr.msk.f32.gmra.mrb[26].mxu1 %vm1141_vm0, %v7143_v32  ;;  %5726 = vmatmul.mubr.msk.f32.gmra.mrb[8].mxu0 %vm1141_vm0, %v6845_v48  ;;  %v7183_v60 = vsel %vm978_vm12, %v2417_v56, 0.0  ;;  %v3494_v5 = vsel %vm976_vm13, %v2417_v56, 0.0  ;;  %vm8236_vm13 = vcmp.lt.s32.totalorder %v6790_v37, 16  ;;  %v8244_v37 = vld [vmem:[#allocation64_spill] sm:$0xff] }
  0x8b   : > { %5505 = vmatprep.mubr.msk.f32.mxu1 %vm1141_vm0, %v1134_v23  ;;  %5728 = vmatprep.mubr.msk.f32.mxu0 %vm1141_vm0, %v3476_v51  ;;  %8176 = vst [vmem:[#allocation79_spill] sm:$0xff] %v7183_v60  ;;  %v1839_v23 = vsel %vm1746_vm1, 0.0, %v8178_v6  ;;  %v8179_v51 = vmov 0.0   ;;  %v8186_v6 = vld [vmem:[#allocation24_spill] sm:$0xff]  ;;  %v2418_v60 = vrot.slane %v6871_v49, 7 }
  0x8c   : > { %v2032_v43 = vsel %vm1905_vm2, %v1839_v23, 0.0  ;;  %v8187_v23 = vld [vmem:[#allocation22_spill] sm:$0xff] }
  0x8d   : > { %v2036_v53 = vsel %vm8189_vm6, %v8187_v23, 0.0  ;;  %v3465_v55 = vsel %vm825_vm7, %v2418_v60, 0.0  ;;  %vm8251_vm6 = vcmp.lt.s32.totalorder %v6893_v35, 16  ;;  %v8255_v35 = vld [vmem:[#allocation21_spill] sm:$0xff] }
  0x8e   : > { %5506 = vmatmul.mubr.msk.f32.gmra.mrb[28].mxu1 %vm1141_vm0, %v7166_v44  ;;  %5729 = vmatmul.mubr.msk.f32.gmra.mrb[10].mxu0 %vm1141_vm0, %v6915_v7  ;;  %v3496_v56 = vsel %vm978_vm12, %v3465_v55, 0.0  ;;  %v8273_v42 = vld [vmem:[#allocation77_spill] sm:$0xff] }
  0x8f   : > { %5508 = vmatprep.mubr.msk.f32.mxu1 %vm1141_vm0, %v1136_v9  ;;  %5731 = vmatprep.mubr.msk.f32.mxu0 %vm1141_vm0, %v3478_v59  ;;  %v8183_v9 = vld [vmem:[#allocation17_spill] sm:$0xff] }
  0x90   : > { %vm8184_vm1 = vcmp.lt.s32.totalorder %v8183_v9, 16 }
  0x91   : > { %v2034_v59 = vsel %vm8184_vm1, %v8182_v38, 0.0  ;;  %v8192_v38 = vld [vmem:[#allocation26_spill] sm:$0xff]  ;;  %vm8247_vm1 = vcmp.lt.s32.totalorder %v6859_v46, 16 }
  0x92   : > { %5509 = vmatmul.mubr.msk.f32.gmra.mrb[30].mxu1 %vm1141_vm0, %v7188_v27  ;;  %5732 = vmatmul.mubr.msk.f32.gmra.mrb[12].mxu0 %vm1141_vm0, %v6945_v58  ;;  %vm8193_vm8 = vcmp.lt.s32.totalorder %v8192_v38, 16 }
  0x93   : > { %5513 = vmatprep.mubr.f32.mxu1 %v8179_v51  ;;  %5734 = vmatprep.mubr.msk.f32.mxu0 %vm1141_vm0, %v3480_v20  ;;  %v8185_v20 = vld [vmem:[#allocation55_spill] sm:$0xff] }
  0x96   : > { %5514 = vmatmul.mubr.msk.f32.vlgmr.msra.gmra.mrb[0].mxu1 %vm1141_vm0, %v2032_v43  ;;  %5735 = vmatmul.mubr.msk.f32.gmra.mrb[14].mxu0 %vm1141_vm0, %v6972_v14  ;;  %v3486_v43 = vsel %vm968_vm5, %v7067_v25, 0.0  ;;  %v8195_v25 = vld [vmem:[#allocation32_spill] sm:$0xff] }
  0x97   : > { %5516 = vmatprep.mubr.msk.f32.mxu1 %vm1141_vm0, %v8181_v26  ;;  %5737 = vmatprep.mubr.msk.f32.mxu0 %vm1141_vm0, %v3482_v21  ;;  %v8190_v21 = vld [vmem:[#allocation27_spill] sm:$0xff]  ;;  %v8191_v26 = vld [vmem:[#allocation29_spill] sm:$0xff] }
  0x98   : > { %5562 = vmatpush3.msra.mxu1 %v8185_v20  ;;  %v3488_v20 = vsel %vm970_vm3, %v7097_v40, 0.0  ;;  %v8199_v40 = vld [vmem:[#allocation36_spill] sm:$0xff] }
  0x99   : > { %5861 = vmatprep.subr.mxu1 %v7223_v61 }
  0x9a   : > { %5517 = vmatmul.mubr.msk.f32.gmra.mrb[2].mxu1 %vm1141_vm0, %v2034_v59  ;;  %5738 = vmatmul.mubr.msk.f32.gmra.mrb[16].mxu0 %vm1141_vm0, %v7052_v11  ;;  %v2038_v59 = vsel %vm8193_vm8, %v8191_v26, 0.0  ;;  %vm8268_vm8 = vcmp.lt.s32.totalorder %v8188_v1, 16  ;;  %v8279_v1 = vld [vmem:[#allocation40_spill] sm:$0xff] }
  0x9b   : > { %5519 = vmatprep.mubr.msk.f32.mxu1 %vm1141_vm0, %v8186_v6  ;;  %5740 = vmatprep.mubr.msk.f32.mxu0 %vm1141_vm0, %v3484_v18  ;;  %v8196_v18 = vld [vmem:[#allocation33_spill] sm:$0xff] }
  0x9c   : > { %vm8197_vm5 = vcmp.lt.s32.totalorder %v8196_v18, 16 }
  0x9e   : > { %5520 = vmatmul.mubr.msk.f32.gmra.mrb[4].mxu1 %vm1141_vm0, %v2036_v53  ;;  %5741 = vmatmul.mubr.msk.f32.gmra.mrb[18].mxu0 %vm1141_vm0, %v7088_v57  ;;  %v2040_v53 = vsel %vm8197_vm5, %v8195_v25, 0.0  ;;  %vm8270_vm5 = vcmp.lt.s32.totalorder %v8192_v38, 16  ;;  %v8282_v38 = vld [vmem:[#allocation47_spill] sm:$0xff] }
  0x9f   : > { %5522 = vmatprep.mubr.msk.f32.mxu1 %vm1141_vm0, %v8190_v21  ;;  %5743 = vmatprep.mubr.msk.f32.mxu0 %vm1141_vm0, %v3486_v43  ;;  %v3490_v43 = vsel %vm972_vm4, %v7125_v36, 0.0  ;;  %v8203_v36 = vld [vmem:[#allocation39_spill] sm:$0xff] }
  0xa2   : > { %5523 = vmatmul.mubr.msk.f32.gmra.mrb[6].mxu1 %vm1141_vm0, %v2038_v59  ;;  %5744 = vmatmul.mubr.msk.f32.gmra.mrb[20].mxu0 %vm1141_vm0, %v7115_v54  ;;  %v8200_v59 = vld [vmem:[#allocation37_spill] sm:$0xff] }
  0xa3   : > { %5525 = vmatprep.mubr.msk.f32.mxu1 %vm1141_vm0, %v8194_v29  ;;  %5746 = vmatprep.mubr.msk.f32.mxu0 %vm1141_vm0, %v3488_v20  ;;  %vm8201_vm3 = vcmp.lt.s32.totalorder %v8200_v59, 16 }
  0xa4   : > { %v2042_v20 = vsel %vm8201_vm3, %v8199_v40, 0.0  ;;  %vm8271_vm3 = vcmp.lt.s32.totalorder %v8196_v18, 16  ;;  %v8285_v18 = vld [vmem:[#allocation51_spill] sm:$0xff] }
  0xa6   : > { %5526 = vmatmul.mubr.msk.f32.gmra.mrb[8].mxu1 %vm1141_vm0, %v2040_v53  ;;  %5747 = vmatmul.mubr.msk.f32.gmra.mrb[22].mxu0 %vm1141_vm0, %v7143_v32  ;;  %v8204_v53 = vld [vmem:[#allocation40_spill] sm:$0xff] }
  0xa7   : > { %5528 = vmatprep.mubr.msk.f32.mxu1 %vm1141_vm0, %v8198_v19  ;;  %5749 = vmatprep.mubr.msk.f32.mxu0 %vm1141_vm0, %v3490_v43  ;;  %vm8205_vm9 = vcmp.lt.s32.totalorder %v8204_v53, 16  ;;  %v8208_v53 = vld [vmem:[#allocation41_spill] sm:$0xff] }
  0xa8   : > { %v2044_v43 = vsel %vm8205_vm9, %v8203_v36, 0.0  ;;  %vm8209_vm10 = vcmp.lt.s32.totalorder %v8208_v53, 16  ;;  %v8214_v53 = vld [vmem:[#allocation46_spill] sm:$0xff] }
  0xa9   : > { %vm8215_vm14 = vcmp.lt.s32.totalorder %v8214_v53, 16  ;;  %v8223_v53 = vld [vmem:[#allocation52_spill] sm:$0xff] }
  0xaa   : > { %5529 = vmatmul.mubr.msk.f32.gmra.mrb[10].mxu1 %vm1141_vm0, %v2042_v20  ;;  %5750 = vmatmul.mubr.msk.f32.gmra.mrb[24].mxu0 %vm1141_vm0, %v7166_v44  ;;  %v8206_v20 = vld [vmem:[#allocation42_spill] sm:$0xff]  ;;  %v8210_v44 = vrot.slane %v6835_v2, 7 }
  0xab   : > { %5531 = vmatprep.mubr.msk.f32.mxu1 %vm1141_vm0, %v8202_v28  ;;  %5752 = vmatprep.mubr.msk.f32.mxu0 %vm1141_vm0, %v3492_v3  ;;  %v8207_v3 = vld [vmem:[#allocation43_spill] sm:$0xff] }
  0xac   : > { %v2046_v59 = vsel %vm8209_vm10, %v8207_v3, 0.0  ;;  %v7298_v50 = vsel %vm825_vm7, %v8210_v44, %v2418_v60  ;;  %v8217_v44 = vld [vmem:[#allocation2_spill] sm:$0xff]  ;;  %v8218_v60 = vld [vmem:[#allocation49_spill] sm:$0xff]  ;;  %vm8280_vm10 = vcmp.lt.s32.totalorder %v8279_v1, 16 }
  0xad   : > { %8211 = vst [vmem:[#allocation11_spill] sm:$0xff] %v7298_v50 }
  0xae   : > { %5532 = vmatmul.mubr.msk.f32.gmra.mrb[12].mxu1 %vm1141_vm0, %v2044_v43  ;;  %5753 = vmatmul.mubr.msk.f32.gmra.mrb[26].mxu0 %vm1141_vm0, %v7188_v27  ;;  %v8212_v43 = vld [vmem:[#allocation45_spill] sm:$0xff] }
  0xaf   : > { %5534 = vmatprep.mubr.msk.f32.mxu1 %vm1141_vm0, %v8206_v20  ;;  %5755 = vmatprep.mubr.msk.f32.mxu0 %vm1141_vm0, %v3494_v5  ;;  %v8213_v5 = vld [vmem:[#allocation44_spill] sm:$0xff] }
  0xb0   : > { %v2048_v27 = vsel %vm8215_vm14, %v8213_v5, 0.0  ;;  %v8226_v5 = vld [vmem:[#allocation4_spill] sm:$0xff] }
  0xb2   : > { %5535 = vmatmul.mubr.msk.f32.gmra.mrb[14].mxu1 %vm1141_vm0, %v2046_v59  ;;  %5756 = vmatmul.mubr.msk.f32.gmra.mrb[28].mxu0 %vm1141_vm0, %v7298_v50  ;;  %v8219_v59 = vld [vmem:[#allocation50_spill] sm:$0xff]  ;;  %v8224_v50 = vld [vmem:[#allocation53_spill] sm:$0xff] }
  0xb3   : > { %5537 = vmatprep.mubr.msk.f32.mxu1 %vm1141_vm0, %v8212_v43  ;;  %5758 = vmatprep.mubr.msk.f32.mxu0 %vm1141_vm0, %v3496_v56  ;;  %vm8220_vm15 = vcmp.lt.s32.totalorder %v8219_v59, 16  ;;  %v8221_v56 = vld [vmem:[#allocation3_spill] sm:$0xff]  ;;  %vm8225_vm4 = vcmp.lt.s32.totalorder %v8224_v50, 16  ;;  %v8231_v59 = vld [vmem:[#allocation57_spill] sm:$0xff] }
  0xb4   : > { %v2050_v55 = vsel %vm8220_vm15, %v8218_v60, 0.0  ;;  %vm8232_vm11 = vcmp.lt.s32.totalorder %v8231_v59, 16  ;;  %v8233_v50 = vld [vmem:[#allocation7_spill] sm:$0xff]  ;;  %v8238_v59 = vld [vmem:[#allocation60_spill] sm:$0xff] }
  0xb6   : > { %5538 = vmatmul.mubr.msk.f32.gmra.mrb[16].mxu1 %vm1141_vm0, %v2048_v27  ;;  %5759 = vmatmul.mubr.f32.gmra.mrb[30].mxu0 %v8179_v51  ;;  %v8222_v27 = vld [vmem:[#allocation51_spill] sm:$0xff] }
  0xb7   : > { %5540 = vmatprep.mubr.msk.f32.mxu1 %vm1141_vm0, %v8216_v52  ;;  %5763 = vmatprep.mubr.msk.f32.mxu0 %vm1141_vm0, %v8217_v44  ;;  %v2052_v52 = vsel %vm8225_vm4, %v8223_v53, 0.0  ;;  %v8227_v44 = vld [vmem:[#allocation5_spill] sm:$0xff] }
  0xba   : > { %5541 = vmatmul.mubr.msk.f32.gmra.mrb[18].mxu1 %vm1141_vm0, %v2050_v55  ;;  %5764 = vmatmul.mubr.msk.f32.vlgmr.msra.gmra.mrb[0].mxu0 %vm1141_vm0, %v8221_v56  ;;  %v8228_v55 = vld [vmem:[#allocation54_spill] sm:$0xff] }
  0xbb   : > { %5812 = vmatpush3.msra.mxu0 %v7003_v0  ;;  %5543 = vmatprep.mubr.msk.f32.mxu1 %vm1141_vm0, %v8222_v27  ;;  %v8229_v56 = vld [vmem:[#allocation6_spill] sm:$0xff]  ;;  %v8230_v0 = vld [vmem:[#allocation56_spill] sm:$0xff] }
  0xbc   : > { %5766 = vmatprep.mubr.msk.f32.mxu0 %vm1141_vm0, %v8226_v5  ;;  %v2054_v27 = vsel %vm8232_vm11, %v8230_v0, 0.0  ;;  %v8234_v5 = vld [vmem:[#allocation8_spill] sm:$0xff] }
  0xbe   : > { %5544 = vmatmul.mubr.msk.f32.gmra.mrb[20].mxu1 %vm1141_vm0, %v2052_v52  ;;  %5767 = vmatmul.mubr.msk.f32.gmra.mrb[2].mxu0 %vm1141_vm0, %v8227_v44  ;;  %v8235_v52 = vld [vmem:[#allocation59_spill] sm:$0xff] }
  0xbf   : > { %5546 = vmatprep.mubr.msk.f32.mxu1 %vm1141_vm0, %v8228_v55  ;;  %5769 = vmatprep.mubr.msk.f32.mxu0 %vm1141_vm0, %v8229_v56  ;;  %v2056_v44 = vsel %vm8236_vm13, %v8235_v52, 0.0  ;;  %v8237_v56 = vld [vmem:[#allocation9_spill] sm:$0xff] }
  0xc2   : > { %5547 = vmatmul.mubr.msk.f32.gmra.mrb[22].mxu1 %vm1141_vm0, %v2054_v27  ;;  %5770 = vmatmul.mubr.msk.f32.gmra.mrb[4].mxu0 %vm1141_vm0, %v8233_v50  ;;  %v8239_v27 = vld [vmem:[#allocation10_spill] sm:$0xff] }
  0xc3   : > { %5549 = vmatprep.mubr.msk.f32.mxu1 %vm1141_vm0, %v6763_v16  ;;  %5772 = vmatprep.mubr.msk.f32.mxu0 %vm1141_vm0, %v8234_v5  ;;  %v8240_v50 = vld [vmem:[#allocation62_spill] sm:$0xff]  ;;  %v8241_v16 = vld [vmem:[#allocation63_spill] sm:$0xff]  ;;  %v8243_v5 = vld [vmem:[#allocation12_spill] sm:$0xff] }
  0xc4   : > { %vm8242_vm12 = vcmp.lt.s32.totalorder %v8241_v16, 16 }
  0xc5   : > { %v2058_v0 = vsel %vm8242_vm12, %v8240_v50, 0.0 }
  0xc6   : > { %5550 = vmatmul.mubr.msk.f32.gmra.mrb[24].mxu1 %vm1141_vm0, %v2056_v44  ;;  %5773 = vmatmul.mubr.msk.f32.gmra.mrb[6].mxu0 %vm1141_vm0, %v8237_v56  ;;  %v8245_v44 = vld [vmem:[#allocation13_spill] sm:$0xff] }
  0xc7   : > { %5552 = vmatprep.mubr.msk.f32.mxu1 %vm1141_vm0, %v8238_v59  ;;  %5775 = vmatprep.mubr.msk.f32.mxu0 %vm1141_vm0, %v8239_v27  ;;  %v8246_v56 = vld [vmem:[#allocation65_spill] sm:$0xff]  ;;  %v8248_v27 = vld [vmem:[#allocation14_spill] sm:$0xff] }
  0xc8   : > { %v2060_v59 = vsel %vm8247_vm1, %v8246_v56, 0.0 }
  0xca   : > { %5553 = vmatmul.mubr.msk.f32.gmra.mrb[26].mxu1 %vm1141_vm0, %v2058_v0  ;;  %5776 = vmatmul.mubr.msk.f32.gmra.mrb[8].mxu0 %vm1141_vm0, %v8243_v5  ;;  %v8249_v0 = vld [vmem:[#allocation15_spill] sm:$0xff]  ;;  %v8250_v5 = vld [vmem:[#allocation66_spill] sm:$0xff] }
  0xcb   : > { %5555 = vmatprep.mubr.msk.f32.mxu1 %vm1141_vm0, %v8244_v37  ;;  %5778 = vmatprep.mubr.msk.f32.mxu0 %vm1141_vm0, %v8245_v44  ;;  %v2062_v16 = vsel %vm8251_vm6, %v8250_v5, 0.0  ;;  %v8252_v44 = vld [vmem:[#allocation18_spill] sm:$0xff]  ;;  %vm8303_vm6 = vcmp.lt.s32.totalorder %v6859_v46, 16 }
  0xce   : > { %5556 = vmatmul.mubr.msk.f32.gmra.mrb[28].mxu1 %vm1141_vm0, %v2060_v59  ;;  %5779 = vmatmul.mubr.msk.f32.gmra.mrb[10].mxu0 %vm1141_vm0, %v8248_v27  ;;  %v8253_v59 = vld [vmem:[#allocation20_spill] sm:$0xff] }
  0xcf   : > { %5558 = vmatprep.mubr.msk.f32.mxu1 %vm1141_vm0, %v6883_v34  ;;  %5781 = vmatprep.mubr.msk.f32.mxu0 %vm1141_vm0, %v8249_v0  ;;  %v8254_v27 = vld [vmem:[#allocation48_spill] sm:$0xff] }
  0xd2   : > { %5559 = vmatmul.mubr.msk.f32.gmra.mrb[30].mxu1 %vm1141_vm0, %v2062_v16  ;;  %5782 = vmatmul.mubr.msk.f32.gmra.mrb[12].mxu0 %vm1141_vm0, %v8252_v44  ;;  %v8257_v16 = vld [vmem:[#allocation28_spill] sm:$0xff] }
  0xd3   : > { %5563 = vmatprep.mubr.msk.f32.mxu1 %vm1141_vm0, %v6993_v17  ;;  %5784 = vmatprep.mubr.msk.f32.mxu0 %vm1141_vm0, %v8253_v59  ;;  %v8256_v17 = vld [vmem:[#allocation25_spill] sm:$0xff] }
  0xd6   : > { %5564 = vmatmul.mubr.msk.f32.vlgmr.msra.gmra.mrb[0].mxu1 %vm1141_vm0, %v8254_v27  ;;  %5785 = vmatmul.mubr.msk.f32.gmra.mrb[14].mxu0 %vm1141_vm0, %v6421_v8 }
  0xd7   : > { %5566 = vmatprep.mubr.msk.f32.mxu1 %vm1141_vm0, %v6998_v33  ;;  %5787 = vmatprep.mubr.msk.f32.mxu0 %vm1141_vm0, %v8255_v35  ;;  %v8258_v33 = vld [vmem:[#allocation30_spill] sm:$0xff] }
  0xd8   : > { %5862 = vmatpush3.msra.mxu1 %v7223_v61  ;;  %v8259_v61 = vld [vmem:[#allocation34_spill] sm:$0xff] }
  0xda   : > { %5567 = vmatmul.mubr.msk.f32.gmra.mrb[2].mxu1 %vm1141_vm0, %v6689_v24  ;;  %5788 = vmatmul.mubr.msk.f32.gmra.mrb[16].mxu0 %vm1141_vm0, %v8256_v17  ;;  %v8260_v24 = vld [vmem:[#allocation69_spill] sm:$0xff] }
  0xdb   : > { %5569 = vmatprep.mubr.msk.f32.mxu1 %vm1141_vm0, %v7008_v4  ;;  %5790 = vmatprep.mubr.msk.f32.mxu0 %vm1141_vm0, %v8257_v16  ;;  %v8267_v4 = vld [vmem:[#allocation75_spill] sm:$0xff] }
  0xde   : > { %5570 = vmatmul.mubr.msk.f32.gmra.mrb[4].mxu1 %vm1141_vm0, %v6722_v41  ;;  %5791 = vmatmul.mubr.msk.f32.gmra.mrb[18].mxu0 %vm1141_vm0, %v8258_v33  ;;  %v8261_v41 = vld [vmem:[#allocation70_spill] sm:$0xff] }
  0xdf   : > { %5572 = vmatprep.mubr.msk.f32.mxu1 %vm1141_vm0, %v7013_v39  ;;  %5793 = vmatprep.mubr.msk.f32.mxu0 %vm1141_vm0, %v8259_v61  ;;  %v4113_v39 = vsel %vm8268_vm8, %v8195_v25, 0.0 }
  0xe2   : > { %5573 = vmatmul.mubr.msk.f32.gmra.mrb[6].mxu1 %vm1141_vm0, %v6766_v62  ;;  %5794 = vmatmul.mubr.msk.f32.gmra.mrb[20].mxu0 %vm1141_vm0, %v6513_v22  ;;  %v8262_v62 = vld [vmem:[#allocation71_spill] sm:$0xff] }
  0xe3   : > { %5575 = vmatprep.mubr.msk.f32.mxu1 %vm1141_vm0, %v7018_v47  ;;  %5796 = vmatprep.mubr.msk.f32.mxu0 %vm1141_vm0, %v6542_v13  ;;  %v8269_v47 = vld [vmem:[#allocation76_spill] sm:$0xff] }
  0xe6   : > { %5576 = vmatmul.mubr.msk.f32.gmra.mrb[8].mxu1 %vm1141_vm0, %v6805_v12  ;;  %5797 = vmatmul.mubr.msk.f32.gmra.mrb[22].mxu0 %vm1141_vm0, %v6544_v63  ;;  %v8263_v12 = vld [vmem:[#allocation72_spill] sm:$0xff] }
  0xe7   : > { %5578 = vmatprep.mubr.msk.f32.mxu1 %vm1141_vm0, %v8260_v24  ;;  %5799 = vmatprep.mubr.msk.f32.mxu0 %vm1141_vm0, %v6577_v15 }
  0xea   : > { %5579 = vmatmul.mubr.msk.f32.gmra.mrb[10].mxu1 %vm1141_vm0, %v6845_v48  ;;  %5800 = vmatmul.mubr.msk.f32.gmra.mrb[24].mxu0 %vm1141_vm0, %v6579_v45  ;;  %v4109_v48 = vsel %vm1905_vm2, %v8187_v23, 0.0  ;;  %vm8266_vm2 = vcmp.lt.s32.totalorder %v8183_v9, 16  ;;  %v8276_v9 = vld [vmem:[#allocation80_spill] sm:$0xff] }
  0xeb   : > { %5581 = vmatprep.mubr.msk.f32.mxu1 %vm1141_vm0, %v8261_v41  ;;  %5802 = vmatprep.mubr.msk.f32.mxu0 %vm1141_vm0, %v6605_v31  ;;  %v8278_v23 = vld [vmem:[#allocation44_spill] sm:$0xff] }
  0xee   : > { %5582 = vmatmul.mubr.msk.f32.gmra.mrb[12].mxu1 %vm1141_vm0, %v6915_v7  ;;  %5803 = vmatmul.mubr.msk.f32.gmra.mrb[26].mxu0 %vm1141_vm0, %v6607_v30  ;;  %v8264_v7 = vld [vmem:[#allocation73_spill] sm:$0xff] }
  0xef   : > { %5584 = vmatprep.mubr.msk.f32.mxu1 %vm1141_vm0, %v8262_v62  ;;  %5805 = vmatprep.mubr.msk.f32.mxu0 %vm1141_vm0, %v6835_v2 }
  0xf2   : > { %5585 = vmatmul.mubr.msk.f32.gmra.mrb[14].mxu1 %vm1141_vm0, %v6945_v58  ;;  %5806 = vmatmul.mubr.msk.f32.gmra.mrb[28].mxu0 %vm1141_vm0, %v6871_v49  ;;  %v8265_v58 = vld [vmem:[#allocation74_spill] sm:$0xff] }
  0xf3   : > { %5587 = vmatprep.mubr.msk.f32.mxu1 %vm1141_vm0, %v8263_v12  ;;  %5808 = vmatprep.mubr.f32.mxu0 %v8179_v51 }
  0xf6   : > { %5588 = vmatmul.mubr.msk.f32.gmra.mrb[16].mxu1 %vm1141_vm0, %v6972_v14  ;;  %5809 = vmatmul.mubr.f32.gmra.mrb[30].mxu0 %v8179_v51  ;;  %v4111_v14 = vsel %vm8266_vm2, %v8191_v26, 0.0  ;;  %v8281_v26 = vld [vmem:[#allocation11_spill] sm:$0xff]  ;;  %vm4724_vm2 = vcmask 58368  }
  0xf7   : > { %5590 = vmatprep.mubr.msk.f32.mxu1 %vm1141_vm0, %v8264_v7  ;;  %5813 = vmatprep.mubr.msk.f32.mxu0 %vm1141_vm0, %v8186_v6  ;;  %v8277_v6 = vld [vmem:[#allocation79_spill] sm:$0xff] }
  0xfa   : > { %5591 = vmatmul.mubr.msk.f32.gmra.mrb[18].mxu1 %vm1141_vm0, %v7052_v11  ;;  %5814 = vmatmul.mubr.msk.f32.vlgmr.msra.gmra.mrb[0].mxu0 %vm1141_vm0, %v4109_v48  ;;  %v4115_v11 = vsel %vm8270_vm5, %v8199_v40, 0.0 }
  0xfb   : > { %5593 = vmatprep.mubr.msk.f32.mxu1 %vm1141_vm0, %v8265_v58  ;;  %5816 = vmatprep.mubr.msk.f32.mxu0 %vm1141_vm0, %v8190_v21  ;;  %v4121_v21 = vsel %vm8280_vm10, %v8278_v23, 0.0 }
  0xfe   : > { %5594 = vmatmul.mubr.msk.f32.gmra.mrb[20].mxu1 %vm1141_vm0, %v7088_v57  ;;  %5817 = vmatmul.mubr.msk.f32.gmra.mrb[2].mxu0 %vm1141_vm0, %v4111_v14  ;;  %v4117_v57 = vsel %vm8271_vm3, %v8203_v36, 0.0 }
  0xff   : > { %5596 = vmatprep.mubr.msk.f32.mxu1 %vm1141_vm0, %v8267_v4  ;;  %5819 = vmatprep.mubr.msk.f32.mxu0 %vm1141_vm0, %v8194_v29  ;;  %v8283_v29 = vld [vmem:[#allocation41_spill] sm:$0xff] }
 0x100   : > { %vm8284_vm14 = vcmp.lt.s32.totalorder %v8283_v29, 16 }
 0x101   : > { %v4123_v25 = vsel %vm8284_vm14, %v8218_v60, 0.0  ;;  %v8295_v60 = vld [vmem:[#allocation57_spill] sm:$0xff] }
 0x102   : > { %5597 = vmatmul.mubr.msk.f32.gmra.mrb[22].mxu1 %vm1141_vm0, %v7115_v54  ;;  %5820 = vmatmul.mubr.msk.f32.gmra.mrb[4].mxu0 %vm1141_vm0, %v4113_v39  ;;  %v8272_v54 = vld [vmem:[#allocation78_spill] sm:$0xff]  ;;  %vm8296_vm13 = vcmp.lt.s32.totalorder %v8295_v60, 16 }
 0x103   : > { %5599 = vmatprep.mubr.msk.f32.mxu1 %vm1141_vm0, %v8269_v47  ;;  %5822 = vmatprep.mubr.msk.f32.mxu0 %vm1141_vm0, %v8198_v19  ;;  %v8286_v19 = vld [vmem:[#allocation46_spill] sm:$0xff] }
 0x104   : > { %vm8287_vm15 = vcmp.lt.s32.totalorder %v8286_v19, 16 }
 0x105   : > { %v4125_v40 = vsel %vm8287_vm15, %v8223_v53, 0.0  ;;  %v8291_v53 = vld [vmem:[#allocation58_spill] sm:$0xff] }
 0x106   : > { %5600 = vmatmul.mubr.msk.f32.gmra.mrb[24].mxu1 %vm1141_vm0, %v7143_v32  ;;  %5823 = vmatmul.mubr.msk.f32.gmra.mrb[6].mxu0 %vm1141_vm0, %v4115_v11 }
 0x107   : > { %5602 = vmatprep.mubr.msk.f32.mxu1 %vm1141_vm0, %v7138_v10  ;;  %5825 = vmatprep.mubr.msk.f32.mxu0 %vm1141_vm0, %v8202_v28  ;;  %v8274_v10 = vld [vmem:[#allocation37_spill] sm:$0xff]  ;;  %v8289_v28 = vld [vmem:[#allocation50_spill] sm:$0xff] }
 0x108   : > { %vm8275_vm9 = vcmp.lt.s32.totalorder %v8274_v10, 16  ;;  %vm8290_vm4 = vcmp.lt.s32.totalorder %v8289_v28, 16 }
 0x109   : > { %v4119_v32 = vsel %vm8275_vm9, %v8207_v3, 0.0 }
 0x10a   : > { %5603 = vmatmul.mubr.msk.f32.gmra.mrb[26].mxu1 %vm1141_vm0, %v8272_v54  ;;  %5826 = vmatmul.mubr.msk.f32.gmra.mrb[8].mxu0 %vm1141_vm0, %v4117_v57 }
 0x10b   : > { %5605 = vmatprep.mubr.msk.f32.mxu1 %vm1141_vm0, %v8273_v42  ;;  %5828 = vmatprep.mubr.msk.f32.mxu0 %vm1141_vm0, %v8206_v20  ;;  %v8292_v20 = vld [vmem:[#allocation53_spill] sm:$0xff] }
 0x10c   : > { %vm8293_vm11 = vcmp.lt.s32.totalorder %v8292_v20, 16 }
 0x10d   : > { %v4129_v3 = vsel %vm8293_vm11, %v8235_v52, 0.0 }
 0x10e   : > { %5606 = vmatmul.mubr.msk.f32.gmra.mrb[28].mxu1 %vm1141_vm0, %v8276_v9  ;;  %5829 = vmatmul.mubr.msk.f32.gmra.mrb[10].mxu0 %vm1141_vm0, %v4119_v32 }
 0x10f   : > { %5608 = vmatprep.mubr.msk.f32.mxu1 %vm1141_vm0, %v8277_v6  ;;  %5831 = vmatprep.mubr.msk.f32.mxu0 %vm1141_vm0, %v8212_v43  ;;  %v8294_v43 = vld [vmem:[#allocation60_spill] sm:$0xff] }
 0x112   : > { %5609 = vmatmul.mubr.msk.f32.gmra.mrb[30].mxu1 %vm1141_vm0, %v8281_v26  ;;  %5832 = vmatmul.mubr.msk.f32.gmra.mrb[12].mxu0 %vm1141_vm0, %v4121_v21 }
 0x113   : > { %5637 = vmatprep.mubr.msk.f32.mxu1 %vm1141_vm0, %v8253_v59  ;;  %5834 = vmatprep.mubr.msk.f32.mxu0 %vm1141_vm0, %v8282_v38 }
 0x116   : > { %5638 = vmatmul.mubr.msk.f32.vlgmr.msra.gmra.mrb[16].mxu1 %vm1141_vm0, %v6421_v8  ;;  %5835 = vmatmul.mubr.msk.f32.gmra.mrb[14].mxu0 %vm1141_vm0, %v4123_v25  ;;  %v8288_v8 = vld [vmem:[#allocation56_spill] sm:$0xff] }
 0x117   : > { %5640 = vmatprep.mubr.msk.f32.mxu1 %vm1141_vm0, %v8255_v35  ;;  %5837 = vmatprep.mubr.msk.f32.mxu0 %vm1141_vm0, %v8285_v18  ;;  %v4127_v36 = vsel %vm8290_vm4, %v8288_v8, 0.0 }
 0x11a   : > { %5641 = vmatmul.mubr.msk.f32.gmra.mrb[18].mxu1 %vm1141_vm0, %v8256_v17  ;;  %5838 = vmatmul.mubr.msk.f32.gmra.mrb[16].mxu0 %vm1141_vm0, %v4125_v40 }
 0x11b   : > { %5643 = vmatprep.mubr.msk.f32.mxu1 %vm1141_vm0, %v8257_v16  ;;  %5840 = vmatprep.mubr.msk.f32.mxu0 %vm1141_vm0, %v8228_v55  ;;  %v4131_v55 = vsel %vm8296_vm13, %v8240_v50, 0.0 }
 0x11e   : > { %5644 = vmatmul.mubr.msk.f32.gmra.mrb[20].mxu1 %vm1141_vm0, %v8258_v33  ;;  %5841 = vmatmul.mubr.msk.f32.gmra.mrb[18].mxu0 %vm1141_vm0, %v4127_v36 }
 0x11f   : > { %5646 = vmatprep.mubr.msk.f32.mxu1 %vm1141_vm0, %v8259_v61  ;;  %5843 = vmatprep.mubr.msk.f32.mxu0 %vm1141_vm0, %v8291_v53 }
 0x122   : > { %5647 = vmatmul.mubr.msk.f32.gmra.mrb[22].mxu1 %vm1141_vm0, %v6513_v22  ;;  %5844 = vmatmul.mubr.msk.f32.gmra.mrb[20].mxu0 %vm1141_vm0, %v4129_v3  ;;  %v8297_v22 = vld [vmem:[#allocation61_spill] sm:$0xff] }
 0x123   : > { %5649 = vmatprep.mubr.msk.f32.mxu1 %vm1141_vm0, %v6542_v13  ;;  %5846 = vmatprep.mubr.msk.f32.mxu0 %vm1141_vm0, %v8294_v43  ;;  %vm8298_vm12 = vcmp.lt.s32.totalorder %v8297_v22, 16 }
 0x124   : > { %v4133_v13 = vsel %vm8298_vm12, %v8246_v56, 0.0 }
 0x126   : > { %5650 = vmatmul.mubr.msk.f32.gmra.mrb[24].mxu1 %vm1141_vm0, %v6544_v63  ;;  %5847 = vmatmul.mubr.msk.f32.gmra.mrb[22].mxu0 %vm1141_vm0, %v4131_v55 }
 0x127   : > { %5652 = vmatprep.mubr.msk.f32.mxu1 %vm1141_vm0, %v6577_v15  ;;  %5849 = vmatprep.mubr.msk.f32.mxu0 %vm1141_vm0, %v8244_v37  ;;  %v8299_v15 = vld [vmem:[#allocation63_spill] sm:$0xff]  ;;  %v8301_v37 = vld [vmem:[#allocation68_spill] sm:$0xff] }
 0x128   : > { %vm8300_vm1 = vcmp.lt.s32.totalorder %v8299_v15, 16 }
 0x129   : > { %v4135_v63 = vsel %vm8300_vm1, %v8250_v5, 0.0 }
 0x12a   : > { %5653 = vmatmul.mubr.msk.f32.gmra.mrb[26].mxu1 %vm1141_vm0, %v6579_v45  ;;  %5850 = vmatmul.mubr.msk.f32.gmra.mrb[24].mxu0 %vm1141_vm0, %v4133_v13  ;;  %v8302_v45 = vld [vmem:[#allocation67_spill] sm:$0xff] }
 0x12b   : > { %5655 = vmatprep.mubr.msk.f32.mxu1 %vm1141_vm0, %v6605_v31  ;;  %5852 = vmatprep.mubr.msk.f32.mxu0 %vm1141_vm0, %v6883_v34  ;;  %v4137_v31 = vsel %vm8303_vm6, %v8302_v45, 0.0 }
 0x12e   : > { %5656 = vmatmul.mubr.msk.f32.gmra.mrb[28].mxu1 %vm1141_vm0, %v6607_v30  ;;  %5853 = vmatmul.mubr.msk.f32.gmra.mrb[26].mxu0 %vm1141_vm0, %v4135_v63 }
 0x12f   : > { %5658 = vmatprep.mubr.msk.f32.mxu1 %vm1141_vm0, %v6835_v2  ;;  %5855 = vmatprep.mubr.msk.f32.mxu0 %vm1141_vm0, %v8301_v37 }
 0x132   : > { %5659 = vmatmul.mubr.msk.f32.gmra.mrb[30].mxu1 %vm1141_vm0, %v6871_v49  ;;  %5856 = vmatmul.mubr.msk.f32.gmra.mrb[28].mxu0 %vm1141_vm0, %v4137_v31 }
 0x133   : > { %5858 = vmatprep.mubr.f32.mxu0 %v8179_v51 }
 0x136   : > { %5859 = vmatmul.mubr.f32.gmra.mrb[30].mxu0 %v8179_v51 }
 0x1a9   : > { %v5565_v30 = vpop.f32.mrb[0].mxu1 }
 0x1aa   : > { %v2618_v34 = vpop.f32.mrb[1].mxu1 }
 0x1ad   : > { %v5568_v2 = vpop.f32.mrb[2].mxu1 }
 0x1ae   : > { %v2628_v52 = vpop.f32.mrb[3].mxu1 }
 0x1b1   : > { %v5571_v50 = vpop.f32.mrb[4].mxu1 }
 0x1b2   : > { %v2638_v56 = vpop.f32.mrb[5].mxu1 }
 0x1b5   : > { %v5574_v0 = vpop.f32.mrb[6].mxu1 }
 0x1b6   : > { %v2648_v5 = vpop.f32.mrb[7].mxu1 }
 0x1b9   : > { %v5577_v46 = vpop.f32.mrb[8].mxu1 }
 0x1ba   : > { %v2658_v44 = vpop.f32.mrb[9].mxu1 }
 0x1bd   : > { %v5580_v59 = vpop.f32.mrb[10].mxu1 }
 0x1be   : > { %v2668_v27 = vpop.f32.mrb[11].mxu1 }
 0x1c1   : > { %v7607_v49 = vpop.f32.mrb[12].mxu1 }
 0x1c2   : > { %v7609_v35 = vpop.f32.mrb[13].mxu1 }
 0x1c5   : > { %v7611_v17 = vpop.f32.mrb[14].mxu1 }
 0x1c6   : > { %v7613_v51 = vpop.f32.mrb[15].mxu1 }
 0x1cd   : > { %v5815_v16 = vpop.f32.mrb[0].mxu0 }
 0x1ce   : > { %v7622_v33 = vadd.f32 %v5815_v16, %v5565_v30  ;;  %v4296_v61 = vpop.f32.mrb[1].mxu0 }
 0x1cf   : > { %v7624_v24 = vadd.f32 %v4296_v61, %v2618_v34 }
 0x1d0   : > { %4488 = vst.msk [vmem:[%s7620_s27 + $0x8] sm:$0xff] %vm1141_vm0, %v7622_v33  ;;  %v4520_v41 = vsel %vm1141_vm0, %v7622_v33, 0.0 }
 0x1d1   : > { %4487 = vst.msk [vmem:[%s7620_s27] sm:$0xff] %vm1141_vm0, %v7624_v24  ;;  %v4519_v62 = vsel %vm1141_vm0, %v7624_v24, 0.0  ;;  %v5818_v12 = vpop.f32.mrb[2].mxu0 }
 0x1d2   : > { %v7636_v48 = vadd.f32 %v5818_v12, %v5568_v2  ;;  %v4306_v7 = vpop.f32.mrb[3].mxu0  ;;  %v4521_v14 = vadd.f32 %v4520_v41, %v4519_v62 }
 0x1d3   : > { %v7638_v58 = vadd.f32 %v4306_v7, %v2628_v52 }
 0x1d4   : > { %4490 = vst.msk [vmem:[%s7620_s27 + $0x18] sm:$0xff] %vm1141_vm0, %v7636_v48  ;;  %v4524_v54 = vsel %vm1141_vm0, %v7636_v48, 0.0 }
 0x1d5   : > { %4489 = vst.msk [vmem:[%s7620_s27 + $0x10] sm:$0xff] %vm1141_vm0, %v7638_v58  ;;  %v4522_v4 = vsel %vm1141_vm0, %v7638_v58, 0.0  ;;  %v5821_v39 = vpop.f32.mrb[4].mxu0 }
 0x1d6   : > { %v4523_v47 = vadd.f32 %v4522_v4, %v4521_v14  ;;  %v7648_v11 = vadd.f32 %v5821_v39, %v5571_v50  ;;  %v4316_v57 = vpop.f32.mrb[5].mxu0 }
 0x1d7   : > { %v7652_v42 = vadd.f32 %v4316_v57, %v2638_v56 }
 0x1d8   : > { %4492 = vst.msk [vmem:[%s7620_s27 + $0x28] sm:$0xff] %vm1141_vm0, %v7648_v11  ;;  %v4525_v10 = vadd.f32 %v4524_v54, %v4523_v47  ;;  %v4528_v21 = vsel %vm1141_vm0, %v7648_v11, 0.0 }
 0x1d9   : > { %4491 = vst.msk [vmem:[%s7620_s27 + $0x20] sm:$0xff] %vm1141_vm0, %v7652_v42  ;;  %v4526_v32 = vsel %vm1141_vm0, %v7652_v42, 0.0  ;;  %v5824_v9 = vpop.f32.mrb[6].mxu0 }
 0x1da   : > { %v4527_v6 = vadd.f32 %v4526_v32, %v4525_v10  ;;  %v7662_v23 = vadd.f32 %v5824_v9, %v5574_v0  ;;  %v4326_v1 = vpop.f32.mrb[7].mxu0 }
 0x1db   : > { %v7666_v26 = vadd.f32 %v4326_v1, %v2648_v5 }
 0x1dc   : > { %4494 = vst.msk [vmem:[%s7620_s27 + $0x38] sm:$0xff] %vm1141_vm0, %v7662_v23  ;;  %v4529_v38 = vadd.f32 %v4528_v21, %v4527_v6  ;;  %v4532_v8 = vsel %vm1141_vm0, %v7662_v23, 0.0 }
 0x1dd   : > { %4493 = vst.msk [vmem:[%s7620_s27 + $0x30] sm:$0xff] %vm1141_vm0, %v7666_v26  ;;  %v4530_v29 = vsel %vm1141_vm0, %v7666_v26, 0.0  ;;  %v5827_v25 = vpop.f32.mrb[8].mxu0 }
 0x1de   : > { %v4531_v18 = vadd.f32 %v4530_v29, %v4529_v38  ;;  %v7676_v19 = vadd.f32 %v5827_v25, %v5577_v46  ;;  %v4336_v40 = vpop.f32.mrb[9].mxu0 }
 0x1df   : > { %v7680_v28 = vadd.f32 %v4336_v40, %v2658_v44 }
 0x1e0   : > { %4496 = vst.msk [vmem:[%s7620_s27 + $0x48] sm:$0xff] %vm1141_vm0, %v7676_v19  ;;  %v4533_v36 = vadd.f32 %v4532_v8, %v4531_v18  ;;  %v4536_v55 = vsel %vm1141_vm0, %v7676_v19, 0.0 }
 0x1e1   : > { %4495 = vst.msk [vmem:[%s7620_s27 + $0x40] sm:$0xff] %vm1141_vm0, %v7680_v28  ;;  %v4534_v53 = vsel %vm1141_vm0, %v7680_v28, 0.0  ;;  %v5830_v20 = vpop.f32.mrb[10].mxu0 }
 0x1e2   : > { %v4535_v3 = vadd.f32 %v4534_v53, %v4533_v36  ;;  %v7690_v43 = vadd.f32 %v5830_v20, %v5580_v59  ;;  %v4346_v60 = vpop.f32.mrb[11].mxu0 }
 0x1e3   : > { %v7694_v22 = vadd.f32 %v4346_v60, %v2668_v27 }
 0x1e4   : > { %4498 = vst.msk [vmem:[%s7620_s27 + $0x58] sm:$0xff] %vm1141_vm0, %v7690_v43  ;;  %v4537_v13 = vadd.f32 %v4536_v55, %v4535_v3  ;;  %v4540_v30 = vsel %vm1141_vm0, %v7690_v43, 0.0 }
 0x1e5   : > { %4497 = vst.msk [vmem:[%s7620_s27 + $0x50] sm:$0xff] %vm1141_vm0, %v7694_v22  ;;  %v4538_v15 = vsel %vm1141_vm0, %v7694_v22, 0.0  ;;  %v5833_v63 = vpop.f32.mrb[12].mxu0 }
 0x1e6   : > { %v4539_v37 = vadd.f32 %v4538_v15, %v4537_v13  ;;  %v7705_v45 = vadd.f32 %v5833_v63, %v7607_v49  ;;  %v4356_v31 = vpop.f32.mrb[13].mxu0 }
 0x1e7   : > { %v7710_v34 = vadd.f32 %v4356_v31, %v7609_v35 }
 0x1e8   : > { %4500 = vst.msk [vmem:[%s7620_s27 + $0x68] sm:$0xff] %vm1141_vm0, %v7705_v45  ;;  %v4541_v2 = vadd.f32 %v4540_v30, %v4539_v37  ;;  %v4544_v59 = vsel %vm1141_vm0, %v7705_v45, 0.0 }
 0x1e9   : > { %4499 = vst.msk [vmem:[%s7620_s27 + $0x60] sm:$0xff] %vm1141_vm0, %v7710_v34  ;;  %v4542_v52 = vsel %vm1141_vm0, %v7710_v34, 0.0  ;;  %v5639_v50 = vpop.f32.mrb[16].mxu1  ;;  %v5836_v56 = vpop.f32.mrb[14].mxu0 }
 0x1ea   : > { %v4543_v0 = vadd.f32 %v4542_v52, %v4541_v2  ;;  %v7721_v5 = vadd.f32 %v5836_v56, %v7611_v17  ;;  %v2961_v46 = vpop.f32.mrb[17].mxu1  ;;  %v4366_v44 = vpop.f32.mrb[15].mxu0 }
 0x1eb   : > { %v7726_v27 = vadd.f32 %v4366_v44, %v7613_v51 }
 0x1ec   : > { %4502 = vst.msk [vmem:[%s7620_s27 + $0x78] sm:$0xff] %vm1141_vm0, %v7721_v5  ;;  %v4545_v49 = vadd.f32 %v4544_v59, %v4543_v0  ;;  %v4548_v51 = vsel %vm1141_vm0, %v7721_v5, 0.0 }
 0x1ed   : > { %4501 = vst.msk [vmem:[%s7620_s27 + $0x70] sm:$0xff] %vm1141_vm0, %v7726_v27  ;;  %v4546_v35 = vsel %vm1141_vm0, %v7726_v27, 0.0  ;;  %v5642_v17 = vpop.f32.mrb[18].mxu1  ;;  %v5839_v16 = vpop.f32.mrb[16].mxu0 }
 0x1ee   : > { %v4547_v61 = vadd.f32 %v4546_v35, %v4545_v49  ;;  %v7736_v41 = vadd.f32 %v5839_v16, %v5639_v50  ;;  %v2971_v62 = vpop.f32.mrb[19].mxu1  ;;  %v4376_v12 = vpop.f32.mrb[17].mxu0 }
 0x1ef   : > { %v7740_v7 = vadd.f32 %v4376_v12, %v2961_v46 }
 0x1f0   : > { %4504 = vst.msk [vmem:[%s7620_s27 + $0x88] sm:$0xff] %vm1141_vm0, %v7736_v41  ;;  %v4549_v14 = vadd.f32 %v4548_v51, %v4547_v61  ;;  %v4552_v9 = vsel %vm1141_vm0, %v7736_v41, 0.0 }
 0x1f1   : > { %4503 = vst.msk [vmem:[%s7620_s27 + $0x80] sm:$0xff] %vm1141_vm0, %v7740_v7  ;;  %v4550_v4 = vsel %vm1141_vm0, %v7740_v7, 0.0  ;;  %v5645_v39 = vpop.f32.mrb[20].mxu1  ;;  %v5842_v47 = vpop.f32.mrb[18].mxu0 }
 0x1f2   : > { %v4551_v57 = vadd.f32 %v4550_v4, %v4549_v14  ;;  %v7750_v54 = vadd.f32 %v5842_v47, %v5642_v17  ;;  %v2981_v10 = vpop.f32.mrb[21].mxu1  ;;  %v4386_v32 = vpop.f32.mrb[19].mxu0 }
 0x1f3   : > { %v7754_v6 = vadd.f32 %v4386_v32, %v2971_v62 }
 0x1f4   : > { %4506 = vst.msk [vmem:[%s7620_s27 + $0x98] sm:$0xff] %vm1141_vm0, %v7750_v54  ;;  %v4553_v1 = vadd.f32 %v4552_v9, %v4551_v57  ;;  %v4556_v36 = vsel %vm1141_vm0, %v7750_v54, 0.0 }
 0x1f5   : > { %4505 = vst.msk [vmem:[%s7620_s27 + $0x90] sm:$0xff] %vm1141_vm0, %v7754_v6  ;;  %v4554_v21 = vsel %vm1141_vm0, %v7754_v6, 0.0  ;;  %v5648_v38 = vpop.f32.mrb[22].mxu1  ;;  %v5845_v29 = vpop.f32.mrb[20].mxu0 }
 0x1f6   : > { %v4555_v25 = vadd.f32 %v4554_v21, %v4553_v1  ;;  %v7764_v18 = vadd.f32 %v5845_v29, %v5645_v39  ;;  %v2991_v40 = vpop.f32.mrb[23].mxu1  ;;  %v4396_v8 = vpop.f32.mrb[21].mxu0 }
 0x1f7   : > { %v7768_v53 = vadd.f32 %v4396_v8, %v2981_v10 }
 0x1f8   : > { %4508 = vst.msk [vmem:[%s7620_s27 + $0xa8] sm:$0xff] %vm1141_vm0, %v7764_v18  ;;  %v4557_v20 = vadd.f32 %v4556_v36, %v4555_v25  ;;  %v4560_v31 = vsel %vm1141_vm0, %v7764_v18, 0.0 }
 0x1f9   : > { %4507 = vst.msk [vmem:[%s7620_s27 + $0xa0] sm:$0xff] %vm1141_vm0, %v7768_v53  ;;  %v4558_v3 = vsel %vm1141_vm0, %v7768_v53, 0.0  ;;  %v5651_v60 = vpop.f32.mrb[24].mxu1  ;;  %v5848_v55 = vpop.f32.mrb[22].mxu0 }
 0x1fa   : > { %v4559_v13 = vadd.f32 %v4558_v3, %v4557_v20  ;;  %v7778_v15 = vadd.f32 %v5848_v55, %v5648_v38  ;;  %v3001_v63 = vpop.f32.mrb[25].mxu1  ;;  %v4406_v37 = vpop.f32.mrb[23].mxu0 }
 0x1fb   : > { %v7782_v30 = vadd.f32 %v4406_v37, %v2991_v40 }
 0x1fc   : > { %4510 = vst.msk [vmem:[%s7620_s27 + $0xb8] sm:$0xff] %vm1141_vm0, %v7778_v15  ;;  %v4561_v2 = vadd.f32 %v4560_v31, %v4559_v13  ;;  %v4564_v49 = vsel %vm1141_vm0, %v7778_v15, 0.0 }
 0x1fd   : > { %4509 = vst.msk [vmem:[%s7620_s27 + $0xb0] sm:$0xff] %vm1141_vm0, %v7782_v30  ;;  %v4562_v52 = vsel %vm1141_vm0, %v7782_v30, 0.0  ;;  %v5654_v50 = vpop.f32.mrb[26].mxu1  ;;  %v5851_v56 = vpop.f32.mrb[24].mxu0 }
 0x1fe   : > { %v4563_v0 = vadd.f32 %v4562_v52, %v4561_v2  ;;  %v7792_v46 = vadd.f32 %v5851_v56, %v5651_v60  ;;  %v3011_v44 = vpop.f32.mrb[27].mxu1  ;;  %v4416_v59 = vpop.f32.mrb[25].mxu0 }
 0x1ff   : > { %v7796_v35 = vadd.f32 %v4416_v59, %v3001_v63 }
 0x200   : > { %4512 = vst.msk [vmem:[%s7620_s27 + $0xc8] sm:$0xff] %vm1141_vm0, %v7792_v46  ;;  %v4565_v17 = vadd.f32 %v4564_v49, %v4563_v0  ;;  %v4568_v39 = vsel %vm1141_vm0, %v7792_v46, 0.0 }
 0x201   : > { %4511 = vst.msk [vmem:[%s7620_s27 + $0xc0] sm:$0xff] %vm1141_vm0, %v7796_v35  ;;  %v4566_v16 = vsel %vm1141_vm0, %v7796_v35, 0.0  ;;  %v5657_v61 = vpop.f32.mrb[28].mxu1  ;;  %v5854_v62 = vpop.f32.mrb[26].mxu0 }
 0x202   : > { %v4567_v12 = vadd.f32 %v4566_v16, %v4565_v17  ;;  %v7806_v51 = vadd.f32 %v5854_v62, %v5654_v50  ;;  %v3021_v14 = vpop.f32.mrb[29].mxu1  ;;  %v4426_v4 = vpop.f32.mrb[27].mxu0 }
 0x203   : > { %v7810_v47 = vadd.f32 %v4426_v4, %v3011_v44 }
 0x204   : > { %4514 = vst.msk [vmem:[%s7620_s27 + $0xd8] sm:$0xff] %vm1141_vm0, %v7806_v51  ;;  %v4569_v57 = vadd.f32 %v4568_v39, %v4567_v12  ;;  %v4572_v25 = vsel %vm1141_vm0, %v7806_v51, 0.0 }
 0x205   : > { %4513 = vst.msk [vmem:[%s7620_s27 + $0xd0] sm:$0xff] %vm1141_vm0, %v7810_v47  ;;  %v4570_v10 = vsel %vm1141_vm0, %v7810_v47, 0.0  ;;  %v5660_v32 = vpop.f32.mrb[30].mxu1  ;;  %v5857_v9 = vpop.f32.mrb[28].mxu0 }
 0x206   : > { %v4571_v1 = vadd.f32 %v4570_v10, %v4569_v57  ;;  %v7820_v21 = vadd.f32 %v5857_v9, %v5657_v61  ;;  %v3031_v38 = vpop.f32.mrb[31].mxu1  ;;  %v4436_v29 = vpop.f32.mrb[29].mxu0 }
 0x207   : > { %v7824_v40 = vadd.f32 %v4436_v29, %v3021_v14 }
 0x208   : > { %4516 = vst.msk [vmem:[%s7620_s27 + $0xe8] sm:$0xff] %vm1141_vm0, %v7820_v21  ;;  %v4573_v8 = vadd.f32 %v4572_v25, %v4571_v1  ;;  %v4576_v13 = vsel %vm1141_vm0, %v7820_v21, 0.0 }
 0x209   : > { %4515 = vst.msk [vmem:[%s7620_s27 + $0xe0] sm:$0xff] %vm1141_vm0, %v7824_v40  ;;  %v4574_v36 = vsel %vm1141_vm0, %v7824_v40, 0.0  ;;  %v5860_v20 = vpop.f32.mrb[30].mxu0 }
 0x20a   : > { %v4575_v3 = vadd.f32 %v4574_v36, %v4573_v8  ;;  %v7834_v60 = vadd.f32 %v5860_v20, %v5660_v32  ;;  %v4446_v55 = vpop.f32.mrb[31].mxu0 }
 0x20b   : > { %v7838_v63 = vadd.f32 %v4446_v55, %v3031_v38 }
 0x20c   : > { %4518 = vst.msk [vmem:[%s7620_s27 + $0xf8] sm:$0xff] %vm1141_vm0, %v7834_v60  ;;  %v4577_v37 = vadd.f32 %v4576_v13, %v4575_v3  ;;  %v4580_v52 = vsel %vm1141_vm0, %v7834_v60, 0.0 }
 0x20d   : > { %4517 = vst.msk [vmem:[%s7620_s27 + $0xf0] sm:$0xff] %vm1141_vm0, %v7838_v63  ;;  %v4578_v31 = vsel %vm1141_vm0, %v7838_v63, 0.0 }
 0x20e   : > { %v4579_v2 = vadd.f32 %v4578_v31, %v4577_v37 }
 0x210   : > { %v4581_v50 = vadd.f32 %v4580_v52, %v4579_v2 }
 0x212   : > { %v4582_v56 = vrot.slane %v4581_v50, 4 }
 0x214   : > { %v4583_v0 = vadd.f32 %v4582_v56, %v4581_v50 }
 0x216   : > { %v4584_v44 = vrot.slane %v4583_v0, 2 }
 0x218   : > { %v4585_v59 = vadd.f32 %v4584_v44, %v4583_v0 }
 0x21a   : > { %v4586_v49 = vrot.slane %v4585_v59, 1 }
 0x21c   : > { %v4587_v17 = vadd.f32 %v4586_v49, %v4585_v59 }
 0x21e   : > { %v7850_v16 = vmul.f32 0.00390625, %v4587_v17 }
 0x220   : > { %v4590_v61 = vsub.f32 %v7624_v24, %v7850_v16  ;;  %v4591_v62 = vsub.f32 %v7622_v33, %v7850_v16  ;;  %v4592_v12 = vsub.f32 %v7638_v58, %v7850_v16  ;;  %v4593_v14 = vsub.f32 %v7636_v48, %v7850_v16 }
 0x221   : > { %v4594_v57 = vsub.f32 %v7652_v42, %v7850_v16  ;;  %v4595_v32 = vsub.f32 %v7648_v11, %v7850_v16  ;;  %v4596_v58 = vsub.f32 %v7666_v26, %v7850_v16  ;;  %v4597_v42 = vsub.f32 %v7662_v23, %v7850_v16 }
 0x222   : > { %v4622_v4 = vmul.f32 %v4590_v61, %v4590_v61  ;;  %v4623_v39 = vmul.f32 %v4591_v62, %v4591_v62  ;;  %v4624_v10 = vmul.f32 %v4592_v12, %v4592_v12  ;;  %v4625_v9 = vmul.f32 %v4593_v14, %v4593_v14 }
 0x223   : > { %v4626_v38 = vmul.f32 %v4594_v57, %v4594_v57  ;;  %v4627_v25 = vmul.f32 %v4595_v32, %v4595_v32  ;;  %v4598_v36 = vsub.f32 %v7680_v28, %v7850_v16  ;;  %v4628_v20 = vmul.f32 %v4596_v58, %v4596_v58 }
 0x224   : > { %v4654_v24 = vsel %vm1141_vm0, %v4622_v4, 0.0  ;;  %v4655_v33 = vsel %vm1141_vm0, %v4623_v39, 0.0  ;;  %v4657_v48 = vsel %vm1141_vm0, %v4624_v10, 0.0  ;;  %v4659_v8 = vsel %vm1141_vm0, %v4625_v9, 0.0 }
 0x225   : > { %v4656_v1 = vadd.f32 %v4655_v33, %v4654_v24  ;;  %v4661_v3 = vsel %vm1141_vm0, %v4626_v38, 0.0  ;;  %v4599_v26 = vsub.f32 %v7676_v19, %v7850_v16  ;;  %v4629_v13 = vmul.f32 %v4597_v42, %v4597_v42 }
 0x226   : > { %v4663_v37 = vsel %vm1141_vm0, %v4627_v25, 0.0  ;;  %v4600_v23 = vsub.f32 %v7694_v22, %v7850_v16  ;;  %v4630_v2 = vmul.f32 %v4598_v36, %v4598_v36  ;;  %v4665_v52 = vsel %vm1141_vm0, %v4628_v20, 0.0 }
 0x227   : > { %v4658_v29 = vadd.f32 %v4657_v48, %v4656_v1  ;;  %v4601_v28 = vsub.f32 %v7690_v43, %v7850_v16  ;;  %v4631_v56 = vmul.f32 %v4599_v26, %v4599_v26  ;;  %v4667_v0 = vsel %vm1141_vm0, %v4629_v13, 0.0 }
 0x228   : > { %v4602_v19 = vsub.f32 %v7710_v34, %v7850_v16  ;;  %v4632_v59 = vmul.f32 %v4600_v23, %v4600_v23  ;;  %v4669_v49 = vsel %vm1141_vm0, %v4630_v2, 0.0  ;;  %v4603_v22 = vsub.f32 %v7705_v45, %v7850_v16 }
 0x229   : > { %v4660_v11 = vadd.f32 %v4659_v8, %v4658_v29  ;;  %v4633_v61 = vmul.f32 %v4601_v28, %v4601_v28  ;;  %v4671_v62 = vsel %vm1141_vm0, %v4631_v56, 0.0  ;;  %v4604_v43 = vsub.f32 %v7726_v27, %v7850_v16 }
 0x22a   : > { %v4634_v14 = vmul.f32 %v4602_v19, %v4602_v19  ;;  %v4673_v4 = vsel %vm1141_vm0, %v4632_v59, 0.0  ;;  %v4605_v34 = vsub.f32 %v7721_v5, %v7850_v16  ;;  %v4635_v57 = vmul.f32 %v4603_v22, %v4603_v22 }
 0x22b   : > { %v4662_v55 = vadd.f32 %v4661_v3, %v4660_v11  ;;  %v4675_v10 = vsel %vm1141_vm0, %v4633_v61, 0.0  ;;  %v4606_v45 = vsub.f32 %v7740_v7, %v7850_v16  ;;  %v4636_v9 = vmul.f32 %v4604_v43, %v4604_v43 }
 0x22c   : > { %v4677_v24 = vsel %vm1141_vm0, %v4634_v14, 0.0  ;;  %v4607_v27 = vsub.f32 %v7736_v41, %v7850_v16  ;;  %v4637_v1 = vmul.f32 %v4605_v34, %v4605_v34  ;;  %v4679_v58 = vsel %vm1141_vm0, %v4635_v57, 0.0 }
 0x22d   : > { %v4664_v31 = vadd.f32 %v4663_v37, %v4662_v55  ;;  %v4608_v5 = vsub.f32 %v7754_v6, %v7850_v16  ;;  %v4638_v48 = vmul.f32 %v4606_v45, %v4606_v45  ;;  %v4681_v29 = vsel %vm1141_vm0, %v4636_v9, 0.0 }
 0x22e   : > { %v4609_v7 = vsub.f32 %v7750_v54, %v7850_v16  ;;  %v4639_v25 = vmul.f32 %v4607_v27, %v4607_v27  ;;  %v4683_v8 = vsel %vm1141_vm0, %v4637_v1, 0.0  ;;  %v4610_v41 = vsub.f32 %v7768_v53, %v7850_v16 }
 0x22f   : > { %v4666_v50 = vadd.f32 %v4665_v52, %v4664_v31  ;;  %v4640_v36 = vmul.f32 %v4608_v5, %v4608_v5  ;;  %v4685_v20 = vsel %vm1141_vm0, %v4638_v48, 0.0  ;;  %v4611_v6 = vsub.f32 %v7764_v18, %v7850_v16 }
 0x230   : > { %v4641_v55 = vmul.f32 %v4609_v7, %v4609_v7  ;;  %v4687_v26 = vsel %vm1141_vm0, %v4639_v25, 0.0  ;;  %v4612_v54 = vsub.f32 %v7782_v30, %v7850_v16  ;;  %v4642_v37 = vmul.f32 %v4610_v41, %v4610_v41 }
 0x231   : > { %v4668_v44 = vadd.f32 %v4667_v0, %v4666_v50  ;;  %v4689_v31 = vsel %vm1141_vm0, %v4640_v36, 0.0  ;;  %v4613_v53 = vsub.f32 %v7778_v15, %v7850_v16  ;;  %v4643_v2 = vmul.f32 %v4611_v6, %v4611_v6 }
 0x232   : > { %v4691_v52 = vsel %vm1141_vm0, %v4641_v55, 0.0  ;;  %v4614_v18 = vsub.f32 %v7796_v35, %v7850_v16  ;;  %v4644_v28 = vmul.f32 %v4612_v54, %v4612_v54  ;;  %v4693_v56 = vsel %vm1141_vm0, %v4642_v37, 0.0 }
 0x233   : > { %v4670_v17 = vadd.f32 %v4669_v49, %v4668_v44  ;;  %v4615_v30 = vsub.f32 %v7792_v46, %v7850_v16  ;;  %v4645_v44 = vmul.f32 %v4613_v53, %v4613_v53  ;;  %v4695_v19 = vsel %vm1141_vm0, %v4643_v2, 0.0 }
 0x234   : > { %v4616_v15 = vsub.f32 %v7810_v47, %v7850_v16  ;;  %v4646_v49 = vmul.f32 %v4614_v18, %v4614_v18  ;;  %v4617_v35 = vsub.f32 %v7806_v51, %v7850_v16  ;;  %v4618_v46 = vsub.f32 %v7824_v40, %v7850_v16 }
 0x235   : > { %v4672_v12 = vadd.f32 %v4671_v62, %v4670_v17  ;;  %v4697_v17 = vsel %vm1141_vm0, %v4644_v28, 0.0  ;;  %v4647_v61 = vmul.f32 %v4615_v30, %v4615_v30  ;;  %v4699_v62 = vsel %vm1141_vm0, %v4645_v44, 0.0 }
 0x236   : > { %v4648_v43 = vmul.f32 %v4616_v15, %v4616_v15  ;;  %v4701_v14 = vsel %vm1141_vm0, %v4646_v49, 0.0  ;;  %v4619_v47 = vsub.f32 %v7820_v21, %v7850_v16  ;;  %v4620_v51 = vsub.f32 %v7838_v63, %v7850_v16 }
 0x237   : > { %v4674_v39 = vadd.f32 %v4673_v4, %v4672_v12  ;;  %v4703_v34 = vsel %vm1141_vm0, %v4647_v61, 0.0  ;;  %v4621_v40 = vsub.f32 %v7834_v60, %v7850_v16 }
 0x238   : > { %v4651_v9 = vmul.f32 %v4619_v47, %v4619_v47  ;;  %v4652_v21 = vmul.f32 %v4620_v51, %v4620_v51 }
 0x239   : > { %v4676_v32 = vadd.f32 %v4675_v10, %v4674_v39  ;;  %v4649_v39 = vmul.f32 %v4617_v35, %v4617_v35  ;;  %v4650_v10 = vmul.f32 %v4618_v46, %v4618_v46 }
 0x23a   : > { %v4713_v5 = vsel %vm1141_vm0, %v4652_v21, 0.0 }
 0x23b   : > { %v4678_v33 = vadd.f32 %v4677_v24, %v4676_v32  ;;  %v4705_v32 = vsel %vm1141_vm0, %v4648_v43, 0.0  ;;  %v4707_v24 = vsel %vm1141_vm0, %v4649_v39, 0.0  ;;  %v4709_v27 = vsel %vm1141_vm0, %v4650_v10, 0.0 }
 0x23d   : > { %v4680_v38 = vadd.f32 %v4679_v58, %v4678_v33  ;;  %v4653_v58 = vmul.f32 %v4621_v40, %v4621_v40 }
 0x23f   : > { %v4682_v42 = vadd.f32 %v4681_v29, %v4680_v38  ;;  %v4711_v38 = vsel %vm1141_vm0, %v4651_v9, 0.0  ;;  %v4715_v29 = vsel %vm1141_vm0, %v4653_v58, 0.0 }
 0x241   : > { %v4684_v11 = vadd.f32 %v4683_v8, %v4682_v42 }
 0x243   : > { %v4686_v3 = vadd.f32 %v4685_v20, %v4684_v11 }
 0x245   : > { %v4688_v13 = vadd.f32 %v4687_v26, %v4686_v3 }
 0x247   : > { %v4690_v23 = vadd.f32 %v4689_v31, %v4688_v13 }
 0x249   : > { %v4692_v50 = vadd.f32 %v4691_v52, %v4690_v23 }
 0x24b   : > { %v4694_v0 = vadd.f32 %v4693_v56, %v4692_v50 }
 0x24d   : > { %v4696_v59 = vadd.f32 %v4695_v19, %v4694_v0 }
 0x24f   : > { %v4698_v22 = vadd.f32 %v4697_v17, %v4696_v59 }
 0x251   : > { %v4700_v12 = vadd.f32 %v4699_v62, %v4698_v22 }
 0x253   : > { %v4702_v4 = vadd.f32 %v4701_v14, %v4700_v12 }
 0x255   : > { %v4704_v57 = vadd.f32 %v4703_v34, %v4702_v4 }
 0x257   : > { %v4706_v45 = vadd.f32 %v4705_v32, %v4704_v57 }
 0x259   : > { %v4708_v33 = vadd.f32 %v4707_v24, %v4706_v45 }
 0x25b   : > { %v4710_v1 = vadd.f32 %v4709_v27, %v4708_v33 }
 0x25d   : > { %v4712_v63 = vadd.f32 %v4711_v38, %v4710_v1 }
 0x25f   : > { %v4714_v48 = vadd.f32 %v4713_v5, %v4712_v63 }
 0x261   : > { %v4716_v42 = vadd.f32 %v4715_v29, %v4714_v48 }
 0x263   : > { %v4717_v60 = vrot.slane %v4716_v42, 4 }
 0x265   : > { %v4718_v7 = vadd.f32 %v4717_v60, %v4716_v42 }
 0x267   : > { %v4719_v25 = vrot.slane %v4718_v7, 2 }
 0x269   : > { %v4720_v8 = vadd.f32 %v4719_v25, %v4718_v7 }
 0x26b   : > { %v4721_v11 = vrot.slane %v4720_v8, 1 }
 0x26d   : > { %v4722_v41 = vadd.f32 %v4721_v11, %v4720_v8 }
 0x26f   : > { %v4723_v36 = vsel %vm825_vm7, %v7850_v16, %v4722_v41 }
 0x270   : > { %4725 = vst.msk [vmem:[%s235_s6] sm:$0x3] %vm4724_vm2, %v4723_v36 }
 0x271 PF: > { %s16_s18 = sadd.s32 1, %s6135_s18  }
 0x272   : > { %p13_p4 = scmp.ge.s32.totalorder %s16_s18, 4  }
 0x274   :  { %15 = sbr.rel (!%p13_p4) target bundleno = 1 (0x1), region = 86 }

</bundles_post_ra>
